<compile_context>
chip_gen: v5e
topology: v5e:2x2
jax: 0.10.0
libtpu: 0.0.40
codegen_flags: <defaults>
</compile_context>

<pallas_src>
import functools

import jax
import jax.numpy as jnp
from jax.experimental import pallas as pl
from jax.experimental.pallas import tpu as pltpu


# ----------------------------------------------------------------------------- config helpers
def _probe_weight_buffers():
    """1 if single-buffered resident specs (pipeline_mode=pl.Buffered(1)) are constructible,
    else 2.  The VMEM budget below uses this count, so a fallback never silently over-commits
    VMEM (perf-review item)."""
    try:
        pl.BlockSpec((8, 128), lambda i: (0, 0), pipeline_mode=pl.Buffered(1))
        return 1
    except Exception:
        return 2


_WEIGHT_BUFFERS = _probe_weight_buffers()


def _resident_spec(block_shape, index_map):
    """BlockSpec for grid-invariant operands (weights/biases)."""
    if _WEIGHT_BUFFERS == 1:
        return pl.BlockSpec(block_shape, index_map, pipeline_mode=pl.Buffered(1))
    return pl.BlockSpec(block_shape, index_map)


def _vmem_budget_bytes():
    """Per-core VMEM budget with headroom (v7x: ~48 MiB, v5e/v6e: ~112 MiB)."""
    try:
        cap = int(pltpu.get_tpu_info().vmem_capacity_bytes)
    except Exception:
        cap = 64 * 1024 * 1024  # conservative: assume v7x-sized per-core VMEM
    return max(32 * 1024 * 1024, min(cap - 16 * 1024 * 1024, 112 * 1024 * 1024))


def _round_up(v, m):
    return -(-v // m) * m


def _choose_time_block(t, nb, hidden, budget_bytes):
    """Largest recurrence time block that fits the VMEM budget (capped at 32)."""
    g = 3 * hidden
    fixed = _WEIGHT_BUFFERS * hidden * g * 2        # W_hh^T (bf16), resident
    fixed += 8 * hidden * 4                          # b_hh_n (sublane-padded)
    fixed += nb * hidden * 4                         # hidden-state carry scratch
    per_step = 2 * nb * (g * 2 + hidden * 4)         # double-buffered GI(bf16) + y(f32)
    avail = int(budget_bytes * 0.9) - fixed
    tb = avail // per_step if per_step > 0 else t
    return int(max(1, min(tb, 32, t)))


def _choose_row_block(rows, feat, hidden, budget_bytes):
    """Largest phase-1 row block (multiple of 16, divides rows) that fits the budget."""
    g = 3 * hidden
    fixed = _WEIGHT_BUFFERS * feat * g * 2           # W_ih^T (bf16), resident
    fixed += 8 * g * 4                               # folded bias (sublane-padded)
    per_row = 2 * (feat * 4 + g * 2)                 # double-buffered x(f32) + GI(bf16)
    avail = int(budget_bytes * 0.9) - fixed
    cap = max(16, avail // per_row) if per_row > 0 else rows
    for cand in (1024, 512, 256, 128, 64, 32, 16):
        if cand <= cap and rows % cand == 0:
            return cand
    return 16  # rows is always a multiple of 16 (N padded to a multiple of 16)


# ----------------------------------------------------------------------------- kernels
def _input_proj_kernel(x_ref, w_ref, b_ref, gi_ref):
    """GI block = x_block @ W_ih^T + folded biases (f32 accumulate), stored as bf16."""
    xb = x_ref[...].astype(jnp.bfloat16)                                   # (Rb, F)
    acc = jnp.dot(xb, w_ref[...], preferred_element_type=jnp.float32)      # (Rb, 3H) f32
    gi_ref[...] = (acc + b_ref[...]).astype(gi_ref.dtype)                  # bf16


def _gru_recurrence_kernel(gi_ref, whh_ref, bhn_ref, y_ref, h_ref, *, hidden, t_block):
    """One grid step == t_block GRU time steps for one batch block.

    Blocks are time-major: gi_ref (tb, Nb, 3H) bf16, y_ref (tb, Nb, H) f32, so the
    per-timestep slices gi_ref[j] / y_ref[j] are dense (8,128)-tiled loads/stores.
    The hidden state is carried across time grid steps in VMEM scratch."""
    ti = pl.program_id(1)

    @pl.when(ti == 0)
    def _():
        # PyTorch GRU default initial hidden state is zeros (per batch block).
        h_ref[...] = jnp.zeros_like(h_ref)

    H = hidden
    nb = h_ref.shape[0]
    w = whh_ref[...]                                        # (H, 3H) bf16, VMEM-resident
    b_hn = jnp.broadcast_to(bhn_ref[...], (nb, H))          # hoisted out of the time loop

    def step(j, h):
        gi = gi_ref[j].astype(jnp.float32)                  # (Nb, 3H), dense load
        gh = jnp.dot(h.astype(jnp.bfloat16), w,
                     preferred_element_type=jnp.float32)    # (Nb, 3H) f32
        r = jax.nn.sigmoid(gi[:, 0:H] + gh[:, 0:H])
        z = jax.nn.sigmoid(gi[:, H:2 * H] + gh[:, H:2 * H])
        c = jnp.tanh(gi[:, 2 * H:3 * H] + r * (gh[:, 2 * H:3 * H] + b_hn))
        h_new = c + z * (h - c)                             # == (1 - z) * c + z * h
        y_ref[j] = h_new.astype(y_ref.dtype)                # dense store
        return h_new

    h_ref[...] = jax.lax.fori_loop(0, t_block, step, h_ref[...], unroll=True)


# ----------------------------------------------------------------------------- wrapper
def temporal_encoder_forward(x, params, *, use_residual=True, batch_blocks=1, t_block=None):
    """x: (N, T, F) float32 -> (N, T, H) float32.

    batch_blocks: number of batch-wise grid blocks on the recurrence's leading "parallel"
    axis; set to 2 on TPU v7x so the serial recurrence is split across both TensorCores.
    """
    n, t, f = x.shape
    w_ih, w_hh, b_ih, b_hh = params
    hidden = w_hh.shape[1]
    g = 3 * hidden
    assert w_ih.shape == (g, f), w_ih.shape
    assert w_hh.shape == (g, hidden), w_hh.shape
    assert b_ih.shape == (g,) and b_hh.shape == (g,)
    assert batch_blocks >= 1

    budget = _vmem_budget_bytes()

    x = x.astype(jnp.float32)
    w_ih_t = jnp.transpose(w_ih).astype(jnp.bfloat16)       # (F, 3H)
    w_hh_t = jnp.transpose(w_hh).astype(jnp.bfloat16)       # (H, 3H)
    b_ih = b_ih.astype(jnp.float32)
    b_hh = b_hh.astype(jnp.float32)
    # Fold b_ih (all gates) + b_hh_{r,z} into the hoisted input projection; only b_hh_n must
    # stay inside the r * (.) term on the serial path.
    b_fold = jnp.concatenate([
        b_ih[0:hidden] + b_hh[0:hidden],
        b_ih[hidden:2 * hidden] + b_hh[hidden:2 * hidden],
        b_ih[2 * hidden:3 * hidden],
    ]).reshape(1, g)
    b_hn = b_hh[2 * hidden:3 * hidden].reshape(1, hidden)

    # ---- padding: N to a multiple of 16*batch_blocks (bf16 sublane tiling), T to tb ----
    n_mult = 16 * batch_blocks
    n_pad = _round_up(n, n_mult)
    nb = n_pad // batch_blocks

    tb = t_block if t_block is not None else _choose_time_block(t, nb, hidden, budget)
    tb = int(max(1, min(tb, t)))
    t_pad = _round_up(t, tb)

    x_tm = jnp.transpose(x, (1, 0, 2))                      # (T, N, F) time-major
    if (t_pad, n_pad) != (t, n):
        x_tm = jnp.pad(x_tm, ((0, t_pad - t), (0, n_pad - n), (0, 0)))

    # ---------- phase 1: hoisted input projection (parallel, big MXU matmul) ----------
    rows = t_pad * n_pad
    x2 = x_tm.reshape(rows, f)                              # free row-major collapse
    rb = _choose_row_block(rows, f, hidden, budget)
    gi2 = pl.pallas_call(
        _input_proj_kernel,
        out_shape=jax.ShapeDtypeStruct((rows, g), jnp.bfloat16),   # bf16 GI: half the HBM
        grid_spec=pltpu.PrefetchScalarGridSpec(
            num_scalar_prefetch=0,
            grid=(rows // rb,),
            in_specs=[
                pl.BlockSpec((rb, f), lambda i: (i, 0)),            # x rows (f32)
                _resident_spec((f, g), lambda i: (0, 0)),           # W_ih^T (bf16)
                _resident_spec((1, g), lambda i: (0, 0)),           # folded biases (f32)
            ],
            out_specs=pl.BlockSpec((rb, g), lambda i: (i, 0)),
        ),
        compiler_params=pltpu.CompilerParams(
            dimension_semantics=("parallel",),
            vmem_limit_bytes=budget),
    )(x2, w_ih_t, b_fold)
    gi = gi2.reshape(t_pad, n_pad, g)                       # (T, N, 3H) time-major, bf16

    # ---------- phase 2: serial GRU recurrence over (batch block, time block) ----------
    kernel = functools.partial(_gru_recurrence_kernel, hidden=hidden, t_block=tb)
    y_tm = pl.pallas_call(
        kernel,
        out_shape=jax.ShapeDtypeStruct((t_pad, n_pad, hidden), jnp.float32),
        grid_spec=pltpu.PrefetchScalarGridSpec(
            num_scalar_prefetch=0,
            grid=(batch_blocks, t_pad // tb),
            in_specs=[
                pl.BlockSpec((tb, nb, g), lambda b, ti: (ti, b, 0)),      # GI block (bf16)
                _resident_spec((hidden, g), lambda b, ti: (0, 0)),        # W_hh^T (bf16)
                _resident_spec((1, hidden), lambda b, ti: (0, 0)),        # b_hh_n (f32)
            ],
            out_specs=pl.BlockSpec((tb, nb, hidden), lambda b, ti: (ti, b, 0)),
            scratch_shapes=[pltpu.VMEM((nb, hidden), jnp.float32)],       # hidden-state carry
        ),
        compiler_params=pltpu.CompilerParams(
            dimension_semantics=("parallel", "arbitrary"),   # batch || , time = recurrence
            vmem_limit_bytes=budget),
    )(gi, w_hh_t, b_hn)

    # Residual + transpose back to batch-major: done by XLA, fully parallel, off the
    # serial recurrence path (also keeps x out of the recurrence kernel's VMEM/DMA budget).
    y = jnp.transpose(y_tm[:t, :n, :], (1, 0, 2))
    if use_residual and hidden == f:                         # mirrors the PyTorch gate
        y = y + x
    return y


# ----------------------------------------------------------------------------- reference
def _reference_forward(x, params, use_residual=True):
    """Pure-JAX reference using the same numeric recipe (bf16 operands / bf16 GI / f32 state)."""
    w_ih, w_hh, b_ih, b_hh = params
    H = w_hh.shape[1]
    n, t, f = x.shape
    x = x.astype(jnp.float32)
    w_ih_t = jnp.transpose(w_ih).astype(jnp.bfloat16)
    w_hh_t = jnp.transpose(w_hh).astype(jnp.bfloat16)
    b_ih = b_ih.astype(jnp.float32)
    b_hh = b_hh.astype(jnp.float32)
    b_fold = jnp.concatenate([b_ih[:H] + b_hh[:H],
                              b_ih[H:2 * H] + b_hh[H:2 * H],
                              b_ih[2 * H:]])
    b_hn = b_hh[2 * H:]

    gi = (jnp.dot(x.reshape(n * t, f).astype(jnp.bfloat16), w_ih_t,
                  preferred_element_type=jnp.float32) + b_fold)
    gi = gi.astype(jnp.bfloat16).reshape(n, t, 3 * H)
    gi_tm = jnp.transpose(gi, (1, 0, 2))

    def cell(h, gi_t):
        gi_f = gi_t.astype(jnp.float32)
        gh = jnp.dot(h.astype(jnp.bfloat16), w_hh_t, preferred_element_type=jnp.float32)
        r = jax.nn.sigmoid(gi_f[:, :H] + gh[:, :H])
        z = jax.nn.sigmoid(gi_f[:, H:2 * H] + gh[:, H:2 * H])
        c = jnp.tanh(gi_f[:, 2 * H:] + r * (gh[:, 2 * H:] + b_hn))
        h_new = c + z * (h - c)
        return h_new, h_new

    h0 = jnp.zeros((n, H), jnp.float32)
    _, y_tm = jax.lax.scan(cell, h0, gi_tm)
    y = jnp.transpose(y_tm, (1, 0, 2))
    if use_residual and H == f:
        y = y + x
    return y


def init_params(key, input_size, hidden_size):
    """PyTorch-style GRU init: U(-1/sqrt(H), 1/sqrt(H))."""
    k = 1.0 / jnp.sqrt(hidden_size)
    k1, k2, k3, k4 = jax.random.split(key, 4)
    w_ih = jax.random.uniform(k1, (3 * hidden_size, input_size), jnp.float32, -k, k)
    w_hh = jax.random.uniform(k2, (3 * hidden_size, hidden_size), jnp.float32, -k, k)
    b_ih = jax.random.uniform(k3, (3 * hidden_size,), jnp.float32, -k, k)
    b_hh = jax.random.uniform(k4, (3 * hidden_size,), jnp.float32, -k, k)
    return w_ih, w_hh, b_ih, b_hh


if __name__ == "__main__":
    # Small shapes consistent with the module (hidden == F so the residual path is taken,
    # like the default TemporalEncoder(2048, 2048)).  N=20 / T=12 / t_block=8 exercise the
    # batch + time padding, the two-batch-block "parallel" axis, and the hidden-state carry
    # across time grid steps.
    N, T, F_DIM, HIDDEN = 20, 12, 128, 128

    key = jax.random.PRNGKey(0)
    kx, kp = jax.random.split(key)
    x = jax.random.normal(kx, (N, T, F_DIM), jnp.float32)
    params = init_params(kp, F_DIM, HIDDEN)

    fwd = jax.jit(functools.partial(temporal_encoder_forward,
                                    use_residual=True, batch_blocks=2, t_block=8))
    y = jax.block_until_ready(fwd(x, params))

    y_ref = _reference_forward(x, params, use_residual=True)
    assert y.shape == (N, T, HIDDEN)
    max_err = float(jnp.max(jnp.abs(y - y_ref)))
    assert max_err < 1e-2, f"mismatch vs reference: max abs err = {max_err}"

    print("KERNEL_OK")
</pallas_src>

<mosaic_0001>
module attributes {stable_mosaic.version = 11 : i64} {
  func.func @_input_proj_kernel(%arg0: i32, %arg1: memref<512x128xf32, #tpu.memory_space<vmem>>, %arg2: memref<128x384xbf16, #tpu.memory_space<vmem>>, %arg3: memref<1x384xf32, #tpu.memory_space<vmem>>, %arg4: memref<512x384xbf16, #tpu.memory_space<vmem>>) attributes {dimension_semantics = [#tpu.dimension_semantics<parallel>], iteration_bounds = array<i64: 1>, scalar_prefetch = 0 : i64, scratch_operands = 0 : i64, tpu.core_type = #tpu.core_type<tc>, window_params = [{transform_indices = @transform_0, window_bounds = array<i64: 512, 128>}, {pipeline_mode = #tpu.pipeline_mode<synchronous>, transform_indices = @transform_1, window_bounds = array<i64: 128, 384>}, {pipeline_mode = #tpu.pipeline_mode<synchronous>, transform_indices = @transform_2, window_bounds = array<i64: 1, 384>}, {transform_indices = @transform_3, window_bounds = array<i64: 512, 384>}]} {
    %c0 = arith.constant 0 : index
    %c0_0 = arith.constant 0 : index
    %0 = vector.load %arg1[%c0, %c0_0] : memref<512x128xf32, #tpu.memory_space<vmem>>, vector<512x128xf32>
    %1 = arith.truncf %0 : vector<512x128xf32> to vector<512x128xbf16>
    %c0_1 = arith.constant 0 : index
    %c0_2 = arith.constant 0 : index
    %2 = vector.load %arg2[%c0_1, %c0_2] : memref<128x384xbf16, #tpu.memory_space<vmem>>, vector<128x384xbf16>
    %cst = arith.constant dense<0.000000e+00> : vector<512x384xf32>
    %3 = tpu.matmul %1, %2, %cst {dimension_numbers = #tpu.dot_dimension_numbers<[1], [0], [0], [1], [0, 0, 1, 1], [], []>} : vector<512x128xbf16>, vector<128x384xbf16>, vector<512x384xf32> -> vector<512x384xf32>
    %c0_3 = arith.constant 0 : index
    %c0_4 = arith.constant 0 : index
    %4 = vector.load %arg3[%c0_3, %c0_4] : memref<1x384xf32, #tpu.memory_space<vmem>>, vector<1x384xf32>
    %5 = vector.broadcast %4 : vector<1x384xf32> to vector<512x384xf32>
    %6 = arith.addf %3, %5 : vector<512x384xf32>
    %7 = arith.truncf %6 : vector<512x384xf32> to vector<512x384xbf16>
    %c0_5 = arith.constant 0 : index
    %c0_6 = arith.constant 0 : index
    %8 = vector.load %arg4[%c0_5, %c0_6] : memref<512x384xbf16, #tpu.memory_space<vmem>>, vector<512x384xbf16>
    tpu.vector_store %arg4[%c0_5, %c0_6], %7 {strides = array<i32>} : memref<512x384xbf16, #tpu.memory_space<vmem>>, vector<512x384xbf16>,
    return
  }
  func.func @transform_0(%arg0: i32) -> (i32, i32) {
    %c0_i32 = arith.constant 0 : i32
    %c0_i32_0 = arith.constant 0 : i32
    return %arg0, %c0_i32 : i32, i32
  }
  func.func @transform_1(%arg0: i32) -> (i32, i32) {
    %c0_i32 = arith.constant 0 : i32
    %c0_i32_0 = arith.constant 0 : i32
    %c0_i32_1 = arith.constant 0 : i32
    return %c0_i32, %c0_i32_0 : i32, i32
  }
  func.func @transform_2(%arg0: i32) -> (i32, i32) {
    %c0_i32 = arith.constant 0 : i32
    %c0_i32_0 = arith.constant 0 : i32
    %c0_i32_1 = arith.constant 0 : i32
    return %c0_i32, %c0_i32_0 : i32, i32
  }
  func.func @transform_3(%arg0: i32) -> (i32, i32) {
    %c0_i32 = arith.constant 0 : i32
    %c0_i32_0 = arith.constant 0 : i32
    return %arg0, %c0_i32 : i32, i32
  }
}

module attributes {stable_mosaic.version = 11 : i64} {
  func.func @_gru_recurrence_kernel(%arg0: i32, %arg1: i32, %arg2: memref<8x16x384xbf16, #tpu.memory_space<vmem>>, %arg3: memref<128x384xbf16, #tpu.memory_space<vmem>>, %arg4: memref<1x128xf32, #tpu.memory_space<vmem>>, %arg5: memref<8x16x128xf32, #tpu.memory_space<vmem>>, %arg6: memref<16x128xf32, #tpu.memory_space<vmem>>) attributes {dimension_semantics = [#tpu.dimension_semantics<parallel>, #tpu.dimension_semantics<arbitrary>], iteration_bounds = array<i64: 2, 2>, scalar_prefetch = 0 : i64, scratch_operands = 1 : i64, tpu.core_type = #tpu.core_type<tc>, window_params = [{transform_indices = @transform_0, window_bounds = array<i64: 8, 16, 384>}, {pipeline_mode = #tpu.pipeline_mode<synchronous>, transform_indices = @transform_1, window_bounds = array<i64: 128, 384>}, {pipeline_mode = #tpu.pipeline_mode<synchronous>, transform_indices = @transform_2, window_bounds = array<i64: 1, 128>}, {transform_indices = @transform_3, window_bounds = array<i64: 8, 16, 128>}]} {
    %c0_i32 = arith.constant 0 : i32
    %0 = arith.cmpi eq, %arg1, %c0_i32 : i32
    %1 = arith.extui %0 : i1 to i32
    %c0_i32_0 = arith.constant 0 : i32
    %2 = arith.cmpi ne, %1, %c0_i32_0 : i32
    scf.if %2 {
      %cst_64 = arith.constant 0.000000e+00 : f32
      %289 = vector.broadcast %cst_64 : f32 to vector<16x128xf32>
      %c0_65 = arith.constant 0 : index
      %c0_66 = arith.constant 0 : index
      %290 = vector.load %arg6[%c0_65, %c0_66] : memref<16x128xf32, #tpu.memory_space<vmem>>, vector<16x128xf32>
      tpu.vector_store %arg6[%c0_65, %c0_66], %289 {strides = array<i32>} : memref<16x128xf32, #tpu.memory_space<vmem>>, vector<16x128xf32>,
    } else {
    }
    %c0 = arith.constant 0 : index
    %c0_1 = arith.constant 0 : index
    %3 = vector.load %arg3[%c0, %c0_1] : memref<128x384xbf16, #tpu.memory_space<vmem>>, vector<128x384xbf16>
    %c0_2 = arith.constant 0 : index
    %c0_3 = arith.constant 0 : index
    %4 = vector.load %arg4[%c0_2, %c0_3] : memref<1x128xf32, #tpu.memory_space<vmem>>, vector<1x128xf32>
    %5 = vector.shape_cast %4 : vector<1x128xf32> to vector<1x128xf32>
    %6 = vector.broadcast %5 : vector<1x128xf32> to vector<16x128xf32>
    %c0_4 = arith.constant 0 : index
    %c0_5 = arith.constant 0 : index
    %7 = vector.load %arg6[%c0_4, %c0_5] : memref<16x128xf32, #tpu.memory_space<vmem>>, vector<16x128xf32>
    %c0_i32_6 = arith.constant 0 : i32
    %8 = arith.index_cast %c0_i32_6 : i32 to index
    %c0_7 = arith.constant 0 : index
    %c0_8 = arith.constant 0 : index
    %9 = vector.load %arg2[%8, %c0_7, %c0_8] : memref<8x16x384xbf16, #tpu.memory_space<vmem>>, vector<1x16x384xbf16>
    %10 = vector.shape_cast %9 : vector<1x16x384xbf16> to vector<16x384xbf16>
    %11 = arith.extf %10 : vector<16x384xbf16> to vector<16x384xf32>
    %12 = arith.truncf %7 : vector<16x128xf32> to vector<16x128xbf16>
    %cst = arith.constant dense<0.000000e+00> : vector<16x384xf32>
    %13 = tpu.matmul %12, %3, %cst {dimension_numbers = #tpu.dot_dimension_numbers<[1], [0], [0], [1], [0, 0, 1, 1], [], []>} : vector<16x128xbf16>, vector<128x384xbf16>, vector<16x384xf32> -> vector<16x384xf32>
    %14 = vector.extract_strided_slice %11 {offsets = [0, 0], sizes = [16, 128], strides = [1, 1]} : vector<16x384xf32> to vector<16x128xf32>
    %15 = vector.extract_strided_slice %13 {offsets = [0, 0], sizes = [16, 128], strides = [1, 1]} : vector<16x384xf32> to vector<16x128xf32>
    %16 = arith.addf %14, %15 : vector<16x128xf32>
    %17 = arith.negf %16 : vector<16x128xf32>
    %18 = math.exp %17 : vector<16x128xf32>
    %cst_9 = arith.constant 1.000000e+00 : f32
    %19 = vector.broadcast %cst_9 : f32 to vector<16x128xf32>
    %20 = arith.addf %19, %18 : vector<16x128xf32>
    %21 = arith.divf %19, %20 : vector<16x128xf32>
    %22 = vector.extract_strided_slice %11 {offsets = [0, 128], sizes = [16, 128], strides = [1, 1]} : vector<16x384xf32> to vector<16x128xf32>
    %23 = vector.extract_strided_slice %13 {offsets = [0, 128], sizes = [16, 128], strides = [1, 1]} : vector<16x384xf32> to vector<16x128xf32>
    %24 = arith.addf %22, %23 : vector<16x128xf32>
    %25 = arith.negf %24 : vector<16x128xf32>
    %26 = math.exp %25 : vector<16x128xf32>
    %cst_10 = arith.constant 1.000000e+00 : f32
    %27 = vector.broadcast %cst_10 : f32 to vector<16x128xf32>
    %28 = arith.addf %27, %26 : vector<16x128xf32>
    %29 = arith.divf %27, %28 : vector<16x128xf32>
    %30 = vector.extract_strided_slice %11 {offsets = [0, 256], sizes = [16, 128], strides = [1, 1]} : vector<16x384xf32> to vector<16x128xf32>
    %31 = vector.extract_strided_slice %13 {offsets = [0, 256], sizes = [16, 128], strides = [1, 1]} : vector<16x384xf32> to vector<16x128xf32>
    %32 = arith.addf %31, %6 : vector<16x128xf32>
    %33 = arith.mulf %21, %32 : vector<16x128xf32>
    %34 = arith.addf %30, %33 : vector<16x128xf32>
    %35 = math.tanh %34 : vector<16x128xf32>
    %36 = arith.subf %7, %35 : vector<16x128xf32>
    %37 = arith.mulf %29, %36 : vector<16x128xf32>
    %38 = arith.addf %35, %37 : vector<16x128xf32>
    %39 = arith.index_cast %c0_i32_6 : i32 to index
    %c0_11 = arith.constant 0 : index
    %c0_12 = arith.constant 0 : index
    %40 = vector.load %arg5[%39, %c0_11, %c0_12] : memref<8x16x128xf32, #tpu.memory_space<vmem>>, vector<1x16x128xf32>
    %41 = vector.shape_cast %40 : vector<1x16x128xf32> to vector<16x128xf32>
    %42 = vector.shape_cast %38 : vector<16x128xf32> to vector<1x16x128xf32>
    tpu.vector_store %arg5[%39, %c0_11, %c0_12], %42 {strides = array<i32>} : memref<8x16x128xf32, #tpu.memory_space<vmem>>, vector<1x16x128xf32>,
    %c1_i32 = arith.constant 1 : i32
    %43 = arith.index_cast %c1_i32 : i32 to index
    %c0_13 = arith.constant 0 : index
    %c0_14 = arith.constant 0 : index
    %44 = vector.load %arg2[%43, %c0_13, %c0_14] : memref<8x16x384xbf16, #tpu.memory_space<vmem>>, vector<1x16x384xbf16>
    %45 = vector.shape_cast %44 : vector<1x16x384xbf16> to vector<16x384xbf16>
    %46 = arith.extf %45 : vector<16x384xbf16> to vector<16x384xf32>
    %47 = arith.truncf %38 : vector<16x128xf32> to vector<16x128xbf16>
    %cst_15 = arith.constant dense<0.000000e+00> : vector<16x384xf32>
    %48 = tpu.matmul %47, %3, %cst_15 {dimension_numbers = #tpu.dot_dimension_numbers<[1], [0], [0], [1], [0, 0, 1, 1], [], []>} : vector<16x128xbf16>, vector<128x384xbf16>, vector<16x384xf32> -> vector<16x384xf32>
    %49 = vector.extract_strided_slice %46 {offsets = [0, 0], sizes = [16, 128], strides = [1, 1]} : vector<16x384xf32> to vector<16x128xf32>
    %50 = vector.extract_strided_slice %48 {offsets = [0, 0], sizes = [16, 128], strides = [1, 1]} : vector<16x384xf32> to vector<16x128xf32>
    %51 = arith.addf %49, %50 : vector<16x128xf32>
    %52 = arith.negf %51 : vector<16x128xf32>
    %53 = math.exp %52 : vector<16x128xf32>
    %cst_16 = arith.constant 1.000000e+00 : f32
    %54 = vector.broadcast %cst_16 : f32 to vector<16x128xf32>
    %55 = arith.addf %54, %53 : vector<16x128xf32>
    %56 = arith.divf %54, %55 : vector<16x128xf32>
    %57 = vector.extract_strided_slice %46 {offsets = [0, 128], sizes = [16, 128], strides = [1, 1]} : vector<16x384xf32> to vector<16x128xf32>
    %58 = vector.extract_strided_slice %48 {offsets = [0, 128], sizes = [16, 128], strides = [1, 1]} : vector<16x384xf32> to vector<16x128xf32>
    %59 = arith.addf %57, %58 : vector<16x128xf32>
    %60 = arith.negf %59 : vector<16x128xf32>
    %61 = math.exp %60 : vector<16x128xf32>
    %cst_17 = arith.constant 1.000000e+00 : f32
    %62 = vector.broadcast %cst_17 : f32 to vector<16x128xf32>
    %63 = arith.addf %62, %61 : vector<16x128xf32>
    %64 = arith.divf %62, %63 : vector<16x128xf32>
    %65 = vector.extract_strided_slice %46 {offsets = [0, 256], sizes = [16, 128], strides = [1, 1]} : vector<16x384xf32> to vector<16x128xf32>
    %66 = vector.extract_strided_slice %48 {offsets = [0, 256], sizes = [16, 128], strides = [1, 1]} : vector<16x384xf32> to vector<16x128xf32>
    %67 = arith.addf %66, %6 : vector<16x128xf32>
    %68 = arith.mulf %56, %67 : vector<16x128xf32>
    %69 = arith.addf %65, %68 : vector<16x128xf32>
    %70 = math.tanh %69 : vector<16x128xf32>
    %71 = arith.subf %38, %70 : vector<16x128xf32>
    %72 = arith.mulf %64, %71 : vector<16x128xf32>
    %73 = arith.addf %70, %72 : vector<16x128xf32>
    %74 = arith.index_cast %c1_i32 : i32 to index
    %c0_18 = arith.constant 0 : index
    %c0_19 = arith.constant 0 : index
    %75 = vector.load %arg5[%74, %c0_18, %c0_19] : memref<8x16x128xf32, #tpu.memory_space<vmem>>, vector<1x16x128xf32>
    %76 = vector.shape_cast %75 : vector<1x16x128xf32> to vector<16x128xf32>
    %77 = vector.shape_cast %73 : vector<16x128xf32> to vector<1x16x128xf32>
    tpu.vector_store %arg5[%74, %c0_18, %c0_19], %77 {strides = array<i32>} : memref<8x16x128xf32, #tpu.memory_space<vmem>>, vector<1x16x128xf32>,
    %c2_i32 = arith.constant 2 : i32
    %78 = arith.index_cast %c2_i32 : i32 to index
    %c0_20 = arith.constant 0 : index
    %c0_21 = arith.constant 0 : index
    %79 = vector.load %arg2[%78, %c0_20, %c0_21] : memref<8x16x384xbf16, #tpu.memory_space<vmem>>, vector<1x16x384xbf16>
    %80 = vector.shape_cast %79 : vector<1x16x384xbf16> to vector<16x384xbf16>
    %81 = arith.extf %80 : vector<16x384xbf16> to vector<16x384xf32>
    %82 = arith.truncf %73 : vector<16x128xf32> to vector<16x128xbf16>
    %cst_22 = arith.constant dense<0.000000e+00> : vector<16x384xf32>
    %83 = tpu.matmul %82, %3, %cst_22 {dimension_numbers = #tpu.dot_dimension_numbers<[1], [0], [0], [1], [0, 0, 1, 1], [], []>} : vector<16x128xbf16>, vector<128x384xbf16>, vector<16x384xf32> -> vector<16x384xf32>
    %84 = vector.extract_strided_slice %81 {offsets = [0, 0], sizes = [16, 128], strides = [1, 1]} : vector<16x384xf32> to vector<16x128xf32>
    %85 = vector.extract_strided_slice %83 {offsets = [0, 0], sizes = [16, 128], strides = [1, 1]} : vector<16x384xf32> to vector<16x128xf32>
    %86 = arith.addf %84, %85 : vector<16x128xf32>
    %87 = arith.negf %86 : vector<16x128xf32>
    %88 = math.exp %87 : vector<16x128xf32>
    %cst_23 = arith.constant 1.000000e+00 : f32
    %89 = vector.broadcast %cst_23 : f32 to vector<16x128xf32>
    %90 = arith.addf %89, %88 : vector<16x128xf32>
    %91 = arith.divf %89, %90 : vector<16x128xf32>
    %92 = vector.extract_strided_slice %81 {offsets = [0, 128], sizes = [16, 128], strides = [1, 1]} : vector<16x384xf32> to vector<16x128xf32>
    %93 = vector.extract_strided_slice %83 {offsets = [0, 128], sizes = [16, 128], strides = [1, 1]} : vector<16x384xf32> to vector<16x128xf32>
    %94 = arith.addf %92, %93 : vector<16x128xf32>
    %95 = arith.negf %94 : vector<16x128xf32>
    %96 = math.exp %95 : vector<16x128xf32>
    %cst_24 = arith.constant 1.000000e+00 : f32
    %97 = vector.broadcast %cst_24 : f32 to vector<16x128xf32>
    %98 = arith.addf %97, %96 : vector<16x128xf32>
    %99 = arith.divf %97, %98 : vector<16x128xf32>
    %100 = vector.extract_strided_slice %81 {offsets = [0, 256], sizes = [16, 128], strides = [1, 1]} : vector<16x384xf32> to vector<16x128xf32>
    %101 = vector.extract_strided_slice %83 {offsets = [0, 256], sizes = [16, 128], strides = [1, 1]} : vector<16x384xf32> to vector<16x128xf32>
    %102 = arith.addf %101, %6 : vector<16x128xf32>
    %103 = arith.mulf %91, %102 : vector<16x128xf32>
    %104 = arith.addf %100, %103 : vector<16x128xf32>
    %105 = math.tanh %104 : vector<16x128xf32>
    %106 = arith.subf %73, %105 : vector<16x128xf32>
    %107 = arith.mulf %99, %106 : vector<16x128xf32>
    %108 = arith.addf %105, %107 : vector<16x128xf32>
    %109 = arith.index_cast %c2_i32 : i32 to index
    %c0_25 = arith.constant 0 : index
    %c0_26 = arith.constant 0 : index
    %110 = vector.load %arg5[%109, %c0_25, %c0_26] : memref<8x16x128xf32, #tpu.memory_space<vmem>>, vector<1x16x128xf32>
    %111 = vector.shape_cast %110 : vector<1x16x128xf32> to vector<16x128xf32>
    %112 = vector.shape_cast %108 : vector<16x128xf32> to vector<1x16x128xf32>
    tpu.vector_store %arg5[%109, %c0_25, %c0_26], %112 {strides = array<i32>} : memref<8x16x128xf32, #tpu.memory_space<vmem>>, vector<1x16x128xf32>,
    %c3_i32 = arith.constant 3 : i32
    %113 = arith.index_cast %c3_i32 : i32 to index
    %c0_27 = arith.constant 0 : index
    %c0_28 = arith.constant 0 : index
    %114 = vector.load %arg2[%113, %c0_27, %c0_28] : memref<8x16x384xbf16, #tpu.memory_space<vmem>>, vector<1x16x384xbf16>
    %115 = vector.shape_cast %114 : vector<1x16x384xbf16> to vector<16x384xbf16>
    %116 = arith.extf %115 : vector<16x384xbf16> to vector<16x384xf32>
    %117 = arith.truncf %108 : vector<16x128xf32> to vector<16x128xbf16>
    %cst_29 = arith.constant dense<0.000000e+00> : vector<16x384xf32>
    %118 = tpu.matmul %117, %3, %cst_29 {dimension_numbers = #tpu.dot_dimension_numbers<[1], [0], [0], [1], [0, 0, 1, 1], [], []>} : vector<16x128xbf16>, vector<128x384xbf16>, vector<16x384xf32> -> vector<16x384xf32>
    %119 = vector.extract_strided_slice %116 {offsets = [0, 0], sizes = [16, 128], strides = [1, 1]} : vector<16x384xf32> to vector<16x128xf32>
    %120 = vector.extract_strided_slice %118 {offsets = [0, 0], sizes = [16, 128], strides = [1, 1]} : vector<16x384xf32> to vector<16x128xf32>
    %121 = arith.addf %119, %120 : vector<16x128xf32>
    %122 = arith.negf %121 : vector<16x128xf32>
    %123 = math.exp %122 : vector<16x128xf32>
    %cst_30 = arith.constant 1.000000e+00 : f32
    %124 = vector.broadcast %cst_30 : f32 to vector<16x128xf32>
    %125 = arith.addf %124, %123 : vector<16x128xf32>
    %126 = arith.divf %124, %125 : vector<16x128xf32>
    %127 = vector.extract_strided_slice %116 {offsets = [0, 128], sizes = [16, 128], strides = [1, 1]} : vector<16x384xf32> to vector<16x128xf32>
    %128 = vector.extract_strided_slice %118 {offsets = [0, 128], sizes = [16, 128], strides = [1, 1]} : vector<16x384xf32> to vector<16x128xf32>
    %129 = arith.addf %127, %128 : vector<16x128xf32>
    %130 = arith.negf %129 : vector<16x128xf32>
    %131 = math.exp %130 : vector<16x128xf32>
    %cst_31 = arith.constant 1.000000e+00 : f32
    %132 = vector.broadcast %cst_31 : f32 to vector<16x128xf32>
    %133 = arith.addf %132, %131 : vector<16x128xf32>
    %134 = arith.divf %132, %133 : vector<16x128xf32>
    %135 = vector.extract_strided_slice %116 {offsets = [0, 256], sizes = [16, 128], strides = [1, 1]} : vector<16x384xf32> to vector<16x128xf32>
    %136 = vector.extract_strided_slice %118 {offsets = [0, 256], sizes = [16, 128], strides = [1, 1]} : vector<16x384xf32> to vector<16x128xf32>
    %137 = arith.addf %136, %6 : vector<16x128xf32>
    %138 = arith.mulf %126, %137 : vector<16x128xf32>
    %139 = arith.addf %135, %138 : vector<16x128xf32>
    %140 = math.tanh %139 : vector<16x128xf32>
    %141 = arith.subf %108, %140 : vector<16x128xf32>
    %142 = arith.mulf %134, %141 : vector<16x128xf32>
    %143 = arith.addf %140, %142 : vector<16x128xf32>
    %144 = arith.index_cast %c3_i32 : i32 to index
    %c0_32 = arith.constant 0 : index
    %c0_33 = arith.constant 0 : index
    %145 = vector.load %arg5[%144, %c0_32, %c0_33] : memref<8x16x128xf32, #tpu.memory_space<vmem>>, vector<1x16x128xf32>
    %146 = vector.shape_cast %145 : vector<1x16x128xf32> to vector<16x128xf32>
    %147 = vector.shape_cast %143 : vector<16x128xf32> to vector<1x16x128xf32>
    tpu.vector_store %arg5[%144, %c0_32, %c0_33], %147 {strides = array<i32>} : memref<8x16x128xf32, #tpu.memory_space<vmem>>, vector<1x16x128xf32>,
    %c4_i32 = arith.constant 4 : i32
    %148 = arith.index_cast %c4_i32 : i32 to index
    %c0_34 = arith.constant 0 : index
    %c0_35 = arith.constant 0 : index
    %149 = vector.load %arg2[%148, %c0_34, %c0_35] : memref<8x16x384xbf16, #tpu.memory_space<vmem>>, vector<1x16x384xbf16>
    %150 = vector.shape_cast %149 : vector<1x16x384xbf16> to vector<16x384xbf16>
    %151 = arith.extf %150 : vector<16x384xbf16> to vector<16x384xf32>
    %152 = arith.truncf %143 : vector<16x128xf32> to vector<16x128xbf16>
    %cst_36 = arith.constant dense<0.000000e+00> : vector<16x384xf32>
    %153 = tpu.matmul %152, %3, %cst_36 {dimension_numbers = #tpu.dot_dimension_numbers<[1], [0], [0], [1], [0, 0, 1, 1], [], []>} : vector<16x128xbf16>, vector<128x384xbf16>, vector<16x384xf32> -> vector<16x384xf32>
    %154 = vector.extract_strided_slice %151 {offsets = [0, 0], sizes = [16, 128], strides = [1, 1]} : vector<16x384xf32> to vector<16x128xf32>
    %155 = vector.extract_strided_slice %153 {offsets = [0, 0], sizes = [16, 128], strides = [1, 1]} : vector<16x384xf32> to vector<16x128xf32>
    %156 = arith.addf %154, %155 : vector<16x128xf32>
    %157 = arith.negf %156 : vector<16x128xf32>
    %158 = math.exp %157 : vector<16x128xf32>
    %cst_37 = arith.constant 1.000000e+00 : f32
    %159 = vector.broadcast %cst_37 : f32 to vector<16x128xf32>
    %160 = arith.addf %159, %158 : vector<16x128xf32>
    %161 = arith.divf %159, %160 : vector<16x128xf32>
    %162 = vector.extract_strided_slice %151 {offsets = [0, 128], sizes = [16, 128], strides = [1, 1]} : vector<16x384xf32> to vector<16x128xf32>
    %163 = vector.extract_strided_slice %153 {offsets = [0, 128], sizes = [16, 128], strides = [1, 1]} : vector<16x384xf32> to vector<16x128xf32>
    %164 = arith.addf %162, %163 : vector<16x128xf32>
    %165 = arith.negf %164 : vector<16x128xf32>
    %166 = math.exp %165 : vector<16x128xf32>
    %cst_38 = arith.constant 1.000000e+00 : f32
    %167 = vector.broadcast %cst_38 : f32 to vector<16x128xf32>
    %168 = arith.addf %167, %166 : vector<16x128xf32>
    %169 = arith.divf %167, %168 : vector<16x128xf32>
    %170 = vector.extract_strided_slice %151 {offsets = [0, 256], sizes = [16, 128], strides = [1, 1]} : vector<16x384xf32> to vector<16x128xf32>
    %171 = vector.extract_strided_slice %153 {offsets = [0, 256], sizes = [16, 128], strides = [1, 1]} : vector<16x384xf32> to vector<16x128xf32>
    %172 = arith.addf %171, %6 : vector<16x128xf32>
    %173 = arith.mulf %161, %172 : vector<16x128xf32>
    %174 = arith.addf %170, %173 : vector<16x128xf32>
    %175 = math.tanh %174 : vector<16x128xf32>
    %176 = arith.subf %143, %175 : vector<16x128xf32>
    %177 = arith.mulf %169, %176 : vector<16x128xf32>
    %178 = arith.addf %175, %177 : vector<16x128xf32>
    %179 = arith.index_cast %c4_i32 : i32 to index
    %c0_39 = arith.constant 0 : index
    %c0_40 = arith.constant 0 : index
    %180 = vector.load %arg5[%179, %c0_39, %c0_40] : memref<8x16x128xf32, #tpu.memory_space<vmem>>, vector<1x16x128xf32>
    %181 = vector.shape_cast %180 : vector<1x16x128xf32> to vector<16x128xf32>
    %182 = vector.shape_cast %178 : vector<16x128xf32> to vector<1x16x128xf32>
    tpu.vector_store %arg5[%179, %c0_39, %c0_40], %182 {strides = array<i32>} : memref<8x16x128xf32, #tpu.memory_space<vmem>>, vector<1x16x128xf32>,
    %c5_i32 = arith.constant 5 : i32
    %183 = arith.index_cast %c5_i32 : i32 to index
    %c0_41 = arith.constant 0 : index
    %c0_42 = arith.constant 0 : index
    %184 = vector.load %arg2[%183, %c0_41, %c0_42] : memref<8x16x384xbf16, #tpu.memory_space<vmem>>, vector<1x16x384xbf16>
    %185 = vector.shape_cast %184 : vector<1x16x384xbf16> to vector<16x384xbf16>
    %186 = arith.extf %185 : vector<16x384xbf16> to vector<16x384xf32>
    %187 = arith.truncf %178 : vector<16x128xf32> to vector<16x128xbf16>
    %cst_43 = arith.constant dense<0.000000e+00> : vector<16x384xf32>
    %188 = tpu.matmul %187, %3, %cst_43 {dimension_numbers = #tpu.dot_dimension_numbers<[1], [0], [0], [1], [0, 0, 1, 1], [], []>} : vector<16x128xbf16>, vector<128x384xbf16>, vector<16x384xf32> -> vector<16x384xf32>
    %189 = vector.extract_strided_slice %186 {offsets = [0, 0], sizes = [16, 128], strides = [1, 1]} : vector<16x384xf32> to vector<16x128xf32>
    %190 = vector.extract_strided_slice %188 {offsets = [0, 0], sizes = [16, 128], strides = [1, 1]} : vector<16x384xf32> to vector<16x128xf32>
    %191 = arith.addf %189, %190 : vector<16x128xf32>
    %192 = arith.negf %191 : vector<16x128xf32>
    %193 = math.exp %192 : vector<16x128xf32>
    %cst_44 = arith.constant 1.000000e+00 : f32
    %194 = vector.broadcast %cst_44 : f32 to vector<16x128xf32>
    %195 = arith.addf %194, %193 : vector<16x128xf32>
    %196 = arith.divf %194, %195 : vector<16x128xf32>
    %197 = vector.extract_strided_slice %186 {offsets = [0, 128], sizes = [16, 128], strides = [1, 1]} : vector<16x384xf32> to vector<16x128xf32>
    %198 = vector.extract_strided_slice %188 {offsets = [0, 128], sizes = [16, 128], strides = [1, 1]} : vector<16x384xf32> to vector<16x128xf32>
    %199 = arith.addf %197, %198 : vector<16x128xf32>
    %200 = arith.negf %199 : vector<16x128xf32>
    %201 = math.exp %200 : vector<16x128xf32>
    %cst_45 = arith.constant 1.000000e+00 : f32
    %202 = vector.broadcast %cst_45 : f32 to vector<16x128xf32>
    %203 = arith.addf %202, %201 : vector<16x128xf32>
    %204 = arith.divf %202, %203 : vector<16x128xf32>
    %205 = vector.extract_strided_slice %186 {offsets = [0, 256], sizes = [16, 128], strides = [1, 1]} : vector<16x384xf32> to vector<16x128xf32>
    %206 = vector.extract_strided_slice %188 {offsets = [0, 256], sizes = [16, 128], strides = [1, 1]} : vector<16x384xf32> to vector<16x128xf32>
    %207 = arith.addf %206, %6 : vector<16x128xf32>
    %208 = arith.mulf %196, %207 : vector<16x128xf32>
    %209 = arith.addf %205, %208 : vector<16x128xf32>
    %210 = math.tanh %209 : vector<16x128xf32>
    %211 = arith.subf %178, %210 : vector<16x128xf32>
    %212 = arith.mulf %204, %211 : vector<16x128xf32>
    %213 = arith.addf %210, %212 : vector<16x128xf32>
    %214 = arith.index_cast %c5_i32 : i32 to index
    %c0_46 = arith.constant 0 : index
    %c0_47 = arith.constant 0 : index
    %215 = vector.load %arg5[%214, %c0_46, %c0_47] : memref<8x16x128xf32, #tpu.memory_space<vmem>>, vector<1x16x128xf32>
    %216 = vector.shape_cast %215 : vector<1x16x128xf32> to vector<16x128xf32>
    %217 = vector.shape_cast %213 : vector<16x128xf32> to vector<1x16x128xf32>
    tpu.vector_store %arg5[%214, %c0_46, %c0_47], %217 {strides = array<i32>} : memref<8x16x128xf32, #tpu.memory_space<vmem>>, vector<1x16x128xf32>,
    %c6_i32 = arith.constant 6 : i32
    %218 = arith.index_cast %c6_i32 : i32 to index
    %c0_48 = arith.constant 0 : index
    %c0_49 = arith.constant 0 : index
    %219 = vector.load %arg2[%218, %c0_48, %c0_49] : memref<8x16x384xbf16, #tpu.memory_space<vmem>>, vector<1x16x384xbf16>
    %220 = vector.shape_cast %219 : vector<1x16x384xbf16> to vector<16x384xbf16>
    %221 = arith.extf %220 : vector<16x384xbf16> to vector<16x384xf32>
    %222 = arith.truncf %213 : vector<16x128xf32> to vector<16x128xbf16>
    %cst_50 = arith.constant dense<0.000000e+00> : vector<16x384xf32>
    %223 = tpu.matmul %222, %3, %cst_50 {dimension_numbers = #tpu.dot_dimension_numbers<[1], [0], [0], [1], [0, 0, 1, 1], [], []>} : vector<16x128xbf16>, vector<128x384xbf16>, vector<16x384xf32> -> vector<16x384xf32>
    %224 = vector.extract_strided_slice %221 {offsets = [0, 0], sizes = [16, 128], strides = [1, 1]} : vector<16x384xf32> to vector<16x128xf32>
    %225 = vector.extract_strided_slice %223 {offsets = [0, 0], sizes = [16, 128], strides = [1, 1]} : vector<16x384xf32> to vector<16x128xf32>
    %226 = arith.addf %224, %225 : vector<16x128xf32>
    %227 = arith.negf %226 : vector<16x128xf32>
    %228 = math.exp %227 : vector<16x128xf32>
    %cst_51 = arith.constant 1.000000e+00 : f32
    %229 = vector.broadcast %cst_51 : f32 to vector<16x128xf32>
    %230 = arith.addf %229, %228 : vector<16x128xf32>
    %231 = arith.divf %229, %230 : vector<16x128xf32>
    %232 = vector.extract_strided_slice %221 {offsets = [0, 128], sizes = [16, 128], strides = [1, 1]} : vector<16x384xf32> to vector<16x128xf32>
    %233 = vector.extract_strided_slice %223 {offsets = [0, 128], sizes = [16, 128], strides = [1, 1]} : vector<16x384xf32> to vector<16x128xf32>
    %234 = arith.addf %232, %233 : vector<16x128xf32>
    %235 = arith.negf %234 : vector<16x128xf32>
    %236 = math.exp %235 : vector<16x128xf32>
    %cst_52 = arith.constant 1.000000e+00 : f32
    %237 = vector.broadcast %cst_52 : f32 to vector<16x128xf32>
    %238 = arith.addf %237, %236 : vector<16x128xf32>
    %239 = arith.divf %237, %238 : vector<16x128xf32>
    %240 = vector.extract_strided_slice %221 {offsets = [0, 256], sizes = [16, 128], strides = [1, 1]} : vector<16x384xf32> to vector<16x128xf32>
    %241 = vector.extract_strided_slice %223 {offsets = [0, 256], sizes = [16, 128], strides = [1, 1]} : vector<16x384xf32> to vector<16x128xf32>
    %242 = arith.addf %241, %6 : vector<16x128xf32>
    %243 = arith.mulf %231, %242 : vector<16x128xf32>
    %244 = arith.addf %240, %243 : vector<16x128xf32>
    %245 = math.tanh %244 : vector<16x128xf32>
    %246 = arith.subf %213, %245 : vector<16x128xf32>
    %247 = arith.mulf %239, %246 : vector<16x128xf32>
    %248 = arith.addf %245, %247 : vector<16x128xf32>
    %249 = arith.index_cast %c6_i32 : i32 to index
    %c0_53 = arith.constant 0 : index
    %c0_54 = arith.constant 0 : index
    %250 = vector.load %arg5[%249, %c0_53, %c0_54] : memref<8x16x128xf32, #tpu.memory_space<vmem>>, vector<1x16x128xf32>
    %251 = vector.shape_cast %250 : vector<1x16x128xf32> to vector<16x128xf32>
    %252 = vector.shape_cast %248 : vector<16x128xf32> to vector<1x16x128xf32>
    tpu.vector_store %arg5[%249, %c0_53, %c0_54], %252 {strides = array<i32>} : memref<8x16x128xf32, #tpu.memory_space<vmem>>, vector<1x16x128xf32>,
    %c7_i32 = arith.constant 7 : i32
    %253 = arith.index_cast %c7_i32 : i32 to index
    %c0_55 = arith.constant 0 : index
    %c0_56 = arith.constant 0 : index
    %254 = vector.load %arg2[%253, %c0_55, %c0_56] : memref<8x16x384xbf16, #tpu.memory_space<vmem>>, vector<1x16x384xbf16>
    %255 = vector.shape_cast %254 : vector<1x16x384xbf16> to vector<16x384xbf16>
    %256 = arith.extf %255 : vector<16x384xbf16> to vector<16x384xf32>
    %257 = arith.truncf %248 : vector<16x128xf32> to vector<16x128xbf16>
    %cst_57 = arith.constant dense<0.000000e+00> : vector<16x384xf32>
    %258 = tpu.matmul %257, %3, %cst_57 {dimension_numbers = #tpu.dot_dimension_numbers<[1], [0], [0], [1], [0, 0, 1, 1], [], []>} : vector<16x128xbf16>, vector<128x384xbf16>, vector<16x384xf32> -> vector<16x384xf32>
    %259 = vector.extract_strided_slice %256 {offsets = [0, 0], sizes = [16, 128], strides = [1, 1]} : vector<16x384xf32> to vector<16x128xf32>
    %260 = vector.extract_strided_slice %258 {offsets = [0, 0], sizes = [16, 128], strides = [1, 1]} : vector<16x384xf32> to vector<16x128xf32>
    %261 = arith.addf %259, %260 : vector<16x128xf32>
    %262 = arith.negf %261 : vector<16x128xf32>
    %263 = math.exp %262 : vector<16x128xf32>
    %cst_58 = arith.constant 1.000000e+00 : f32
    %264 = vector.broadcast %cst_58 : f32 to vector<16x128xf32>
    %265 = arith.addf %264, %263 : vector<16x128xf32>
    %266 = arith.divf %264, %265 : vector<16x128xf32>
    %267 = vector.extract_strided_slice %256 {offsets = [0, 128], sizes = [16, 128], strides = [1, 1]} : vector<16x384xf32> to vector<16x128xf32>
    %268 = vector.extract_strided_slice %258 {offsets = [0, 128], sizes = [16, 128], strides = [1, 1]} : vector<16x384xf32> to vector<16x128xf32>
    %269 = arith.addf %267, %268 : vector<16x128xf32>
    %270 = arith.negf %269 : vector<16x128xf32>
    %271 = math.exp %270 : vector<16x128xf32>
    %cst_59 = arith.constant 1.000000e+00 : f32
    %272 = vector.broadcast %cst_59 : f32 to vector<16x128xf32>
    %273 = arith.addf %272, %271 : vector<16x128xf32>
    %274 = arith.divf %272, %273 : vector<16x128xf32>
    %275 = vector.extract_strided_slice %256 {offsets = [0, 256], sizes = [16, 128], strides = [1, 1]} : vector<16x384xf32> to vector<16x128xf32>
    %276 = vector.extract_strided_slice %258 {offsets = [0, 256], sizes = [16, 128], strides = [1, 1]} : vector<16x384xf32> to vector<16x128xf32>
    %277 = arith.addf %276, %6 : vector<16x128xf32>
    %278 = arith.mulf %266, %277 : vector<16x128xf32>
    %279 = arith.addf %275, %278 : vector<16x128xf32>
    %280 = math.tanh %279 : vector<16x128xf32>
    %281 = arith.subf %248, %280 : vector<16x128xf32>
    %282 = arith.mulf %274, %281 : vector<16x128xf32>
    %283 = arith.addf %280, %282 : vector<16x128xf32>
    %284 = arith.index_cast %c7_i32 : i32 to index
    %c0_60 = arith.constant 0 : index
    %c0_61 = arith.constant 0 : index
    %285 = vector.load %arg5[%284, %c0_60, %c0_61] : memref<8x16x128xf32, #tpu.memory_space<vmem>>, vector<1x16x128xf32>
    %286 = vector.shape_cast %285 : vector<1x16x128xf32> to vector<16x128xf32>
    %287 = vector.shape_cast %283 : vector<16x128xf32> to vector<1x16x128xf32>
    tpu.vector_store %arg5[%284, %c0_60, %c0_61], %287 {strides = array<i32>} : memref<8x16x128xf32, #tpu.memory_space<vmem>>, vector<1x16x128xf32>,
    %c8_i32 = arith.constant 8 : i32
    %c0_62 = arith.constant 0 : index
    %c0_63 = arith.constant 0 : index
    %288 = vector.load %arg6[%c0_62, %c0_63] : memref<16x128xf32, #tpu.memory_space<vmem>>, vector<16x128xf32>
    tpu.vector_store %arg6[%c0_62, %c0_63], %283 {strides = array<i32>} : memref<16x128xf32, #tpu.memory_space<vmem>>, vector<16x128xf32>,
    return
  }
  func.func @transform_0(%arg0: i32, %arg1: i32) -> (i32, i32, i32) {
    %c0_i32 = arith.constant 0 : i32
    %c0_i32_0 = arith.constant 0 : i32
    return %arg1, %arg0, %c0_i32 : i32, i32, i32
  }
  func.func @transform_1(%arg0: i32, %arg1: i32) -> (i32, i32) {
    %c0_i32 = arith.constant 0 : i32
    %c0_i32_0 = arith.constant 0 : i32
    %c0_i32_1 = arith.constant 0 : i32
    return %c0_i32, %c0_i32_0 : i32, i32
  }
  func.func @transform_2(%arg0: i32, %arg1: i32) -> (i32, i32) {
    %c0_i32 = arith.constant 0 : i32
    %c0_i32_0 = arith.constant 0 : i32
    %c0_i32_1 = arith.constant 0 : i32
    return %c0_i32, %c0_i32_0 : i32, i32
  }
  func.func @transform_3(%arg0: i32, %arg1: i32) -> (i32, i32, i32) {
    %c0_i32 = arith.constant 0 : i32
    %c0_i32_0 = arith.constant 0 : i32
    return %arg1, %arg0, %c0_i32 : i32, i32, i32
  }
}

</mosaic_0001>

<bundles_post_ra>
// kernel: temporal_encoder_forward.3
= control target key start
LH: loop header
LB: loop body
LE: loop exit
PB: predicated region body
PF: predicated region fallthrough
CT: control target
= control target key end

     0   :  { %s2391_s12 = smov 0   ;;  %s2393_s13 = smov 0   ;;  %s3268_s0 = inlined_call_operand.vmem [shape: bf16[16,32,384], index: 0, kind: input, shape index: {}]   ;;  %s3269_s1 = inlined_call_operand.vmem [shape: bf16[128,384], index: 1, kind: input, shape index: {}]   ;;  %s3270_s2 = inlined_call_operand.vmem [shape: f32[1,128], index: 2, kind: input, shape index: {}]   ;;  %s3271_s3 = inlined_call_operand.vmem [shape: f32[16,32,128], index: 3, kind: output, shape index: {}]  }
   0x1   :  { %s2395_s14 = smov 0   ;;  %s2397_s15 = smov 0  }
   0x2   :  { %s2399_s16 = smov 0   ;;  %s2401_s17 = smov 0  }
   0x3   :  { %s2403_s18 = smov 0  }
   0x4 LB: > { %s22_s19 = sadd.s32 1, %s2360_s16  ;;  %s25_s20 = sadd.s32 1, %s2364_s17  ;;  %s2368_s18 = sphi %s2403_s18, %s13_s18   ;;  %s2364_s17 = sphi %s2401_s17, %s3278_s17   ;;  %s2360_s16 = sphi %s2399_s16, %s3277_s16   ;;  %s2356_s15 = sphi %s2397_s15, %s3276_s15   ;;  %s2352_s14 = sphi %s2395_s14, %s3275_s14   ;;  %s2348_s13 = sphi %s2393_s13, %s3274_s13   ;;  %s2344_s12 = sphi %s2391_s12, %s3273_s12  }
   0x5   : > { %p23_p0 = scmp.ge.s32.totalorder %s22_s19, 2  ;;  %s1845_s21 = sadd.s32 4294967295, %s2368_s18  }
   0x6   : > { %p41_p1 = scmp.ne.s32.totalorder %s2348_s13, %s2344_s12  ;;  %p42_p2 = scmp.eq.s32.totalorder %s2368_s18, 0 }
   0x7   : > { %s3280_s19 = smov (%p23_p0, %s22_s19), 0  ;;  %s3282_s20 = smov (!%p23_p0, %s25_s20), %s2364_s17 }
   0x8   : > { %p27_p3 = scmp.ge.s32.totalorder %s3282_s20, 2  ;;  %p115_p4 = scmp.eq.s32.totalorder %s1845_s21, 3 }
   0x9   : > { %s29_s22 = ssub.s32 %s2360_s16, %s3280_s19  ;;  %p43_p5 = por %p42_p2, %p41_p1 }
   0xa   : > { %s3284_s20 = smov (%p27_p3, %s3282_s20), 0  ;;  %p2439_p6 = por %p115_p4, %p41_p1 }
   0xb   : > { %s30_s24 = ssub.s32 %s2364_s17, %s3284_s20  ;;  %s34_s26 = sadd.s32 1, %s2348_s13 }
   0xc   : > { %s31_s25 = sor.u32 %s30_s24, %s29_s22  ;;  %p1848_p8 = scmp.ge.s32.totalorder %s2368_s18, 4 }
   0xd   : > { %p32_p7 = scmp.eq.s32.totalorder %s31_s25, 0 }
   0xe   : > { %143 = sbr.rel (%p1848_p8) target bundleno = 60 (0x3c), region = 24 }
   0xf   : > { %s2447_s27 = scalar_select %p32_p7, %s2348_s13, %s34_s26  }
  0x13   : > { %146 = sbr.rel (!%p43_p5) target bundleno = 60 (0x3c), region = 28  ;;  %s148_s28 = sand.u32 (%p43_p5), 1, %s2348_s13  }
  0x14   : > { %s2092_s29 = smul.u32 (%p43_p5), 6, %s2364_s17 }
  0x15   : > { %s2091_s30 = smul.u32 (%p43_p5), 192, %s148_s28 }
  0x16   : > { %s2093_s4 = smul.u32 (%p43_p5), 96, %s2360_s16 }
  0x17   : > { %s2461_s10 = scalar_lea.vmem (%p43_p5), [#allocation3], %s2091_s30 }
  0x18   : > { %s155_s5 = sadd.s32 %s2093_s4, %s2092_s29 }
  0x19   : > { %s1853_s6 = sshll.u32 %s155_s5, 2 }
  0x1a   : > { %s2456_s9 = scalar_lea.vmem %s3268_s0, %s1853_s6 }
  0x1b   : > { %v172_v0 = vld [vmem:[%s2456_s9] sm:$0xff]  ;;  %v174_v1 = vld [vmem:[%s2456_s9 + $0xc] sm:$0xff]  ;;  %v1854_v16 = vld [vmem:[%s2456_s9 + $0x8] sm:$0xf] }
  0x1c   : > { %v176_v2 = vld [vmem:[%s2456_s9 + $0x30] sm:$0xff]  ;;  %173 = vst [vmem:[%s2461_s10] sm:$0xff] %v172_v0  ;;  %v178_v3 = vld [vmem:[%s2456_s9 + $0x3c] sm:$0xff]  ;;  %v1858_v18 = vld [vmem:[%s2456_s9 + $0x38] sm:$0xf] }
  0x1d   : > { %175 = vst [vmem:[%s2461_s10 + $0xc] sm:$0xff] %v174_v1  ;;  %v180_v4 = vld [vmem:[%s2456_s9 + $0x60] sm:$0xff]  ;;  %v182_v5 = vld [vmem:[%s2456_s9 + $0x6c] sm:$0xff]  ;;  %v1856_v17 = vld [vmem:[%s2456_s9 + $0x14] sm:$0xf] }
  0x1e   : > { %177 = vst [vmem:[%s2461_s10 + $0x18] sm:$0xff] %v176_v2  ;;  %v184_v6 = vld [vmem:[%s2456_s9 + $0x90] sm:$0xff]  ;;  %v186_v7 = vld [vmem:[%s2456_s9 + $0x9c] sm:$0xff]  ;;  %v1860_v19 = vld [vmem:[%s2456_s9 + $0x44] sm:$0xf] }
  0x1f   : > { %179 = vst [vmem:[%s2461_s10 + $0x24] sm:$0xff] %v178_v3  ;;  %v188_v8 = vld [vmem:[%s2456_s9 + $0xc0] sm:$0xff]  ;;  %v190_v9 = vld [vmem:[%s2456_s9 + $0xcc] sm:$0xff]  ;;  %v1862_v20 = vld [vmem:[%s2456_s9 + $0x68] sm:$0xf] }
  0x20   : > { %181 = vst [vmem:[%s2461_s10 + $0x30] sm:$0xff] %v180_v4  ;;  %v192_v10 = vld [vmem:[%s2456_s9 + $0xf0] sm:$0xff]  ;;  %v194_v11 = vld [vmem:[%s2456_s9 + $0xfc] sm:$0xff]  ;;  %v1866_v22 = vld [vmem:[%s2456_s9 + $0x98] sm:$0xf] }
  0x21   : > { %183 = vst [vmem:[%s2461_s10 + $0x3c] sm:$0xff] %v182_v5  ;;  %v196_v12 = vld [vmem:[%s2456_s9 + $0x120] sm:$0xff]  ;;  %v198_v13 = vld [vmem:[%s2456_s9 + $0x12c] sm:$0xff]  ;;  %v1864_v21 = vld [vmem:[%s2456_s9 + $0x74] sm:$0xf] }
  0x22   : > { %185 = vst [vmem:[%s2461_s10 + $0x48] sm:$0xff] %v184_v6  ;;  %v200_v14 = vld [vmem:[%s2456_s9 + $0x150] sm:$0xff]  ;;  %v202_v15 = vld [vmem:[%s2456_s9 + $0x15c] sm:$0xff]  ;;  %v1868_v23 = vld [vmem:[%s2456_s9 + $0xa4] sm:$0xf] }
  0x23   : > { %187 = vst [vmem:[%s2461_s10 + $0x54] sm:$0xff] %v186_v7  ;;  %v1870_v24 = vld [vmem:[%s2456_s9 + $0xc8] sm:$0xf]  ;;  %v1872_v25 = vld [vmem:[%s2456_s9 + $0xd4] sm:$0xf] }
  0x24   : > { %189 = vst [vmem:[%s2461_s10 + $0x60] sm:$0xff] %v188_v8  ;;  %v1874_v26 = vld [vmem:[%s2456_s9 + $0xf8] sm:$0xf]  ;;  %v1876_v27 = vld [vmem:[%s2456_s9 + $0x104] sm:$0xf] }
  0x25   : > { %191 = vst [vmem:[%s2461_s10 + $0x6c] sm:$0xff] %v190_v9  ;;  %v1878_v28 = vld [vmem:[%s2456_s9 + $0x128] sm:$0xf]  ;;  %v1880_v29 = vld [vmem:[%s2456_s9 + $0x134] sm:$0xf] }
  0x26   : > { %193 = vst [vmem:[%s2461_s10 + $0x78] sm:$0xff] %v192_v10  ;;  %v1882_v30 = vld [vmem:[%s2456_s9 + $0x158] sm:$0xf]  ;;  %v1884_v31 = vld [vmem:[%s2456_s9 + $0x164] sm:$0xf] }
  0x27   : > { %195 = vst [vmem:[%s2461_s10 + $0x84] sm:$0xff] %v194_v11 }
  0x28   : > { %197 = vst [vmem:[%s2461_s10 + $0x90] sm:$0xff] %v196_v12 }
  0x29   : > { %199 = vst [vmem:[%s2461_s10 + $0x9c] sm:$0xff] %v198_v13 }
  0x2a   : > { %201 = vst [vmem:[%s2461_s10 + $0xa8] sm:$0xff] %v200_v14 }
  0x2b   : > { %203 = vst [vmem:[%s2461_s10 + $0xb4] sm:$0xff] %v202_v15 }
  0x2c   : > { %1855 = vst [vmem:[%s2461_s10 + $0x8] sm:$0xf] %v1854_v16 }
  0x2d   : > { %1857 = vst [vmem:[%s2461_s10 + $0x14] sm:$0xf] %v1856_v17 }
  0x2e   : > { %1859 = vst [vmem:[%s2461_s10 + $0x20] sm:$0xf] %v1858_v18 }
  0x2f   : > { %1861 = vst [vmem:[%s2461_s10 + $0x2c] sm:$0xf] %v1860_v19 }
  0x30   : > { %1863 = vst [vmem:[%s2461_s10 + $0x38] sm:$0xf] %v1862_v20 }
  0x31   : > { %1865 = vst [vmem:[%s2461_s10 + $0x44] sm:$0xf] %v1864_v21 }
  0x32   : > { %1867 = vst [vmem:[%s2461_s10 + $0x50] sm:$0xf] %v1866_v22 }
  0x33   : > { %1869 = vst [vmem:[%s2461_s10 + $0x5c] sm:$0xf] %v1868_v23 }
  0x34   : > { %1871 = vst [vmem:[%s2461_s10 + $0x68] sm:$0xf] %v1870_v24 }
  0x35   : > { %1873 = vst [vmem:[%s2461_s10 + $0x74] sm:$0xf] %v1872_v25 }
  0x36   : > { %1875 = vst [vmem:[%s2461_s10 + $0x80] sm:$0xf] %v1874_v26 }
  0x37   : > { %1877 = vst [vmem:[%s2461_s10 + $0x8c] sm:$0xf] %v1876_v27 }
  0x38   : > { %1879 = vst [vmem:[%s2461_s10 + $0x98] sm:$0xf] %v1878_v28 }
  0x39   : > { %1881 = vst [vmem:[%s2461_s10 + $0xa4] sm:$0xf] %v1880_v29 }
  0x3a   : > { %1883 = vst [vmem:[%s2461_s10 + $0xb0] sm:$0xf] %v1882_v30 }
  0x3b   : > { %1885 = vst [vmem:[%s2461_s10 + $0xbc] sm:$0xf] %v1884_v31 }
  0x3c PF: > { %p1886_p9 = scmp.ge.s32.totalorder %s2368_s18, 1  ;;  %p248_p10 = scmp.lt.s32.totalorder %s2368_s18, 5 }
  0x3e   : > { %p249_p11 = pnand %p1886_p9, %p248_p10 }
  0x3f   : > { %s255_s11 = sand.u32 (!%p249_p11), 1, %s2344_s12   ;;  %p1888_p12 = scmp.ne.s32.totalorder (!%p249_p11), %s2352_s14, 0 }
  0x40   : > { %252 = sbr.rel (%p249_p11) target bundleno = 1606 (0x646), region = 54  ;;  %s1887_s22 = sshll.u32 (!%p249_p11), %s255_s11, 7 }
  0x41   : > { %s2094_s21 = smul.u32 (!%p249_p11), 192, %s255_s11  ;;  %s2529_s25 = scalar_lea.vmem (!%p249_p11), [#allocation4], %s1887_s22 }
  0x43   : > { %s2527_s24 = scalar_lea.vmem (!%p249_p11), [#allocation3], %s2094_s21 }
  0x45   : > { %284 = sbr.rel (%p1888_p12) target bundleno = 77 (0x4d), region = 62 }
  0x4a   : > { %v2370_v32 = vmov 0.0  }
  0x4b   : > { %285 = vst [vmem:[#allocation2] sm:$0xff] %v2370_v32 }
  0x4c   : > { %286 = vst [vmem:[#allocation2 + $0x8] sm:$0xff] %v2370_v32 }
  0x4d PF: > { %v1975_v33 = vld [vmem:[%s3269_s1 + $0xa8] sm:$0xf]  ;;  %v2088_v34 = vld [vmem:[%s3269_s1 + $0xb0] sm:$0xf0]  ;;  %v2087_v35 = vld [vmem:[%s3269_s1 + $0xac] sm:$0xf] }
  0x4e   : > { %v2541_v36 = vor.u32 %v2088_v34, %v1975_v33  ;;  %v1977_v37 = vld [vmem:[%s3269_s1 + $0xb4] sm:$0xf0]  ;;  %v1963_v38 = vld [vmem:[%s3269_s1 + $0x90] sm:$0xf]  ;;  %v2085_v39 = vld [vmem:[%s3269_s1 + $0x98] sm:$0xf0] }
  0x4f   : > { %v2552_v40 = vor.u32 %v2087_v35, %v1977_v37  ;;  %v2084_v41 = vld [vmem:[%s3269_s1 + $0x94] sm:$0xf]  ;;  %v1965_v42 = vld [vmem:[%s3269_s1 + $0x9c] sm:$0xf0]  ;;  %v2561_v43 = vor.u32 %v2085_v39, %v1963_v38  ;;  %v1951_v45 = vld [vmem:[%s3269_s1 + $0x78] sm:$0xf] }
  0x50   : > { %464 = vmatpush.bf16.msra.mxu0 %v2541_v36  ;;  %614 = vmatpush.bf16.msra.mxu3 %v2541_v36  ;;  %v2565_v44 = vor.u32 %v2084_v41, %v1965_v42  ;;  %v2082_v46 = vld [vmem:[%s3269_s1 + $0x80] sm:$0xf0]  ;;  %v2081_v47 = vld [vmem:[%s3269_s1 + $0x7c] sm:$0xf]  ;;  %v1953_v48 = vld [vmem:[%s3269_s1 + $0x84] sm:$0xf0] }
  0x51   : > { %478 = vmatpush.bf16.msra.mxu1 %v2552_v40  ;;  %v1983_v49 = vld [vmem:[%s3269_s1 + $0xb0] sm:$0xf]  ;;  %v2089_v50 = vld [vmem:[%s3269_s1 + $0xb8] sm:$0xf0]  ;;  %v2588_v52 = vor.u32 %v2082_v46, %v1951_v45  ;;  %v1971_v53 = vld [vmem:[%s3269_s1 + $0x98] sm:$0xf]  ;;  %v2598_v55 = vor.u32 %v2081_v47, %v1953_v48 }
  0x52   : > { %v2585_v51 = vor.u32 %v2089_v50, %v1983_v49  ;;  %v2086_v54 = vld [vmem:[%s3269_s1 + $0xa0] sm:$0xf0]  ;;  %v1939_v56 = vld [vmem:[%s3269_s1 + $0x60] sm:$0xf]  ;;  %v2079_v57 = vld [vmem:[%s3269_s1 + $0x68] sm:$0xf0] }
  0x53   : > { %v2078_v58 = vld [vmem:[%s3269_s1 + $0x64] sm:$0xf]  ;;  %v2610_v59 = vor.u32 %v2086_v54, %v1971_v53  ;;  %v1941_v60 = vld [vmem:[%s3269_s1 + $0x6c] sm:$0xf0]  ;;  %v1959_v61 = vld [vmem:[%s3269_s1 + $0x80] sm:$0xf]  ;;  %v2622_v63 = vor.u32 %v2079_v57, %v1939_v56 }
  0x54   : > { %465 = vmatpush.bf16.msra.mxu0 %v2561_v43  ;;  %615 = vmatpush.bf16.msra.mxu3 %v2561_v43  ;;  %v2083_v62 = vld [vmem:[%s3269_s1 + $0x88] sm:$0xf0]  ;;  %v2626_v0 = vor.u32 %v2078_v58, %v1941_v60  ;;  %v1927_v1 = vld [vmem:[%s3269_s1 + $0x48] sm:$0xf]  ;;  %v2076_v2 = vld [vmem:[%s3269_s1 + $0x50] sm:$0xf0] }
  0x55   : > { %479 = vmatpush.bf16.msra.mxu1 %v2565_v44  ;;  %492 = vmatpush.bf16.msra.mxu2 %v2585_v51  ;;  %v2075_v3 = vld [vmem:[%s3269_s1 + $0x4c] sm:$0xf]  ;;  %v2638_v4 = vor.u32 %v2083_v62, %v1959_v61  ;;  %v1929_v5 = vld [vmem:[%s3269_s1 + $0x54] sm:$0xf0]  ;;  %v1947_v6 = vld [vmem:[%s3269_s1 + $0x68] sm:$0xf]  ;;  %v2650_v8 = vor.u32 %v2076_v2, %v1927_v1 }
  0x56   : > { %v2080_v7 = vld [vmem:[%s3269_s1 + $0x70] sm:$0xf0]  ;;  %v1915_v9 = vld [vmem:[%s3269_s1 + $0x30] sm:$0xf]  ;;  %v2657_v10 = vor.u32 %v2075_v3, %v1929_v5  ;;  %v2073_v11 = vld [vmem:[%s3269_s1 + $0x38] sm:$0xf0] }
  0x57   : > { %v2072_v12 = vld [vmem:[%s3269_s1 + $0x34] sm:$0xf]  ;;  %v1917_v13 = vld [vmem:[%s3269_s1 + $0x3c] sm:$0xf0]  ;;  %v2669_v14 = vor.u32 %v2080_v7, %v1947_v6  ;;  %v1935_v15 = vld [vmem:[%s3269_s1 + $0x50] sm:$0xf]  ;;  %v2678_v17 = vor.u32 %v2073_v11, %v1915_v9 }
  0x58   : > { %466 = vmatpush.bf16.msra.mxu0 %v2588_v52  ;;  %616 = vmatpush.bf16.msra.mxu3 %v2588_v52  ;;  %v2077_v16 = vld [vmem:[%s3269_s1 + $0x58] sm:$0xf0]  ;;  %v2682_v18 = vor.u32 %v2072_v12, %v1917_v13  ;;  %v1903_v19 = vld [vmem:[%s3269_s1 + $0x18] sm:$0xf]  ;;  %v2070_v20 = vld [vmem:[%s3269_s1 + $0x20] sm:$0xf0] }
  0x59   : > { %480 = vmatpush.bf16.msra.mxu1 %v2598_v55  ;;  %493 = vmatpush.bf16.msra.mxu2 %v2610_v59  ;;  %v2069_v21 = vld [vmem:[%s3269_s1 + $0x1c] sm:$0xf]  ;;  %v2694_v22 = vor.u32 %v2077_v16, %v1935_v15  ;;  %v1905_v23 = vld [vmem:[%s3269_s1 + $0x24] sm:$0xf0]  ;;  %v1923_v24 = vld [vmem:[%s3269_s1 + $0x38] sm:$0xf]  ;;  %v2706_v26 = vor.u32 %v2070_v20, %v1903_v19 }
  0x5a   : > { %v2074_v25 = vld [vmem:[%s3269_s1 + $0x40] sm:$0xf0]  ;;  %v2710_v27 = vor.u32 %v2069_v21, %v1905_v23  ;;  %v1891_v28 = vld [vmem:[%s3269_s1] sm:$0xf]  ;;  %v2067_v29 = vld [vmem:[%s3269_s1 + $0x8] sm:$0xf0] }
  0x5b   : > { %v2066_v30 = vld [vmem:[%s3269_s1 + $0x4] sm:$0xf]  ;;  %v2722_v31 = vor.u32 %v2074_v25, %v1923_v24  ;;  %v1893_v32 = vld [vmem:[%s3269_s1 + $0xc] sm:$0xf0]  ;;  %v1911_v33 = vld [vmem:[%s3269_s1 + $0x20] sm:$0xf]  ;;  %v2734_v35 = vor.u32 %v2067_v29, %v1891_v28 }
  0x5c   : > { %467 = vmatpush.bf16.msra.mxu0 %v2622_v63  ;;  %617 = vmatpush.bf16.msra.mxu3 %v2622_v63  ;;  %v2071_v34 = vld [vmem:[%s3269_s1 + $0x28] sm:$0xf0]  ;;  %v2736_v37 = vld [vmem:[#allocation2] sm:$0xff]  ;;  %v2742_v39 = vor.u32 %v2066_v30, %v1893_v32  ;;  %v1899_v42 = vld [vmem:[%s3269_s1 + $0x8] sm:$0xf]  ;;  %s2090_s9 = sshll.u32 (%p2439_p6), %s2352_s14, 5 }
  0x5d   : > { %481 = vmatpush.bf16.msra.mxu1 %v2626_v0  ;;  %494 = vmatpush.bf16.msra.mxu2 %v2638_v4  ;;  %v2738_v38 = vld [vmem:[#allocation2 + $0x8] sm:$0xff]  ;;  %v2745_v41 = vor.u32 %v2071_v34, %v1911_v33  ;;  %v2068_v45 = vld [vmem:[%s3269_s1 + $0x10] sm:$0xf0]  ;;  %v327_v58 = vld [vmem:[%s2527_s24 + $0xc] sm:$0xff] }
  0x5e   : > { %v335_v46 = vpack.c.bf16 %v2738_v38, %v2736_v37  ;;  %v2759_v47 = vor.u32 %v2068_v45, %v1899_v42  ;;  %v325_v48 = vld [vmem:[%s2527_s24] sm:$0xff]  ;;  %v332_v62 = vunpack.c.l.bf16 %v327_v58  ;;  %v333_v1 = vunpack.c.h.bf16 %v327_v58  ;;  %v2830_v28 = vld [vmem:[%s3270_s2] ss:$0 sm:$0xff]  ;;  %v326_v45 = vld [vmem:[%s2527_s24 + $0x8] sm:$0xf] }
  0x5f   : > { %v329_v49 = vunpack.c.l.bf16 %v325_v48  ;;  %v330_v50 = vunpack.c.h.bf16 %v325_v48 }
  0x60   : > { %468 = vmatpush.bf16.msra.mxu0 %v2650_v8  ;;  %618 = vmatpush.bf16.msra.mxu3 %v2650_v8 }
  0x61   : > { %482 = vmatpush.bf16.msra.mxu1 %v2657_v10  ;;  %495 = vmatpush.bf16.msra.mxu2 %v2669_v14 }
  0x64   : > { %469 = vmatpush.bf16.msra.mxu0 %v2678_v17  ;;  %619 = vmatpush.bf16.msra.mxu3 %v2678_v17 }
  0x65   : > { %483 = vmatpush.bf16.msra.mxu1 %v2682_v18  ;;  %496 = vmatpush.bf16.msra.mxu2 %v2694_v22 }
  0x68   : > { %470 = vmatpush.bf16.msra.mxu0 %v2706_v26  ;;  %620 = vmatpush.bf16.msra.mxu3 %v2706_v26 }
  0x69   : > { %484 = vmatpush.bf16.msra.mxu1 %v2710_v27  ;;  %497 = vmatpush.bf16.msra.mxu2 %v2722_v31 }
  0x6c   : > { %471 = vmatpush.bf16.msra.mxu0 %v2734_v35  ;;  %621 = vmatpush.bf16.msra.mxu3 %v2734_v35 }
  0x6d   : > { %485 = vmatpush.bf16.msra.mxu1 %v2742_v39  ;;  %498 = vmatpush.bf16.msra.mxu2 %v2745_v41 }
  0x6f   : > { %472 = vmatmul.bf16.vlgmr.msra.gmra.mxu0 %v335_v46 }
  0x70   : > { %628 = vmatpush.bf16.msrb.mxu0 %v2552_v40  ;;  %779 = vmatpush.bf16.msrb.mxu3 %v2552_v40 }
  0x71   : > { %642 = vmatpush.bf16.msrb.mxu1 %v2585_v51  ;;  %499 = vmatpush.bf16.msra.mxu2 %v2759_v47 }
  0x72   : > { %486 = vmatmul.bf16.vlgmr.msra.gmra.mxu1 %v335_v46 }
  0x74   : > { %629 = vmatpush.bf16.msrb.mxu0 %v2565_v44  ;;  %780 = vmatpush.bf16.msrb.mxu3 %v2565_v44 }
  0x75   : > { %643 = vmatpush.bf16.msrb.mxu1 %v2610_v59  ;;  %765 = vmatpush.bf16.msrb.mxu2 %v2541_v36 }
  0x76   : > { %500 = vmatmul.bf16.vlgmr.msra.gmra.mxu2 %v335_v46 }
  0x78   : > { %630 = vmatpush.bf16.msrb.mxu0 %v2598_v55  ;;  %781 = vmatpush.bf16.msrb.mxu3 %v2598_v55 }
  0x79   : > { %644 = vmatpush.bf16.msrb.mxu1 %v2638_v4  ;;  %766 = vmatpush.bf16.msrb.mxu2 %v2561_v43 }
  0x7c   : > { %631 = vmatpush.bf16.msrb.mxu0 %v2626_v0  ;;  %782 = vmatpush.bf16.msrb.mxu3 %v2626_v0 }
  0x7d   : > { %645 = vmatpush.bf16.msrb.mxu1 %v2669_v14  ;;  %767 = vmatpush.bf16.msrb.mxu2 %v2588_v52 }
  0x80   : > { %632 = vmatpush.bf16.msrb.mxu0 %v2657_v10  ;;  %783 = vmatpush.bf16.msrb.mxu3 %v2657_v10 }
  0x81   : > { %646 = vmatpush.bf16.msrb.mxu1 %v2694_v22  ;;  %768 = vmatpush.bf16.msrb.mxu2 %v2622_v63 }
  0x84   : > { %633 = vmatpush.bf16.msrb.mxu0 %v2682_v18  ;;  %784 = vmatpush.bf16.msrb.mxu3 %v2682_v18 }
  0x85   : > { %647 = vmatpush.bf16.msrb.mxu1 %v2722_v31  ;;  %769 = vmatpush.bf16.msrb.mxu2 %v2650_v8 }
  0x88   : > { %634 = vmatpush.bf16.msrb.mxu0 %v2710_v27  ;;  %785 = vmatpush.bf16.msrb.mxu3 %v2710_v27 }
  0x89   : > { %648 = vmatpush.bf16.msrb.mxu1 %v2745_v41  ;;  %770 = vmatpush.bf16.msrb.mxu2 %v2678_v17 }
  0x8c   : > { %635 = vmatpush.bf16.msrb.mxu0 %v2742_v39  ;;  %786 = vmatpush.bf16.msrb.mxu3 %v2742_v39 }
  0x8d   : > { %649 = vmatpush.bf16.msrb.mxu1 %v2759_v47  ;;  %771 = vmatpush.bf16.msrb.mxu2 %v2706_v26 }
  0x90   : > { %793 = vmatpush.bf16.msra.mxu0 %v2585_v51 }
  0x91   : > { %916 = vmatpush.bf16.msra.mxu1 %v2541_v36  ;;  %772 = vmatpush.bf16.msrb.mxu2 %v2734_v35 }
  0x94   : > { %794 = vmatpush.bf16.msra.mxu0 %v2610_v59 }
  0x95   : > { %930 = vmatpush.bf16.msra.mxu2 %v2552_v40  ;;  %917 = vmatpush.bf16.msra.mxu1 %v2561_v43 }
  0x98   : > { %795 = vmatpush.bf16.msra.mxu0 %v2638_v4 }
  0x99   : > { %931 = vmatpush.bf16.msra.mxu2 %v2565_v44  ;;  %918 = vmatpush.bf16.msra.mxu1 %v2588_v52 }
  0x9c   : > { %796 = vmatpush.bf16.msra.mxu0 %v2669_v14 }
  0x9d   : > { %932 = vmatpush.bf16.msra.mxu2 %v2598_v55  ;;  %919 = vmatpush.bf16.msra.mxu1 %v2622_v63 }
  0xa0   : > { %797 = vmatpush.bf16.msra.mxu0 %v2694_v22 }
  0xa1   : > { %933 = vmatpush.bf16.msra.mxu2 %v2626_v0  ;;  %920 = vmatpush.bf16.msra.mxu1 %v2650_v8 }
  0xa4   : > { %798 = vmatpush.bf16.msra.mxu0 %v2722_v31 }
  0xa5   : > { %934 = vmatpush.bf16.msra.mxu2 %v2657_v10  ;;  %921 = vmatpush.bf16.msra.mxu1 %v2678_v17 }
  0xa8   : > { %799 = vmatpush.bf16.msra.mxu0 %v2745_v41 }
  0xa9   : > { %935 = vmatpush.bf16.msra.mxu2 %v2682_v18  ;;  %922 = vmatpush.bf16.msra.mxu1 %v2706_v26 }
  0xac   : > { %800 = vmatpush.bf16.msra.mxu0 %v2759_v47 }
  0xad   : > { %936 = vmatpush.bf16.msra.mxu2 %v2710_v27  ;;  %923 = vmatpush.bf16.msra.mxu1 %v2734_v35 }
  0xb1   : > { %937 = vmatpush.bf16.msra.mxu2 %v2742_v39 }
  0xec   : > { %v473_v53 = vpop.f32.mrf.mxu0 }
  0xed   : > { %v506_v54 = vadd.f32 %v473_v53, %v329_v49 }
  0xef   : > { %v487_v56 = vpop.f32.mrf.mxu1  ;;  %v1985_v60 = vmul.f32 -1.442695, %v506_v54  ;;  %v331_v54 = vunpack.c.l.bf16 %v326_v45 }
  0xf0   : > { %v546_v57 = vadd.f32 %v487_v56, %v330_v50 }
  0xf1   : > { %2153 = vpow2.f32 %v1985_v60 }
  0xf2   : > { %v1987_v61 = vmul.f32 -1.442695, %v546_v57 }
  0xf4   : > { %2155 = vpow2.f32 %v1987_v61  ;;  %v475_v2 = vpop.f32.mrf.mxu0 }
  0xf5   : > { %v507_v3 = vadd.f32 %v475_v2, %v332_v62 }
  0xf7   : > { %v489_v5 = vpop.f32.mrf.mxu1  ;;  %v2154_v7 = vpop.eup %2153  ;;  %v1986_v9 = vmul.f32 -1.442695, %v507_v3 }
  0xf8   : > { %v547_v6 = vadd.f32 %v489_v5, %v333_v1  ;;  %v514_v12 = vadd.f32 1.0, %v2154_v7 }
  0xf9   : > { %2157 = vpow2.f32 %v1986_v9  ;;  %v501_v32 = vpop.f32.mrf.mxu2  ;;  %v328_v9 = vld [vmem:[%s2527_s24 + $0x14] sm:$0xf] }
  0xfa   : > { %v2156_v11 = vpop.eup %2155  ;;  %v1988_v13 = vmul.f32 -1.442695, %v547_v6  ;;  %2159 = vrcp.f32 %v514_v12  ;;  %v527_v33 = vand.u32 2147483648, %v514_v12  ;;  %v525_v42 = vand.u32 2147483647, %v514_v12 }
  0xfb   : > { %v2820_v15 = vadd.f32 1.0, %v2156_v11  ;;  %vm521_vm1 = vweird.f32 %v514_v12  ;;  %v586_v48 = vadd.f32 %v2830_v28, %v501_v32 }
  0xfc   : > { %v528_v53 = vor.u32 1.1754944e-38, %v527_v33  ;;  %vm526_vm3 = vcmp.eq.f32.partialorder %v525_v42, 8.507059e+37 }
  0xfd   : > { %2161 = vrcp.f32 %v2820_v15  ;;  %vm561_vm5 = vweird.f32 %v2820_v15 }
  0xfe   : > { %2163 = vpow2.f32 %v1988_v13 }
  0xff   : > { %v2158_v16 = vpop.eup %2157 }
 0x100   : > { %v2160_v19 = vpop.eup %2159  ;;  %v515_v20 = vadd.f32 1.0, %v2158_v16 }
 0x101   : > { %v517_v23 = vmul.f32 %v2160_v19, %v514_v12  ;;  %vm522_vm0 = vweird.f32 %v2160_v19  ;;  %v503_v11 = vpop.f32.mrf.mxu2  ;;  %v567_v12 = vand.u32 2147483648, %v2820_v15 }
 0x102   : > { %2165 = vrcp.f32 %v515_v20  ;;  %vm523_vm2 = vmor %vm521_vm1, %vm522_vm0  ;;  %v542_v3 = vand.u32 2147483648, %v515_v20  ;;  %v540_v7 = vand.u32 2147483647, %v515_v20  ;;  %vm536_vm7 = vweird.f32 %v515_v20 }
 0x103   : > { %v2823_v21 = vpop.eup %2161  ;;  %v518_v29 = vsub.f32 1.0, %v517_v23  ;;  %v587_v32 = vadd.f32 %v2830_v28, %v503_v11  ;;  %v568_v42 = vor.u32 1.1754944e-38, %v567_v12 }
 0x104   : > { %v2164_v24 = vpop.eup %2163  ;;  %v557_v30 = vmul.f32 %v2823_v21, %v2820_v15  ;;  %vm562_vm6 = vweird.f32 %v2823_v21  ;;  %vm541_vm9 = vcmp.eq.f32.partialorder %v540_v7, 8.507059e+37 }
 0x105   : > { %v2825_v25 = vadd.f32 1.0, %v2164_v24  ;;  %v519_v34 = vmul.f32 %v2160_v19, %v518_v29  ;;  %v565_v24 = vand.u32 2147483647, %v2820_v15  ;;  %v334_v29 = vunpack.c.l.bf16 %v328_v9  ;;  %vm563_vm10 = vmor %vm561_vm5, %vm562_vm6 }
 0x106   : > { %v558_v50 = vsub.f32 1.0, %v557_v30 }
 0x107   : > { %2167 = vrcp.f32 %v2825_v25  ;;  %v520_v46 = vadd.f32 %v2160_v19, %v519_v34  ;;  %vm566_vm11 = vcmp.eq.f32.partialorder %v565_v24, 8.507059e+37  ;;  %v582_v15 = vand.u32 2147483648, %v2825_v25 }
 0x108   : > { %v2166_v49 = vpop.eup %2165  ;;  %v559_v1 = vmul.f32 %v2823_v21, %v558_v50  ;;  %vm576_vm13 = vweird.f32 %v2825_v25 }
 0x109   : > { %v524_v56 = vsel %vm523_vm2, %v2160_v19, %v520_v46  ;;  %v532_v57 = vmul.f32 %v2166_v49, %v515_v20  ;;  %vm537_vm4 = vweird.f32 %v2166_v49  ;;  %v543_v19 = vor.u32 1.1754944e-38, %v542_v3 }
 0x10a   : > { %v529_v58 = vsel %vm526_vm3, %v528_v53, %v524_v56  ;;  %vm538_vm8 = vmor %vm536_vm7, %vm537_vm4  ;;  %v560_v23 = vadd.f32 %v2823_v21, %v559_v1  ;;  %v580_v56 = vand.u32 2147483647, %v2825_v25 }
 0x10b   : > { %v588_v61 = vmul.f32 %v586_v48, %v529_v58  ;;  %v533_v62 = vsub.f32 1.0, %v532_v57 }
 0x10c   : > { %v564_v20 = vsel %vm563_vm10, %v2823_v21, %v560_v23  ;;  %vm581_vm15 = vcmp.eq.f32.partialorder %v580_v56, 8.507059e+37 }
 0x10d   : > { %v2168_v60 = vpop.eup %2167  ;;  %v590_v5 = vadd.f32 %v588_v61, %v331_v54  ;;  %v534_v6 = vmul.f32 %v2166_v49, %v533_v62 }
 0x10e   : > { %v572_v2 = vmul.f32 %v2168_v60, %v2825_v25  ;;  %vm577_vm12 = vweird.f32 %v2168_v60 }
 0x10f   : > { %2169 = vtanh.f32 %v590_v5  ;;  %v535_v13 = vadd.f32 %v2166_v49, %v534_v6  ;;  %vm578_vm14 = vmor %vm576_vm13, %vm577_vm12  ;;  %v1991_v6 = vld [vmem:[%s2527_s24 + $0x24] sm:$0xff] }
 0x110   : > { %v573_v16 = vsub.f32 1.0, %v572_v2  ;;  %v611_v11 = vunpack.c.h.bf16 %v1991_v6  ;;  %v610_v24 = vunpack.c.l.bf16 %v1991_v6 }
 0x111   : > { %v539_v30 = vsel %vm538_vm8, %v2166_v49, %v535_v13  ;;  %v569_v49 = vsel %vm566_vm11, %v568_v42, %v564_v20 }
 0x112   : > { %v544_v33 = vsel %vm541_vm9, %v543_v19, %v539_v30  ;;  %v574_v45 = vmul.f32 %v2168_v60, %v573_v16 }
 0x113   : > { %v589_v34 = vmul.f32 %v587_v32, %v544_v33 }
 0x114   : > { %v575_v53 = vadd.f32 %v2168_v60, %v574_v45 }
 0x115   : > { %v2170_v46 = vpop.eup %2169  ;;  %v591_v48 = vadd.f32 %v589_v34, %v334_v29 }
 0x116   : > { %v594_v50 = vsub.f32 %v2736_v37, %v2170_v46  ;;  %v579_v21 = vsel %vm578_vm14, %v2168_v60, %v575_v53  ;;  %v583_v37 = vor.u32 1.1754944e-38, %v582_v15 }
 0x117   : > { %2171 = vtanh.f32 %v591_v48 }
 0x118   : > { %v596_v54 = vmul.f32 %v594_v50, %v569_v49  ;;  %v584_v62 = vsel %vm581_vm15, %v583_v37, %v579_v21 }
 0x11a   : > { %v2853_v57 = vadd.f32 %v2170_v46, %v596_v54 }
 0x11c   : > { %600 = vst [vmem:[%s2529_s25] sm:$0xff] %v2853_v57 }
 0x11d   : > { %v2172_v58 = vpop.eup %2171 }
 0x11e   : > { %v595_v61 = vsub.f32 %v2738_v38, %v2172_v58  ;;  %v1989_v38 = vld [vmem:[%s2527_s24 + $0x18] sm:$0xff] }
 0x11f   : > { %v608_v60 = vunpack.c.h.bf16 %v1989_v38  ;;  %v607_v7 = vunpack.c.l.bf16 %v1989_v38 }
 0x120   : > { %v597_v1 = vmul.f32 %v595_v61, %v584_v62 }
 0x122   : > { %v2858_v2 = vadd.f32 %v2172_v58, %v597_v1  ;;  %v1990_v1 = vld [vmem:[%s2527_s24 + $0x20] sm:$0xf] }
 0x124   : > { %601 = vst [vmem:[%s2529_s25 + $0x8] sm:$0xff] %v2858_v2  ;;  %v613_v25 = vpack.c.bf16 %v2858_v2, %v2853_v57 }
 0x126   : > { %622 = vmatmul.bf16.vlgmr.msra.gmra.mxu3 %v613_v25  ;;  %636 = vmatmul.bf16.vlgmr.msrb.gmra.mxu0 %v613_v25 }
 0x127   : > { %650 = vmatmul.bf16.vlgmr.msrb.gmra.mxu1 %v613_v25  ;;  %944 = vmatpush.bf16.msra.mxu3 %v2585_v51 }
 0x128   : > { %1067 = vmatpush.bf16.msrb.mxu0 %v2541_v36  ;;  %1081 = vmatpush.bf16.msrb.mxu1 %v2552_v40 }
 0x12b   : > { %945 = vmatpush.bf16.msra.mxu3 %v2610_v59 }
 0x12c   : > { %1068 = vmatpush.bf16.msrb.mxu0 %v2561_v43  ;;  %1082 = vmatpush.bf16.msrb.mxu1 %v2565_v44 }
 0x12f   : > { %946 = vmatpush.bf16.msra.mxu3 %v2638_v4 }
 0x130   : > { %1069 = vmatpush.bf16.msrb.mxu0 %v2588_v52  ;;  %1083 = vmatpush.bf16.msrb.mxu1 %v2598_v55 }
 0x133   : > { %947 = vmatpush.bf16.msra.mxu3 %v2669_v14 }
 0x134   : > { %1070 = vmatpush.bf16.msrb.mxu0 %v2622_v63  ;;  %1084 = vmatpush.bf16.msrb.mxu1 %v2626_v0 }
 0x137   : > { %948 = vmatpush.bf16.msra.mxu3 %v2694_v22 }
 0x138   : > { %1071 = vmatpush.bf16.msrb.mxu0 %v2650_v8  ;;  %1085 = vmatpush.bf16.msrb.mxu1 %v2657_v10 }
 0x13b   : > { %949 = vmatpush.bf16.msra.mxu3 %v2722_v31 }
 0x13c   : > { %1072 = vmatpush.bf16.msrb.mxu0 %v2678_v17  ;;  %1086 = vmatpush.bf16.msrb.mxu1 %v2682_v18 }
 0x13f   : > { %950 = vmatpush.bf16.msra.mxu3 %v2745_v41 }
 0x140   : > { %1073 = vmatpush.bf16.msrb.mxu0 %v2706_v26  ;;  %1087 = vmatpush.bf16.msrb.mxu1 %v2710_v27 }
 0x143   : > { %951 = vmatpush.bf16.msra.mxu3 %v2759_v47 }
 0x144   : > { %1074 = vmatpush.bf16.msrb.mxu0 %v2734_v35  ;;  %1088 = vmatpush.bf16.msrb.mxu1 %v2742_v39 }
 0x1a3   : > { %v637_v3 = vpop.f32.mrf.mxu0 }
 0x1a4   : > { %v696_v5 = vadd.f32 %v637_v3, %v608_v60  ;;  %v651_v56 = vpop.f32.mrf.mxu1 }
 0x1a5   : > { %v736_v3 = vadd.f32 %v2830_v28, %v651_v56 }
 0x1a6   : > { %v1995_v9 = vmul.f32 -1.442695, %v696_v5 }
 0x1a8   : > { %2173 = vpow2.f32 %v1995_v9 }
 0x1a9   : > { %v623_v12 = vpop.f32.mrf.mxu3 }
 0x1aa   : > { %v656_v13 = vadd.f32 %v623_v12, %v607_v7 }
 0x1ab   : > { %v639_v16 = vpop.f32.mrf.mxu0 }
 0x1ac   : > { %v1993_v19 = vmul.f32 -1.442695, %v656_v13  ;;  %v697_v23 = vadd.f32 %v639_v16, %v611_v11  ;;  %v609_v11 = vunpack.c.l.bf16 %v1990_v1 }
 0x1ae   : > { %2175 = vpow2.f32 %v1993_v19  ;;  %v1996_v29 = vmul.f32 -1.442695, %v697_v23  ;;  %v2174_v30 = vpop.eup %2173 }
 0x1af   : > { %v2890_v42 = vadd.f32 1.0, %v2174_v30 }
 0x1b0   : > { %2177 = vpow2.f32 %v1996_v29 }
 0x1b1   : > { %v625_v32 = vpop.f32.mrf.mxu3  ;;  %vm711_vm9 = vweird.f32 %v2890_v42 }
 0x1b2   : > { %v657_v33 = vadd.f32 %v625_v32, %v610_v24  ;;  %v653_v24 = vpop.f32.mrf.mxu1 }
 0x1b4   : > { %v2176_v34 = vpop.eup %2175  ;;  %v1994_v45 = vmul.f32 -1.442695, %v657_v33 }
 0x1b5   : > { %v664_v20 = vadd.f32 1.0, %v2176_v34  ;;  %v1992_v34 = vld [vmem:[%s2527_s24 + $0x2c] sm:$0xf] }
 0x1b6   : > { %2179 = vpow2.f32 %v1994_v45  ;;  %v2178_v46 = vpop.eup %2177  ;;  %v737_v45 = vadd.f32 %v2830_v28, %v653_v24 }
 0x1b7   : > { %2181 = vrcp.f32 %v664_v20  ;;  %v2893_v50 = vadd.f32 1.0, %v2178_v46  ;;  %v677_v37 = vand.u32 2147483648, %v664_v20  ;;  %v675_v62 = vand.u32 2147483647, %v664_v20 }
 0x1b8   : > { %2183 = vrcp.f32 %v2890_v42  ;;  %vm671_vm1 = vweird.f32 %v664_v20 }
 0x1b9   : > { %v678_v5 = vor.u32 1.1754944e-38, %v677_v37  ;;  %vm676_vm3 = vcmp.eq.f32.partialorder %v675_v62, 8.507059e+37  ;;  %v715_v37 = vand.u32 2147483647, %v2890_v42  ;;  %vm726_vm13 = vweird.f32 %v2893_v50 }
 0x1bb   : > { %vm716_vm11 = vcmp.eq.f32.partialorder %v715_v37, 8.507059e+37 }
 0x1bc   : > { %v2180_v48 = vpop.eup %2179 }
 0x1bd   : > { %v2182_v49 = vpop.eup %2181  ;;  %v665_v53 = vadd.f32 1.0, %v2180_v48 }
 0x1be   : > { %v2895_v54 = vpop.eup %2183  ;;  %v667_v15 = vmul.f32 %v2182_v49, %v664_v20  ;;  %vm672_vm0 = vweird.f32 %v2182_v49 }
 0x1bf   : > { %2185 = vrcp.f32 %v665_v53  ;;  %v707_v58 = vmul.f32 %v2895_v54, %v2890_v42  ;;  %vm673_vm2 = vmor %vm671_vm1, %vm672_vm0  ;;  %v692_v29 = vand.u32 2147483648, %v665_v53  ;;  %v690_v32 = vand.u32 2147483647, %v665_v53 }
 0x1c0   : > { %v668_v21 = vsub.f32 1.0, %v667_v15  ;;  %2187 = vrcp.f32 %v2893_v50  ;;  %vm686_vm5 = vweird.f32 %v665_v53  ;;  %vm712_vm7 = vweird.f32 %v2895_v54 }
 0x1c1   : > { %v708_v60 = vsub.f32 1.0, %v707_v58  ;;  %v693_v48 = vor.u32 1.1754944e-38, %v692_v29  ;;  %v717_v15 = vand.u32 2147483648, %v2890_v42  ;;  %vm691_vm8 = vcmp.eq.f32.partialorder %v690_v32, 8.507059e+37  ;;  %vm713_vm10 = vmor %vm711_vm9, %vm712_vm7 }
 0x1c2   : > { %v669_v61 = vmul.f32 %v2182_v49, %v668_v21  ;;  %v612_v21 = vunpack.c.l.bf16 %v1992_v34  ;;  %v732_v42 = vand.u32 2147483648, %v2893_v50  ;;  %v2001_v34 = vld [vmem:[%s2527_s24 + $0x3c] sm:$0xff] }
 0x1c3   : > { %v709_v19 = vmul.f32 %v2895_v54, %v708_v60 }
 0x1c4   : > { %v670_v25 = vadd.f32 %v2182_v49, %v669_v61 }
 0x1c5   : > { %v2186_v38 = vpop.eup %2185 }
 0x1c6   : > { %v2188_v6 = vpop.eup %2187  ;;  %v674_v7 = vsel %vm673_vm2, %v2182_v49, %v670_v25  ;;  %v682_v9 = vmul.f32 %v2186_v38, %v665_v53  ;;  %vm687_vm4 = vweird.f32 %v2186_v38  ;;  %v710_v49 = vadd.f32 %v2895_v54, %v709_v19 }
 0x1c7   : > { %v679_v12 = vsel %vm676_vm3, %v678_v5, %v674_v7  ;;  %v722_v23 = vmul.f32 %v2188_v6, %v2893_v50  ;;  %vm688_vm6 = vmor %vm686_vm5, %vm687_vm4  ;;  %v718_v25 = vor.u32 1.1754944e-38, %v717_v15  ;;  %vm727_vm12 = vweird.f32 %v2188_v6 }
 0x1c8   : > { %v683_v13 = vsub.f32 1.0, %v682_v9  ;;  %v738_v16 = vmul.f32 %v736_v3, %v679_v12  ;;  %v714_v62 = vsel %vm713_vm10, %v2895_v54, %v710_v49  ;;  %v730_v9 = vand.u32 2147483647, %v2893_v50  ;;  %vm728_vm14 = vmor %vm726_vm13, %vm727_vm12 }
 0x1c9   : > { %v723_v46 = vsub.f32 1.0, %v722_v23 }
 0x1ca   : > { %v684_v30 = vmul.f32 %v2186_v38, %v683_v13  ;;  %v740_v33 = vadd.f32 %v738_v16, %v609_v11  ;;  %vm731_vm15 = vcmp.eq.f32.partialorder %v730_v9, 8.507059e+37 }
 0x1cb   : > { %v724_v61 = vmul.f32 %v2188_v6, %v723_v46  ;;  %v761_v46 = vunpack.c.l.bf16 %v2001_v34 }
 0x1cc   : > { %v685_v20 = vadd.f32 %v2186_v38, %v684_v30  ;;  %2189 = vtanh.f32 %v740_v33 }
 0x1cd   : > { %v725_v5 = vadd.f32 %v2188_v6, %v724_v61 }
 0x1ce   : > { %v689_v56 = vsel %vm688_vm6, %v2186_v38, %v685_v20  ;;  %v719_v38 = vsel %vm716_vm11, %v718_v25, %v714_v62 }
 0x1cf   : > { %v694_v58 = vsel %vm691_vm8, %v693_v48, %v689_v56  ;;  %v729_v11 = vsel %vm728_vm14, %v2188_v6, %v725_v5  ;;  %v762_v48 = vunpack.c.h.bf16 %v2001_v34 }
 0x1d0   : > { %v739_v53 = vmul.f32 %v737_v45, %v694_v58 }
 0x1d2   : > { %v2190_v1 = vpop.eup %2189  ;;  %v741_v60 = vadd.f32 %v739_v53, %v612_v21 }
 0x1d3   : > { %v744_v3 = vsub.f32 %v2853_v57, %v2190_v1  ;;  %v733_v57 = vor.u32 1.1754944e-38, %v732_v42 }
 0x1d4   : > { %2191 = vtanh.f32 %v741_v60 }
 0x1d5   : > { %v746_v7 = vmul.f32 %v744_v3, %v719_v38  ;;  %v734_v16 = vsel %vm731_vm15, %v733_v57, %v729_v11 }
 0x1d7   : > { %v2916_v54 = vadd.f32 %v2190_v1, %v746_v7 }
 0x1d9   : > { %1997 = vst [vmem:[%s2529_s25 + $0x10] sm:$0xff] %v2916_v54 }
 0x1da   : > { %v2192_v12 = vpop.eup %2191 }
 0x1db   : > { %v745_v13 = vsub.f32 %v2858_v2, %v2192_v12  ;;  %v1999_v2 = vld [vmem:[%s2527_s24 + $0x30] sm:$0xff] }
 0x1dc   : > { %v758_v6 = vunpack.c.l.bf16 %v1999_v2  ;;  %v759_v24 = vunpack.c.h.bf16 %v1999_v2 }
 0x1dd   : > { %v747_v19 = vmul.f32 %v745_v13, %v734_v16 }
 0x1df   : > { %v2921_v23 = vadd.f32 %v2192_v12, %v747_v19  ;;  %v2000_v19 = vld [vmem:[%s2527_s24 + $0x38] sm:$0xf] }
 0x1e1   : > { %1998 = vst [vmem:[%s2529_s25 + $0x18] sm:$0xff] %v2921_v23  ;;  %v764_v50 = vpack.c.bf16 %v2921_v23, %v2916_v54 }
 0x1e3   : > { %773 = vmatmul.bf16.vlgmr.msrb.gmra.mxu2 %v764_v50  ;;  %787 = vmatmul.bf16.vlgmr.msrb.gmra.mxu3 %v764_v50 }
 0x1e4   : > { %801 = vmatmul.bf16.vlgmr.msra.gmra.mxu0 %v764_v50  ;;  %1095 = vmatpush.bf16.msrb.mxu2 %v2585_v51 }
 0x1e5   : > { %1218 = vmatpush.bf16.msrb.mxu3 %v2541_v36  ;;  %1232 = vmatpush.bf16.msra.mxu0 %v2552_v40 }
 0x1e8   : > { %1096 = vmatpush.bf16.msrb.mxu2 %v2610_v59 }
 0x1e9   : > { %1219 = vmatpush.bf16.msrb.mxu3 %v2561_v43  ;;  %1233 = vmatpush.bf16.msra.mxu0 %v2565_v44 }
 0x1ec   : > { %1097 = vmatpush.bf16.msrb.mxu2 %v2638_v4 }
 0x1ed   : > { %1220 = vmatpush.bf16.msrb.mxu3 %v2588_v52  ;;  %1234 = vmatpush.bf16.msra.mxu0 %v2598_v55 }
 0x1f0   : > { %1098 = vmatpush.bf16.msrb.mxu2 %v2669_v14 }
 0x1f1   : > { %1221 = vmatpush.bf16.msrb.mxu3 %v2622_v63  ;;  %1235 = vmatpush.bf16.msra.mxu0 %v2626_v0 }
 0x1f4   : > { %1099 = vmatpush.bf16.msrb.mxu2 %v2694_v22 }
 0x1f5   : > { %1222 = vmatpush.bf16.msrb.mxu3 %v2650_v8  ;;  %1236 = vmatpush.bf16.msra.mxu0 %v2657_v10 }
 0x1f8   : > { %1100 = vmatpush.bf16.msrb.mxu2 %v2722_v31 }
 0x1f9   : > { %1223 = vmatpush.bf16.msrb.mxu3 %v2678_v17  ;;  %1237 = vmatpush.bf16.msra.mxu0 %v2682_v18 }
 0x1fc   : > { %1101 = vmatpush.bf16.msrb.mxu2 %v2745_v41 }
 0x1fd   : > { %1224 = vmatpush.bf16.msrb.mxu3 %v2706_v26  ;;  %1238 = vmatpush.bf16.msra.mxu0 %v2710_v27 }
 0x200   : > { %1102 = vmatpush.bf16.msrb.mxu2 %v2759_v47 }
 0x201   : > { %1225 = vmatpush.bf16.msrb.mxu3 %v2734_v35  ;;  %1239 = vmatpush.bf16.msra.mxu0 %v2742_v39 }
 0x261   : > { %v802_v42 = vpop.f32.mrf.mxu0 }
 0x266   : > { %v774_v29 = vpop.f32.mrf.mxu2  ;;  %v788_v30 = vpop.f32.mrf.mxu3 }
 0x267   : > { %v807_v32 = vadd.f32 %v774_v29, %v758_v6  ;;  %v847_v33 = vadd.f32 %v788_v30, %v759_v24  ;;  %v887_v6 = vadd.f32 %v2830_v28, %v802_v42 }
 0x269   : > { %v2003_v45 = vmul.f32 -1.442695, %v807_v32  ;;  %v2005_v20 = vmul.f32 -1.442695, %v847_v33  ;;  %v760_v33 = vunpack.c.l.bf16 %v2000_v19 }
 0x26b   : > { %2193 = vpow2.f32 %v2003_v45 }
 0x26c   : > { %2195 = vpow2.f32 %v2005_v20 }
 0x26e   : > { %v776_v49 = vpop.f32.mrf.mxu2  ;;  %v790_v15 = vpop.f32.mrf.mxu3 }
 0x26f   : > { %v808_v56 = vadd.f32 %v776_v49, %v761_v46  ;;  %v848_v21 = vadd.f32 %v790_v15, %v762_v48  ;;  %v804_v49 = vpop.f32.mrf.mxu0 }
 0x271   : > { %v2194_v58 = vpop.eup %2193  ;;  %v2004_v37 = vmul.f32 -1.442695, %v808_v56  ;;  %v2006_v62 = vmul.f32 -1.442695, %v848_v21 }
 0x272   : > { %v2196_v53 = vpop.eup %2195  ;;  %v815_v61 = vadd.f32 1.0, %v2194_v58 }
 0x273   : > { %v2953_v1 = vadd.f32 1.0, %v2196_v53  ;;  %2197 = vpow2.f32 %v2004_v37  ;;  %v2002_v53 = vld [vmem:[%s2527_s24 + $0x44] sm:$0xf] }
 0x274   : > { %2199 = vrcp.f32 %v815_v61  ;;  %v828_v12 = vand.u32 2147483648, %v815_v61  ;;  %v826_v16 = vand.u32 2147483647, %v815_v61  ;;  %vm822_vm1 = vweird.f32 %v815_v61 }
 0x275   : > { %2201 = vrcp.f32 %v2953_v1  ;;  %vm862_vm9 = vweird.f32 %v2953_v1 }
 0x276   : > { %2203 = vpow2.f32 %v2006_v62  ;;  %v829_v24 = vor.u32 1.1754944e-38, %v828_v12  ;;  %vm827_vm3 = vcmp.eq.f32.partialorder %v826_v16, 8.507059e+37  ;;  %v866_v12 = vand.u32 2147483647, %v2953_v1 }
 0x278   : > { %vm867_vm11 = vcmp.eq.f32.partialorder %v866_v12, 8.507059e+37 }
 0x279   : > { %v2198_v25 = vpop.eup %2197 }
 0x27a   : > { %v2200_v60 = vpop.eup %2199  ;;  %v816_v3 = vadd.f32 1.0, %v2198_v25 }
 0x27b   : > { %v2956_v38 = vpop.eup %2201  ;;  %v818_v5 = vmul.f32 %v2200_v60, %v815_v61  ;;  %vm823_vm0 = vweird.f32 %v2200_v60  ;;  %v888_v61 = vadd.f32 %v2830_v28, %v804_v49 }
 0x27c   : > { %v2204_v7 = vpop.eup %2203  ;;  %2205 = vrcp.f32 %v816_v3  ;;  %v858_v57 = vmul.f32 %v2956_v38, %v2953_v1  ;;  %vm824_vm2 = vmor %vm822_vm1, %vm823_vm0  ;;  %v843_v15 = vand.u32 2147483648, %v816_v3  ;;  %v841_v58 = vand.u32 2147483647, %v816_v3 }
 0x27d   : > { %v819_v9 = vsub.f32 1.0, %v818_v5  ;;  %v2958_v11 = vadd.f32 1.0, %v2204_v7  ;;  %vm837_vm5 = vweird.f32 %v816_v3  ;;  %vm863_vm6 = vweird.f32 %v2956_v38 }
 0x27e   : > { %v859_v29 = vsub.f32 1.0, %v858_v57  ;;  %v868_v7 = vand.u32 2147483648, %v2953_v1  ;;  %vm842_vm8 = vcmp.eq.f32.partialorder %v841_v58, 8.507059e+37  ;;  %vm864_vm10 = vmor %vm862_vm9, %vm863_vm6 }
 0x27f   : > { %v820_v13 = vmul.f32 %v2200_v60, %v819_v9  ;;  %2207 = vrcp.f32 %v2958_v11  ;;  %v763_v9 = vunpack.c.l.bf16 %v2002_v53  ;;  %v883_v1 = vand.u32 2147483648, %v2958_v11 }
 0x280   : > { %v860_v48 = vmul.f32 %v2956_v38, %v859_v29  ;;  %vm877_vm13 = vweird.f32 %v2958_v11 }
 0x281   : > { %v821_v50 = vadd.f32 %v2200_v60, %v820_v13 }
 0x282   : > { %v2206_v2 = vpop.eup %2205  ;;  %v861_v25 = vadd.f32 %v2956_v38, %v860_v48 }
 0x283   : > { %v825_v30 = vsel %vm824_vm2, %v2200_v60, %v821_v50  ;;  %v833_v32 = vmul.f32 %v2206_v2, %v816_v3  ;;  %vm838_vm4 = vweird.f32 %v2206_v2  ;;  %v844_v60 = vor.u32 1.1754944e-38, %v843_v15 }
 0x284   : > { %v830_v34 = vsel %vm827_vm3, %v829_v24, %v825_v30  ;;  %vm839_vm7 = vmor %vm837_vm5, %vm838_vm4  ;;  %v865_v16 = vsel %vm864_vm10, %v2956_v38, %v861_v25  ;;  %v869_v50 = vor.u32 1.1754944e-38, %v868_v7 }
 0x285   : > { %v2208_v45 = vpop.eup %2207  ;;  %v889_v20 = vmul.f32 %v887_v6, %v830_v34  ;;  %v834_v46 = vsub.f32 1.0, %v833_v32  ;;  %v881_v32 = vand.u32 2147483647, %v2958_v11 }
 0x286   : > { %v873_v56 = vmul.f32 %v2208_v45, %v2958_v11  ;;  %vm878_vm12 = vweird.f32 %v2208_v45 }
 0x287   : > { %v835_v21 = vmul.f32 %v2206_v2, %v834_v46  ;;  %v891_v37 = vadd.f32 %v889_v20, %v760_v33  ;;  %vm879_vm14 = vmor %vm877_vm13, %vm878_vm12  ;;  %vm882_vm15 = vcmp.eq.f32.partialorder %v881_v32, 8.507059e+37 }
 0x288   : > { %v874_v5 = vsub.f32 1.0, %v873_v56 }
 0x289   : > { %v836_v62 = vadd.f32 %v2206_v2, %v835_v21  ;;  %2209 = vtanh.f32 %v891_v37  ;;  %v2011_v21 = vld [vmem:[%s2527_s24 + $0x54] sm:$0xff] }
 0x28a   : > { %v875_v13 = vmul.f32 %v2208_v45, %v874_v5  ;;  %v912_v53 = vunpack.c.l.bf16 %v2011_v21 }
 0x28b   : > { %v840_v42 = vsel %vm839_vm7, %v2206_v2, %v836_v62  ;;  %v870_v2 = vsel %vm867_vm11, %v869_v50, %v865_v16 }
 0x28c   : > { %v845_v57 = vsel %vm842_vm8, %v844_v60, %v840_v42  ;;  %v876_v29 = vadd.f32 %v2208_v45, %v875_v13 }
 0x28d   : > { %v890_v3 = vmul.f32 %v888_v61, %v845_v57 }
 0x28e   : > { %v880_v33 = vsel %vm879_vm14, %v2208_v45, %v876_v29 }
 0x28f   : > { %v2210_v19 = vpop.eup %2209  ;;  %v892_v6 = vadd.f32 %v890_v3, %v763_v9  ;;  %v913_v9 = vunpack.c.h.bf16 %v2011_v21 }
 0x290   : > { %v895_v24 = vsub.f32 %v2916_v54, %v2210_v19  ;;  %v884_v54 = vor.u32 1.1754944e-38, %v883_v1 }
 0x291   : > { %2211 = vtanh.f32 %v892_v6 }
 0x292   : > { %v897_v30 = vmul.f32 %v895_v24, %v870_v2  ;;  %v885_v46 = vsel %vm882_vm15, %v884_v54, %v880_v33  ;;  %v2010_v33 = vld [vmem:[%s2527_s24 + $0x50] sm:$0xf] }
 0x294   : > { %v2979_v38 = vadd.f32 %v2210_v19, %v897_v30 }
 0x296   : > { %2007 = vst [vmem:[%s2529_s25 + $0x20] sm:$0xff] %v2979_v38 }
 0x297   : > { %v2212_v34 = vpop.eup %2211 }
 0x298   : > { %v896_v20 = vsub.f32 %v2921_v23, %v2212_v34  ;;  %v2009_v23 = vld [vmem:[%s2527_s24 + $0x48] sm:$0xff] }
 0x299   : > { %v909_v45 = vunpack.c.l.bf16 %v2009_v23  ;;  %v910_v37 = vunpack.c.h.bf16 %v2009_v23  ;;  %v911_v23 = vunpack.c.l.bf16 %v2010_v33 }
 0x29a   : > { %v898_v48 = vmul.f32 %v896_v20, %v885_v46 }
 0x29c   : > { %v2984_v49 = vadd.f32 %v2212_v34, %v898_v48 }
 0x29e   : > { %2008 = vst [vmem:[%s2529_s25 + $0x28] sm:$0xff] %v2984_v49  ;;  %v915_v11 = vpack.c.bf16 %v2984_v49, %v2979_v38 }
 0x2a0   : > { %924 = vmatmul.bf16.vlgmr.msra.gmra.mxu1 %v915_v11  ;;  %938 = vmatmul.bf16.vlgmr.msra.gmra.mxu2 %v915_v11 }
 0x2a1   : > { %952 = vmatmul.bf16.vlgmr.msra.gmra.mxu3 %v915_v11  ;;  %1246 = vmatpush.bf16.msra.mxu1 %v2585_v51 }
 0x2a2   : > { %1369 = vmatpush.bf16.msra.mxu2 %v2541_v36  ;;  %1383 = vmatpush.bf16.msra.mxu3 %v2552_v40 }
 0x2a5   : > { %1247 = vmatpush.bf16.msra.mxu1 %v2610_v59 }
 0x2a6   : > { %1370 = vmatpush.bf16.msra.mxu2 %v2561_v43  ;;  %1384 = vmatpush.bf16.msra.mxu3 %v2565_v44 }
 0x2a9   : > { %1248 = vmatpush.bf16.msra.mxu1 %v2638_v4 }
 0x2aa   : > { %1371 = vmatpush.bf16.msra.mxu2 %v2588_v52  ;;  %1385 = vmatpush.bf16.msra.mxu3 %v2598_v55 }
 0x2ad   : > { %1249 = vmatpush.bf16.msra.mxu1 %v2669_v14 }
 0x2ae   : > { %1372 = vmatpush.bf16.msra.mxu2 %v2622_v63  ;;  %1386 = vmatpush.bf16.msra.mxu3 %v2626_v0 }
 0x2b1   : > { %1250 = vmatpush.bf16.msra.mxu1 %v2694_v22 }
 0x2b2   : > { %1373 = vmatpush.bf16.msra.mxu2 %v2650_v8  ;;  %1387 = vmatpush.bf16.msra.mxu3 %v2657_v10 }
 0x2b5   : > { %1251 = vmatpush.bf16.msra.mxu1 %v2722_v31 }
 0x2b6   : > { %1374 = vmatpush.bf16.msra.mxu2 %v2678_v17  ;;  %1388 = vmatpush.bf16.msra.mxu3 %v2682_v18 }
 0x2b9   : > { %1252 = vmatpush.bf16.msra.mxu1 %v2745_v41 }
 0x2ba   : > { %1375 = vmatpush.bf16.msra.mxu2 %v2706_v26  ;;  %1389 = vmatpush.bf16.msra.mxu3 %v2710_v27 }
 0x2bd   : > { %1253 = vmatpush.bf16.msra.mxu1 %v2759_v47 }
 0x2be   : > { %1376 = vmatpush.bf16.msra.mxu2 %v2734_v35  ;;  %1390 = vmatpush.bf16.msra.mxu3 %v2742_v39 }
 0x31d   : > { %v925_v15 = vpop.f32.mrf.mxu1 }
 0x31e   : > { %v958_v56 = vadd.f32 %v925_v15, %v909_v45 }
 0x320   : > { %v2013_v58 = vmul.f32 -1.442695, %v958_v56 }
 0x322   : > { %2213 = vpow2.f32 %v2013_v58 }
 0x323   : > { %v939_v61 = vpop.f32.mrf.mxu2 }
 0x324   : > { %v998_v62 = vadd.f32 %v939_v61, %v910_v37  ;;  %v953_v30 = vpop.f32.mrf.mxu3 }
 0x325   : > { %v927_v25 = vpop.f32.mrf.mxu1  ;;  %v1038_v58 = vadd.f32 %v2830_v28, %v953_v30 }
 0x326   : > { %v2015_v60 = vmul.f32 -1.442695, %v998_v62  ;;  %v959_v5 = vadd.f32 %v927_v25, %v912_v53  ;;  %v2012_v25 = vld [vmem:[%s2527_s24 + $0x5c] sm:$0xf] }
 0x328   : > { %v2214_v7 = vpop.eup %2213  ;;  %2215 = vpow2.f32 %v2015_v60  ;;  %v2014_v42 = vmul.f32 -1.442695, %v959_v5 }
 0x329   : > { %v966_v12 = vadd.f32 1.0, %v2214_v7 }
 0x32a   : > { %2217 = vpow2.f32 %v2014_v42 }
 0x32b   : > { %2219 = vrcp.f32 %v966_v12  ;;  %v941_v57 = vpop.f32.mrf.mxu2  ;;  %v979_v1 = vand.u32 2147483648, %v966_v12  ;;  %v977_v54 = vand.u32 2147483647, %v966_v12  ;;  %vm973_vm1 = vweird.f32 %v966_v12 }
 0x32c   : > { %v999_v3 = vadd.f32 %v941_v57, %v913_v9  ;;  %v955_v9 = vpop.f32.mrf.mxu3 }
 0x32d   : > { %v980_v45 = vor.u32 1.1754944e-38, %v979_v1  ;;  %vm978_vm3 = vcmp.eq.f32.partialorder %v977_v54, 8.507059e+37  ;;  %v1039_v30 = vadd.f32 %v2830_v28, %v955_v9 }
 0x32e   : > { %v2216_v13 = vpop.eup %2215  ;;  %v2016_v16 = vmul.f32 -1.442695, %v999_v3 }
 0x32f   : > { %v3016_v19 = vadd.f32 1.0, %v2216_v13  ;;  %v914_v13 = vunpack.c.l.bf16 %v2012_v25 }
 0x330   : > { %v2218_v50 = vpop.eup %2217  ;;  %2221 = vpow2.f32 %v2016_v16 }
 0x331   : > { %v2220_v6 = vpop.eup %2219  ;;  %2223 = vrcp.f32 %v3016_v19  ;;  %v967_v2 = vadd.f32 1.0, %v2218_v50  ;;  %vm1013_vm8 = vweird.f32 %v3016_v19  ;;  %v1017_v1 = vand.u32 2147483647, %v3016_v19 }
 0x332   : > { %v969_v24 = vmul.f32 %v2220_v6, %v966_v12  ;;  %vm974_vm0 = vweird.f32 %v2220_v6 }
 0x333   : > { %2225 = vrcp.f32 %v967_v2  ;;  %vm975_vm2 = vmor %vm973_vm1, %vm974_vm0  ;;  %v994_v7 = vand.u32 2147483648, %v967_v2  ;;  %v992_v57 = vand.u32 2147483647, %v967_v2  ;;  %vm988_vm6 = vweird.f32 %v967_v2 }
 0x334   : > { %v970_v29 = vsub.f32 1.0, %v969_v24  ;;  %vm1018_vm11 = vcmp.eq.f32.partialorder %v1017_v1, 8.507059e+37 }
 0x335   : > { %vm993_vm9 = vcmp.eq.f32.partialorder %v992_v57, 8.507059e+37 }
 0x336   : > { %v2222_v32 = vpop.eup %2221  ;;  %v971_v34 = vmul.f32 %v2220_v6, %v970_v29  ;;  %v995_v29 = vor.u32 1.1754944e-38, %v994_v7 }
 0x337   : > { %v2224_v20 = vpop.eup %2223  ;;  %v3020_v46 = vadd.f32 1.0, %v2222_v32 }
 0x338   : > { %v1009_v48 = vmul.f32 %v2224_v20, %v3016_v19  ;;  %v972_v11 = vadd.f32 %v2220_v6, %v971_v34  ;;  %vm1014_vm5 = vweird.f32 %v2224_v20 }
 0x339   : > { %2227 = vrcp.f32 %v3020_v46  ;;  %v2226_v15 = vpop.eup %2225  ;;  %vm1015_vm10 = vmor %vm1013_vm8, %vm1014_vm5  ;;  %vm1028_vm13 = vweird.f32 %v3020_v46 }
 0x33a   : > { %v1010_v56 = vsub.f32 1.0, %v1009_v48  ;;  %v976_v21 = vsel %vm975_vm2, %v2220_v6, %v972_v11  ;;  %v984_v53 = vmul.f32 %v2226_v15, %v967_v2  ;;  %vm989_vm4 = vweird.f32 %v2226_v15 }
 0x33b   : > { %v981_v37 = vsel %vm978_vm3, %v980_v45, %v976_v21  ;;  %v1019_v6 = vand.u32 2147483648, %v3016_v19  ;;  %vm990_vm7 = vmor %vm988_vm6, %vm989_vm4  ;;  %v1034_v19 = vand.u32 2147483648, %v3020_v46 }
 0x33c   : > { %v1040_v61 = vmul.f32 %v1038_v58, %v981_v37  ;;  %v1011_v62 = vmul.f32 %v2224_v20, %v1010_v56  ;;  %v985_v60 = vsub.f32 1.0, %v984_v53 }
 0x33d   : > { %v1020_v2 = vor.u32 1.1754944e-38, %v1019_v6  ;;  %v1035_v37 = vor.u32 1.1754944e-38, %v1034_v19 }
 0x33e   : > { %v1042_v5 = vadd.f32 %v1040_v61, %v911_v23  ;;  %v986_v12 = vmul.f32 %v2226_v15, %v985_v60  ;;  %v1012_v16 = vadd.f32 %v2224_v20, %v1011_v62 }
 0x33f   : > { %v2228_v42 = vpop.eup %2227 }
 0x340   : > { %2229 = vtanh.f32 %v1042_v5  ;;  %v1024_v3 = vmul.f32 %v2228_v42, %v3020_v46  ;;  %v987_v50 = vadd.f32 %v2226_v15, %v986_v12  ;;  %v1016_v54 = vsel %vm1015_vm10, %v2224_v20, %v1012_v16 }
 0x341   : > { %v1021_v56 = vsel %vm1018_vm11, %v1020_v2, %v1016_v54  ;;  %vm1029_vm12 = vweird.f32 %v2228_v42  ;;  %v1032_v20 = vand.u32 2147483647, %v3020_v46 }
 0x342   : > { %v1025_v24 = vsub.f32 1.0, %v1024_v3  ;;  %v991_v32 = vsel %vm990_vm7, %v2226_v15, %v987_v50  ;;  %vm1030_vm14 = vmor %vm1028_vm13, %vm1029_vm12 }
 0x343   : > { %v996_v33 = vsel %vm993_vm9, %v995_v29, %v991_v32  ;;  %vm1033_vm15 = vcmp.eq.f32.partialorder %v1032_v20, 8.507059e+37  ;;  %v2020_v32 = vld [vmem:[%s2527_s24 + $0x68] sm:$0xf] }
 0x344   : > { %v1041_v34 = vmul.f32 %v1039_v30, %v996_v33  ;;  %v1026_v11 = vmul.f32 %v2228_v42, %v1025_v24 }
 0x346   : > { %v2230_v48 = vpop.eup %2229  ;;  %v1043_v45 = vadd.f32 %v1041_v34, %v914_v13  ;;  %v1027_v21 = vadd.f32 %v2228_v42, %v1026_v11  ;;  %v1062_v11 = vunpack.c.l.bf16 %v2020_v32 }
 0x347   : > { %v1046_v23 = vsub.f32 %v2979_v38, %v2230_v48 }
 0x348   : > { %2231 = vtanh.f32 %v1043_v45  ;;  %v1031_v58 = vsel %vm1030_vm14, %v2228_v42, %v1027_v21 }
 0x349   : > { %v1048_v28 = vmul.f32 %v1046_v23, %v1021_v56  ;;  %v1036_v61 = vsel %vm1033_vm15, %v1035_v37, %v1031_v58  ;;  %v3086_v56 = vld [vmem:[%s3270_s2] ss:$0 sm:$0xff] }
 0x34b   : > { %v3033_v15 = vadd.f32 %v2230_v48, %v1048_v28 }
 0x34d   : > { %2017 = vst [vmem:[%s2529_s25 + $0x30] sm:$0xff] %v3033_v15 }
 0x34e   : > { %v2232_v38 = vpop.eup %2231 }
 0x34f   : > { %v1047_v53 = vsub.f32 %v2984_v49, %v2232_v38 }
 0x351   : > { %v1049_v62 = vmul.f32 %v1047_v53, %v1036_v61  ;;  %v2022_v61 = vld [vmem:[%s2527_s24 + $0x74] sm:$0xf] }
 0x353   : > { %v3040_v25 = vadd.f32 %v2232_v38, %v1049_v62 }
 0x355   : > { %2018 = vst [vmem:[%s2529_s25 + $0x38] sm:$0xff] %v3040_v25  ;;  %v1066_v60 = vpack.c.bf16 %v3040_v25, %v3033_v15 }
 0x357   : > { %1075 = vmatmul.bf16.vlgmr.msrb.gmra.mxu0 %v1066_v60  ;;  %1089 = vmatmul.bf16.vlgmr.msrb.gmra.mxu1 %v1066_v60 }
 0x358   : > { %1103 = vmatmul.bf16.vlgmr.msrb.gmra.mxu2 %v1066_v60  ;;  %1397 = vmatpush.bf16.msrb.mxu0 %v2585_v51 }
 0x359   : > { %1520 = vmatpush.bf16.msrb.mxu1 %v2541_v36  ;;  %1534 = vmatpush.bf16.msrb.mxu2 %v2552_v40  ;;  %v2019_v36 = vld [vmem:[%s2527_s24 + $0x60] sm:$0xff] }
 0x35a   : > { %v1060_v40 = vunpack.c.l.bf16 %v2019_v36 }
 0x35c   : > { %1398 = vmatpush.bf16.msrb.mxu0 %v2610_v59 }
 0x35d   : > { %1521 = vmatpush.bf16.msrb.mxu1 %v2561_v43  ;;  %1535 = vmatpush.bf16.msrb.mxu2 %v2565_v44  ;;  %v1061_v43 = vunpack.c.h.bf16 %v2019_v36 }
 0x360   : > { %1399 = vmatpush.bf16.msrb.mxu0 %v2638_v4 }
 0x361   : > { %1522 = vmatpush.bf16.msrb.mxu1 %v2588_v52  ;;  %1536 = vmatpush.bf16.msrb.mxu2 %v2598_v55 }
 0x364   : > { %1400 = vmatpush.bf16.msrb.mxu0 %v2669_v14 }
 0x365   : > { %1523 = vmatpush.bf16.msrb.mxu1 %v2622_v63  ;;  %1537 = vmatpush.bf16.msrb.mxu2 %v2626_v0  ;;  %v2021_v0 = vld [vmem:[%s2527_s24 + $0x6c] sm:$0xff] }
 0x368   : > { %1401 = vmatpush.bf16.msrb.mxu0 %v2694_v22 }
 0x369   : > { %1524 = vmatpush.bf16.msrb.mxu1 %v2650_v8  ;;  %1538 = vmatpush.bf16.msrb.mxu2 %v2657_v10 }
 0x36c   : > { %1402 = vmatpush.bf16.msrb.mxu0 %v2722_v31 }
 0x36d   : > { %1525 = vmatpush.bf16.msrb.mxu1 %v2678_v17  ;;  %1539 = vmatpush.bf16.msrb.mxu2 %v2682_v18  ;;  %v1063_v17 = vunpack.c.l.bf16 %v2021_v0  ;;  %v1064_v18 = vunpack.c.h.bf16 %v2021_v0 }
 0x370   : > { %1403 = vmatpush.bf16.msrb.mxu0 %v2745_v41 }
 0x371   : > { %1526 = vmatpush.bf16.msrb.mxu1 %v2706_v26  ;;  %1540 = vmatpush.bf16.msrb.mxu2 %v2710_v27 }
 0x374   : > { %1404 = vmatpush.bf16.msrb.mxu0 %v2759_v47 }
 0x375   : > { %1527 = vmatpush.bf16.msrb.mxu1 %v2734_v35  ;;  %1541 = vmatpush.bf16.msrb.mxu2 %v2742_v39 }
 0x3d4   : > { %v1076_v44 = vpop.f32.mrf.mxu0  ;;  %v1090_v52 = vpop.f32.mrf.mxu1 }
 0x3d5   : > { %v1109_v55 = vadd.f32 %v1076_v44, %v1060_v40  ;;  %v1149_v63 = vadd.f32 %v1090_v52, %v1061_v43  ;;  %v1065_v44 = vunpack.c.l.bf16 %v2022_v61 }
 0x3d7   : > { %v2023_v8 = vmul.f32 -1.442695, %v1109_v55  ;;  %v2025_v10 = vmul.f32 -1.442695, %v1149_v63 }
 0x3d9   : > { %2233 = vpow2.f32 %v2023_v8 }
 0x3da   : > { %2235 = vpow2.f32 %v2025_v10 }
 0x3db   : > { %v1104_v30 = vpop.f32.mrf.mxu2 }
 0x3dc   : > { %v1078_v26 = vpop.f32.mrf.mxu0  ;;  %v1092_v27 = vpop.f32.mrf.mxu1  ;;  %v1189_v28 = vadd.f32 %v3086_v56, %v1104_v30 }
 0x3dd   : > { %v1110_v49 = vadd.f32 %v1078_v26, %v1063_v17  ;;  %v1150_v35 = vadd.f32 %v1092_v27, %v1064_v18 }
 0x3df   : > { %v2234_v46 = vpop.eup %2233  ;;  %v2024_v39 = vmul.f32 -1.442695, %v1110_v49  ;;  %v2026_v42 = vmul.f32 -1.442695, %v1150_v35 }
 0x3e0   : > { %v2236_v5 = vpop.eup %2235  ;;  %v1117_v7 = vadd.f32 1.0, %v2234_v46 }
 0x3e1   : > { %v3072_v9 = vadd.f32 1.0, %v2236_v5  ;;  %2237 = vpow2.f32 %v2024_v39 }
 0x3e2   : > { %2239 = vrcp.f32 %v1117_v7  ;;  %v1130_v1 = vand.u32 2147483648, %v1117_v7  ;;  %v1128_v34 = vand.u32 2147483647, %v1117_v7  ;;  %vm1124_vm1 = vweird.f32 %v1117_v7 }
 0x3e3   : > { %2241 = vrcp.f32 %v3072_v9  ;;  %v1106_v43 = vpop.f32.mrf.mxu2  ;;  %v1170_v8 = vand.u32 2147483648, %v3072_v9  ;;  %vm1164_vm9 = vweird.f32 %v3072_v9  ;;  %v1168_v18 = vand.u32 2147483647, %v3072_v9 }
 0x3e4   : > { %2243 = vpow2.f32 %v2026_v42  ;;  %v1131_v23 = vor.u32 1.1754944e-38, %v1130_v1  ;;  %vm1129_vm3 = vcmp.eq.f32.partialorder %v1128_v34, 8.507059e+37  ;;  %v1190_v17 = vadd.f32 %v3086_v56, %v1106_v43 }
 0x3e5   : > { %v1171_v39 = vor.u32 1.1754944e-38, %v1170_v8  ;;  %vm1169_vm11 = vcmp.eq.f32.partialorder %v1168_v18, 8.507059e+37 }
 0x3e7   : > { %v2238_v12 = vpop.eup %2237 }
 0x3e8   : > { %v2240_v57 = vpop.eup %2239  ;;  %v1118_v3 = vadd.f32 1.0, %v2238_v12 }
 0x3e9   : > { %v3075_v13 = vpop.eup %2241  ;;  %v1120_v16 = vmul.f32 %v2240_v57, %v1117_v7  ;;  %vm1125_vm0 = vweird.f32 %v2240_v57 }
 0x3ea   : > { %v2244_v50 = vpop.eup %2243  ;;  %2245 = vrcp.f32 %v1118_v3  ;;  %v1160_v29 = vmul.f32 %v3075_v13, %v3072_v9  ;;  %vm1126_vm2 = vmor %vm1124_vm1, %vm1125_vm0  ;;  %v1145_v62 = vand.u32 2147483648, %v1118_v3  ;;  %v1143_v40 = vand.u32 2147483647, %v1118_v3 }
 0x3eb   : > { %v1121_v6 = vsub.f32 1.0, %v1120_v16  ;;  %v3077_v24 = vadd.f32 1.0, %v2244_v50  ;;  %vm1139_vm5 = vweird.f32 %v1118_v3  ;;  %vm1165_vm6 = vweird.f32 %v3075_v13 }
 0x3ec   : > { %v1161_v2 = vsub.f32 1.0, %v1160_v29  ;;  %v1146_v0 = vor.u32 1.1754944e-38, %v1145_v62  ;;  %vm1144_vm8 = vcmp.eq.f32.partialorder %v1143_v40, 8.507059e+37  ;;  %vm1166_vm10 = vmor %vm1164_vm9, %vm1165_vm6 }
 0x3ed   : > { %v1122_v33 = vmul.f32 %v2240_v57, %v1121_v6  ;;  %2247 = vrcp.f32 %v3077_v24  ;;  %v1185_v9 = vand.u32 2147483648, %v3077_v24  ;;  %vm1179_vm13 = vweird.f32 %v3077_v24 }
 0x3ee   : > { %v1162_v37 = vmul.f32 %v3075_v13, %v1161_v2 }
 0x3ef   : > { %v1123_v54 = vadd.f32 %v2240_v57, %v1122_v33 }
 0x3f0   : > { %v2246_v48 = vpop.eup %2245  ;;  %v1163_v55 = vadd.f32 %v3075_v13, %v1162_v37 }
 0x3f1   : > { %v1127_v45 = vsel %vm1126_vm2, %v2240_v57, %v1123_v54  ;;  %v1135_v21 = vmul.f32 %v2246_v48, %v1118_v3  ;;  %vm1140_vm4 = vweird.f32 %v2246_v48  ;;  %v1183_v3 = vand.u32 2147483647, %v3077_v24  ;;  %v2031_v54 = vld [vmem:[%s2527_s24 + $0x84] sm:$0xff] }
 0x3f2   : > { %v1132_v19 = vsel %vm1129_vm3, %v1131_v23, %v1127_v45  ;;  %vm1141_vm7 = vmor %vm1139_vm5, %vm1140_vm4  ;;  %v1167_v35 = vsel %vm1166_vm10, %v3075_v13, %v1163_v55 }
 0x3f3   : > { %v2248_v20 = vpop.eup %2247  ;;  %v1191_v58 = vmul.f32 %v1189_v28, %v1132_v19  ;;  %v1136_v38 = vsub.f32 1.0, %v1135_v21  ;;  %v1172_v42 = vsel %vm1169_vm11, %v1171_v39, %v1167_v35  ;;  %vm1184_vm15 = vcmp.eq.f32.partialorder %v1183_v3, 8.507059e+37 }
 0x3f4   : > { %v1175_v53 = vmul.f32 %v2248_v20, %v3077_v24  ;;  %vm1180_vm12 = vweird.f32 %v2248_v20 }
 0x3f5   : > { %v1193_v60 = vadd.f32 %v1191_v58, %v1062_v11  ;;  %v1137_v36 = vmul.f32 %v2246_v48, %v1136_v38  ;;  %vm1181_vm14 = vmor %vm1179_vm13, %vm1180_vm12 }
 0x3f6   : > { %v1176_v63 = vsub.f32 1.0, %v1175_v53 }
 0x3f7   : > { %2249 = vtanh.f32 %v1193_v60  ;;  %v1138_v52 = vadd.f32 %v2246_v48, %v1137_v36 }
 0x3f8   : > { %v1177_v49 = vmul.f32 %v2248_v20, %v1176_v63  ;;  %v2030_v63 = vld [vmem:[%s2527_s24 + $0x80] sm:$0xf] }
 0x3f9   : > { %v1142_v10 = vsel %vm1141_vm7, %v2246_v48, %v1138_v52  ;;  %v1213_v35 = vunpack.c.l.bf16 %v2030_v63 }
 0x3fa   : > { %v1147_v26 = vsel %vm1144_vm8, %v1146_v0, %v1142_v10  ;;  %v1178_v12 = vadd.f32 %v2248_v20, %v1177_v49 }
 0x3fb   : > { %v1192_v27 = vmul.f32 %v1190_v17, %v1147_v26 }
 0x3fc   : > { %v1182_v16 = vsel %vm1181_vm14, %v2248_v20, %v1178_v12 }
 0x3fd   : > { %v2250_v46 = vpop.eup %2249  ;;  %v1194_v5 = vadd.f32 %v1192_v27, %v1065_v44 }
 0x3fe   : > { %v1197_v7 = vsub.f32 %v3033_v15, %v2250_v46  ;;  %v1186_v15 = vor.u32 1.1754944e-38, %v1185_v9 }
 0x3ff   : > { %2251 = vtanh.f32 %v1194_v5 }
 0x400   : > { %v1199_v57 = vmul.f32 %v1197_v7, %v1172_v42  ;;  %v1187_v29 = vsel %vm1184_vm15, %v1186_v15, %v1182_v16 }
 0x402   : > { %v3103_v13 = vadd.f32 %v2250_v46, %v1199_v57 }
 0x404   : > { %2027 = vst [vmem:[%s2529_s25 + $0x40] sm:$0xff] %v3103_v13 }
 0x405   : > { %v2252_v50 = vpop.eup %2251 }
 0x406   : > { %v1198_v6 = vsub.f32 %v3040_v25, %v2252_v50  ;;  %v2029_v25 = vld [vmem:[%s2527_s24 + $0x78] sm:$0xff] }
 0x407   : > { %v1212_v32 = vunpack.c.h.bf16 %v2029_v25 }
 0x408   : > { %v1200_v30 = vmul.f32 %v1198_v6, %v1187_v29 }
 0x40a   : > { %v3108_v1 = vadd.f32 %v2252_v50, %v1200_v30  ;;  %v2032_v50 = vld [vmem:[%s2527_s24 + $0x8c] sm:$0xf] }
 0x40c   : > { %2028 = vst [vmem:[%s2529_s25 + $0x48] sm:$0xff] %v3108_v1  ;;  %v1217_v24 = vpack.c.bf16 %v3108_v1, %v3103_v13 }
 0x40e   : > { %1226 = vmatmul.bf16.vlgmr.msrb.gmra.mxu3 %v1217_v24  ;;  %1240 = vmatmul.bf16.vlgmr.msra.gmra.mxu0 %v1217_v24 }
 0x40f   : > { %1254 = vmatmul.bf16.vlgmr.msra.gmra.mxu1 %v1217_v24  ;;  %1548 = vmatpush.bf16.msrb.mxu3 %v2585_v51  ;;  %v1211_v51 = vunpack.c.l.bf16 %v2029_v25 }
 0x413   : > { %1549 = vmatpush.bf16.msrb.mxu3 %v2610_v59  ;;  %v1215_v59 = vunpack.c.h.bf16 %v2031_v54 }
 0x417   : > { %1550 = vmatpush.bf16.msrb.mxu3 %v2638_v4 }
 0x41b   : > { %1551 = vmatpush.bf16.msrb.mxu3 %v2669_v14 }
 0x41f   : > { %1552 = vmatpush.bf16.msrb.mxu3 %v2694_v22 }
 0x423   : > { %1553 = vmatpush.bf16.msrb.mxu3 %v2722_v31  ;;  %v1214_v31 = vunpack.c.l.bf16 %v2031_v54 }
 0x427   : > { %1554 = vmatpush.bf16.msrb.mxu3 %v2745_v41 }
 0x42b   : > { %1555 = vmatpush.bf16.msrb.mxu3 %v2759_v47 }
 0x48b   : > { %v1241_v33 = vpop.f32.mrf.mxu0 }
 0x48c   : > { %v1300_v34 = vadd.f32 %v1241_v33, %v1212_v32  ;;  %v1255_v36 = vpop.f32.mrf.mxu1  ;;  %v1216_v33 = vunpack.c.l.bf16 %v2032_v50 }
 0x48d   : > { %v1340_v17 = vadd.f32 %v3086_v56, %v1255_v36 }
 0x48e   : > { %v2035_v48 = vmul.f32 -1.442695, %v1300_v34 }
 0x490   : > { %2253 = vpow2.f32 %v2035_v48 }
 0x491   : > { %v1227_v2 = vpop.f32.mrf.mxu3 }
 0x492   : > { %v1260_v4 = vadd.f32 %v1227_v2, %v1211_v51 }
 0x493   : > { %v1243_v14 = vpop.f32.mrf.mxu0 }
 0x494   : > { %v2033_v11 = vmul.f32 -1.442695, %v1260_v4  ;;  %v1301_v22 = vadd.f32 %v1243_v14, %v1215_v59  ;;  %v1257_v12 = vpop.f32.mrf.mxu1 }
 0x495   : > { %v1341_v15 = vadd.f32 %v3086_v56, %v1257_v12 }
 0x496   : > { %2255 = vpow2.f32 %v2033_v11  ;;  %v2036_v23 = vmul.f32 -1.442695, %v1301_v22  ;;  %v2254_v41 = vpop.eup %2253 }
 0x497   : > { %v3124_v21 = vadd.f32 1.0, %v2254_v41 }
 0x498   : > { %2257 = vpow2.f32 %v2036_v23 }
 0x499   : > { %v1229_v45 = vpop.f32.mrf.mxu3  ;;  %v1321_v25 = vand.u32 2147483648, %v3124_v21  ;;  %vm1315_vm9 = vweird.f32 %v3124_v21  ;;  %v1319_v34 = vand.u32 2147483647, %v3124_v21 }
 0x49a   : > { %v1261_v47 = vadd.f32 %v1229_v45, %v1214_v31 }
 0x49b   : > { %v1322_v4 = vor.u32 1.1754944e-38, %v1321_v25  ;;  %vm1320_vm11 = vcmp.eq.f32.partialorder %v1319_v34, 8.507059e+37 }
 0x49c   : > { %v2256_v28 = vpop.eup %2255  ;;  %v2034_v19 = vmul.f32 -1.442695, %v1261_v47 }
 0x49d   : > { %v1268_v20 = vadd.f32 1.0, %v2256_v28 }
 0x49e   : > { %2259 = vpow2.f32 %v2034_v19  ;;  %v2258_v58 = vpop.eup %2257 }
 0x49f   : > { %2261 = vrcp.f32 %v1268_v20  ;;  %v3127_v37 = vadd.f32 1.0, %v2258_v58  ;;  %v1281_v44 = vand.u32 2147483648, %v1268_v20  ;;  %v1279_v55 = vand.u32 2147483647, %v1268_v20 }
 0x4a0   : > { %2263 = vrcp.f32 %v3124_v21  ;;  %vm1275_vm1 = vweird.f32 %v1268_v20 }
 0x4a1   : > { %v1282_v18 = vor.u32 1.1754944e-38, %v1281_v44  ;;  %vm1280_vm3 = vcmp.eq.f32.partialorder %v1279_v55, 8.507059e+37  ;;  %v1336_v41 = vand.u32 2147483648, %v3127_v37  ;;  %vm1330_vm13 = vweird.f32 %v3127_v37 }
 0x4a2   : > { %v1334_v45 = vand.u32 2147483647, %v3127_v37 }
 0x4a4   : > { %v2260_v38 = vpop.eup %2259  ;;  %vm1335_vm15 = vcmp.eq.f32.partialorder %v1334_v45, 8.507059e+37 }
 0x4a5   : > { %v2262_v53 = vpop.eup %2261  ;;  %v1269_v61 = vadd.f32 1.0, %v2260_v38 }
 0x4a6   : > { %v3129_v62 = vpop.eup %2263  ;;  %v1271_v60 = vmul.f32 %v2262_v53, %v1268_v20  ;;  %vm1276_vm0 = vweird.f32 %v2262_v53 }
 0x4a7   : > { %2265 = vrcp.f32 %v1269_v61  ;;  %v1311_v43 = vmul.f32 %v3129_v62, %v3124_v21  ;;  %vm1277_vm2 = vmor %vm1275_vm1, %vm1276_vm0  ;;  %v1296_v57 = vand.u32 2147483648, %v1269_v61  ;;  %v1294_v3 = vand.u32 2147483647, %v1269_v61 }
 0x4a8   : > { %v1272_v40 = vsub.f32 1.0, %v1271_v60  ;;  %2267 = vrcp.f32 %v3127_v37  ;;  %vm1290_vm5 = vweird.f32 %v1269_v61  ;;  %vm1316_vm6 = vweird.f32 %v3129_v62 }
 0x4a9   : > { %v1312_v10 = vsub.f32 1.0, %v1311_v43  ;;  %v1297_v24 = vor.u32 1.1754944e-38, %v1296_v57  ;;  %vm1295_vm8 = vcmp.eq.f32.partialorder %v1294_v3, 8.507059e+37  ;;  %vm1317_vm10 = vmor %vm1315_vm9, %vm1316_vm6  ;;  %v1337_v21 = vor.u32 1.1754944e-38, %v1336_v41  ;;  %v2041_v43 = vld [vmem:[%s2527_s24 + $0x9c] sm:$0xff] }
 0x4aa   : > { %v1273_v52 = vmul.f32 %v2262_v53, %v1272_v40  ;;  %v1365_v55 = vunpack.c.l.bf16 %v2041_v43  ;;  %v1366_v63 = vunpack.c.h.bf16 %v2041_v43 }
 0x4ab   : > { %v1313_v7 = vmul.f32 %v3129_v62, %v1312_v10 }
 0x4ac   : > { %v1274_v0 = vadd.f32 %v2262_v53, %v1273_v52 }
 0x4ad   : > { %v2266_v8 = vpop.eup %2265  ;;  %v1314_v29 = vadd.f32 %v3129_v62, %v1313_v7 }
 0x4ae   : > { %v2268_v26 = vpop.eup %2267  ;;  %v1278_v27 = vsel %vm1277_vm2, %v2262_v53, %v1274_v0  ;;  %v1286_v49 = vmul.f32 %v2266_v8, %v1269_v61  ;;  %vm1291_vm4 = vweird.f32 %v2266_v8  ;;  %v2039_v53 = vld [vmem:[%s2527_s24 + $0x90] sm:$0xff] }
 0x4af   : > { %v1283_v46 = vsel %vm1280_vm3, %v1282_v18, %v1278_v27  ;;  %v1326_v42 = vmul.f32 %v2268_v26, %v3127_v37  ;;  %vm1292_vm7 = vmor %vm1290_vm5, %vm1291_vm4  ;;  %v1318_v59 = vsel %vm1317_vm10, %v3129_v62, %v1314_v29  ;;  %vm1331_vm12 = vweird.f32 %v2268_v26 }
 0x4b0   : > { %v1342_v39 = vmul.f32 %v1340_v17, %v1283_v46  ;;  %v1287_v5 = vsub.f32 1.0, %v1286_v49  ;;  %v1323_v22 = vsel %vm1320_vm11, %v1322_v4, %v1318_v59  ;;  %vm1332_vm14 = vmor %vm1330_vm13, %vm1331_vm12  ;;  %v1362_v61 = vunpack.c.l.bf16 %v2039_v53 }
 0x4b1   : > { %v1327_v30 = vsub.f32 1.0, %v1326_v42  ;;  %v1363_v62 = vunpack.c.h.bf16 %v2039_v53 }
 0x4b2   : > { %v1288_v9 = vmul.f32 %v2266_v8, %v1287_v5  ;;  %v1344_v16 = vadd.f32 %v1342_v39, %v1213_v35 }
 0x4b3   : > { %v1328_v48 = vmul.f32 %v2268_v26, %v1327_v30  ;;  %v2040_v30 = vld [vmem:[%s2527_s24 + $0x98] sm:$0xf] }
 0x4b4   : > { %v1289_v6 = vadd.f32 %v2266_v8, %v1288_v9  ;;  %2269 = vtanh.f32 %v1344_v16 }
 0x4b5   : > { %v1329_v31 = vadd.f32 %v2268_v26, %v1328_v48  ;;  %v1364_v48 = vunpack.c.l.bf16 %v2040_v30 }
 0x4b6   : > { %v1293_v32 = vsel %vm1292_vm7, %v2266_v8, %v1289_v6 }
 0x4b7   : > { %v1298_v54 = vsel %vm1295_vm8, %v1297_v24, %v1293_v32  ;;  %v1333_v28 = vsel %vm1332_vm14, %v2268_v26, %v1329_v31 }
 0x4b8   : > { %v1343_v51 = vmul.f32 %v1341_v15, %v1298_v54  ;;  %v1338_v20 = vsel %vm1335_vm15, %v1337_v21, %v1333_v28 }
 0x4ba   : > { %v2270_v2 = vpop.eup %2269  ;;  %v1345_v14 = vadd.f32 %v1343_v51, %v1216_v33 }
 0x4bb   : > { %v1348_v11 = vsub.f32 %v3103_v13, %v2270_v2 }
 0x4bc   : > { %2271 = vtanh.f32 %v1345_v14 }
 0x4bd   : > { %v1350_v23 = vmul.f32 %v1348_v11, %v1323_v22 }
 0x4bf   : > { %v3150_v47 = vadd.f32 %v2270_v2, %v1350_v23 }
 0x4c1   : > { %2037 = vst [vmem:[%s2529_s25 + $0x50] sm:$0xff] %v3150_v47 }
 0x4c2   : > { %v2272_v13 = vpop.eup %2271 }
 0x4c3   : > { %v1349_v19 = vsub.f32 %v3108_v1, %v2272_v13 }
 0x4c5   : > { %v1351_v58 = vmul.f32 %v1349_v19, %v1338_v20 }
 0x4c7   : > { %v3155_v38 = vadd.f32 %v2272_v13, %v1351_v58  ;;  %v2042_v13 = vld [vmem:[%s2527_s24 + $0xa4] sm:$0xf] }
 0x4c9   : > { %2038 = vst [vmem:[%s2529_s25 + $0x58] sm:$0xff] %v3155_v38  ;;  %v1368_v37 = vpack.c.bf16 %v3155_v38, %v3150_v47 }
 0x4cb   : > { %1377 = vmatmul.bf16.vlgmr.msra.gmra.mxu2 %v1368_v37  ;;  %1391 = vmatmul.bf16.vlgmr.msra.gmra.mxu3 %v1368_v37 }
 0x4cc   : > { %1405 = vmatmul.bf16.vlgmr.msrb.gmra.mxu0 %v1368_v37 }
 0x549   : > { %v1406_v9 = vpop.f32.mrf.mxu0 }
 0x54a   : > { %v1491_v32 = vadd.f32 %v3086_v56, %v1406_v9 }
 0x54e   : > { %v1378_v60 = vpop.f32.mrf.mxu2  ;;  %v1392_v36 = vpop.f32.mrf.mxu3 }
 0x54f   : > { %v1411_v40 = vadd.f32 %v1378_v60, %v1362_v61  ;;  %v1451_v1 = vadd.f32 %v1392_v36, %v1363_v62  ;;  %v1367_v62 = vunpack.c.l.bf16 %v2042_v13 }
 0x551   : > { %v2043_v44 = vmul.f32 -1.442695, %v1411_v40  ;;  %v2045_v52 = vmul.f32 -1.442695, %v1451_v1  ;;  %v1408_v22 = vpop.f32.mrf.mxu0 }
 0x552   : > { %v1492_v21 = vadd.f32 %v3086_v56, %v1408_v22 }
 0x553   : > { %2273 = vpow2.f32 %v2043_v44 }
 0x554   : > { %2275 = vpow2.f32 %v2045_v52 }
 0x556   : > { %v1380_v0 = vpop.f32.mrf.mxu2  ;;  %v1394_v8 = vpop.f32.mrf.mxu3 }
 0x557   : > { %v1412_v10 = vadd.f32 %v1380_v0, %v1365_v55  ;;  %v1452_v17 = vadd.f32 %v1394_v8, %v1366_v63 }
 0x559   : > { %v2274_v18 = vpop.eup %2273  ;;  %v2044_v26 = vmul.f32 -1.442695, %v1412_v10  ;;  %v2046_v35 = vmul.f32 -1.442695, %v1452_v17 }
 0x55a   : > { %v2276_v27 = vpop.eup %2275  ;;  %v1419_v49 = vadd.f32 1.0, %v2274_v18 }
 0x55b   : > { %v3163_v46 = vadd.f32 1.0, %v2276_v27  ;;  %2277 = vpow2.f32 %v2044_v26 }
 0x55c   : > { %2279 = vrcp.f32 %v1419_v49  ;;  %v1432_v50 = vand.u32 2147483648, %v1419_v49  ;;  %v1430_v29 = vand.u32 2147483647, %v1419_v49  ;;  %vm1426_vm1 = vweird.f32 %v1419_v49 }
 0x55d   : > { %2281 = vrcp.f32 %v3163_v46  ;;  %v1472_v53 = vand.u32 2147483648, %v3163_v46  ;;  %vm1466_vm9 = vweird.f32 %v3163_v46  ;;  %v1470_v60 = vand.u32 2147483647, %v3163_v46 }
 0x55e   : > { %2283 = vpow2.f32 %v2046_v35  ;;  %v1433_v33 = vor.u32 1.1754944e-38, %v1432_v50  ;;  %vm1431_vm3 = vcmp.eq.f32.partialorder %v1430_v29, 8.507059e+37 }
 0x55f   : > { %v1473_v52 = vor.u32 1.1754944e-38, %v1472_v53  ;;  %vm1471_vm11 = vcmp.eq.f32.partialorder %v1470_v60, 8.507059e+37 }
 0x561   : > { %v2278_v39 = vpop.eup %2277 }
 0x562   : > { %v2280_v5 = vpop.eup %2279  ;;  %v1420_v7 = vadd.f32 1.0, %v2278_v39 }
 0x563   : > { %v3166_v42 = vpop.eup %2281  ;;  %v1422_v12 = vmul.f32 %v2280_v5, %v1419_v49  ;;  %vm1427_vm0 = vweird.f32 %v2280_v5 }
 0x564   : > { %v2284_v57 = vpop.eup %2283  ;;  %2285 = vrcp.f32 %v1420_v7  ;;  %v1462_v15 = vmul.f32 %v3166_v42, %v3163_v46  ;;  %vm1428_vm2 = vmor %vm1426_vm1, %vm1427_vm0  ;;  %v1447_v31 = vand.u32 2147483648, %v1420_v7  ;;  %v1445_v45 = vand.u32 2147483647, %v1420_v7 }
 0x565   : > { %v1423_v3 = vsub.f32 1.0, %v1422_v12  ;;  %v3168_v16 = vadd.f32 1.0, %v2284_v57  ;;  %vm1441_vm5 = vweird.f32 %v1420_v7  ;;  %vm1467_vm6 = vweird.f32 %v3166_v42 }
 0x566   : > { %v1463_v34 = vsub.f32 1.0, %v1462_v15  ;;  %v1448_v58 = vor.u32 1.1754944e-38, %v1447_v31  ;;  %vm1446_vm8 = vcmp.eq.f32.partialorder %v1445_v45, 8.507059e+37  ;;  %vm1468_vm10 = vmor %vm1466_vm9, %vm1467_vm6 }
 0x567   : > { %v1424_v6 = vmul.f32 %v2280_v5, %v1423_v3  ;;  %2287 = vrcp.f32 %v3168_v16  ;;  %v1487_v17 = vand.u32 2147483648, %v3168_v16  ;;  %vm1481_vm13 = vweird.f32 %v3168_v16  ;;  %v2051_v3 = vld [vmem:[%s2527_s24 + $0xb4] sm:$0xff] }
 0x568   : > { %v1464_v11 = vmul.f32 %v3166_v42, %v1463_v34  ;;  %v1485_v18 = vand.u32 2147483647, %v3168_v16 }
 0x569   : > { %v1425_v24 = vadd.f32 %v2280_v5, %v1424_v6  ;;  %v1488_v49 = vor.u32 1.1754944e-38, %v1487_v17 }
 0x56a   : > { %v2286_v25 = vpop.eup %2285  ;;  %v1465_v20 = vadd.f32 %v3166_v42, %v1464_v11  ;;  %vm1486_vm15 = vcmp.eq.f32.partialorder %v1485_v18, 8.507059e+37 }
 0x56b   : > { %v1429_v54 = vsel %vm1428_vm2, %v2280_v5, %v1425_v24  ;;  %v1437_v51 = vmul.f32 %v2286_v25, %v1420_v7  ;;  %vm1442_vm4 = vweird.f32 %v2286_v25 }
 0x56c   : > { %v1434_v59 = vsel %vm1431_vm3, %v1433_v33, %v1429_v54  ;;  %vm1443_vm7 = vmor %vm1441_vm5, %vm1442_vm4  ;;  %v1469_v43 = vsel %vm1468_vm10, %v3166_v42, %v1465_v20  ;;  %v2049_v42 = vld [vmem:[%s2527_s24 + $0xa8] sm:$0xff]  ;;  %v1517_v33 = vunpack.c.h.bf16 %v2051_v3 }
 0x56d   : > { %v2288_v2 = vpop.eup %2287  ;;  %v1493_v4 = vmul.f32 %v1491_v32, %v1434_v59  ;;  %v1438_v14 = vsub.f32 1.0, %v1437_v51  ;;  %v1474_v0 = vsel %vm1471_vm11, %v1473_v52, %v1469_v43  ;;  %v1513_v12 = vunpack.c.l.bf16 %v2049_v42 }
 0x56e   : > { %v1477_v23 = vmul.f32 %v2288_v2, %v3168_v16  ;;  %vm1482_vm12 = vweird.f32 %v2288_v2  ;;  %v1514_v50 = vunpack.c.h.bf16 %v2049_v42 }
 0x56f   : > { %v1439_v41 = vmul.f32 %v2286_v25, %v1438_v14  ;;  %v1495_v28 = vadd.f32 %v1493_v4, %v1364_v48  ;;  %vm1483_vm14 = vmor %vm1481_vm13, %vm1482_vm12 }
 0x570   : > { %v1478_v37 = vsub.f32 1.0, %v1477_v23 }
 0x571   : > { %v1440_v19 = vadd.f32 %v2286_v25, %v1439_v41  ;;  %2289 = vtanh.f32 %v1495_v28  ;;  %v2050_v28 = vld [vmem:[%s2527_s24 + $0xb0] sm:$0xf] }
 0x572   : > { %v1479_v1 = vmul.f32 %v2288_v2, %v1478_v37  ;;  %v1515_v53 = vunpack.c.l.bf16 %v2050_v28  ;;  %v1748_v28 = vld [vmem:[%s2529_s25 + $0x40] sm:$0xff] (%p2439_p6) }
 0x573   : > { %v1444_v61 = vsel %vm1443_vm7, %v2286_v25, %v1440_v19 }
 0x574   : > { %v1449_v36 = vsel %vm1446_vm8, %v1448_v58, %v1444_v61  ;;  %v1480_v8 = vadd.f32 %v2288_v2, %v1479_v1 }
 0x575   : > { %v1494_v40 = vmul.f32 %v1492_v21, %v1449_v36 }
 0x576   : > { %v1484_v27 = vsel %vm1483_vm14, %v2288_v2, %v1480_v8 }
 0x577   : > { %v2290_v44 = vpop.eup %2289  ;;  %v1496_v55 = vadd.f32 %v1494_v40, %v1367_v62  ;;  %v1489_v46 = vsel %vm1486_vm15, %v1488_v49, %v1484_v27 }
 0x578   : > { %v1499_v63 = vsub.f32 %v3150_v47, %v2290_v44 }
 0x579   : > { %2291 = vtanh.f32 %v1496_v55  ;;  %v2052_v55 = vld [vmem:[%s2527_s24 + $0xbc] sm:$0xf]  ;;  %s2061_s24 = sshll.u32 (%p2439_p6), %s2356_s15, 1 }
 0x57a   : > { %v1501_v10 = vmul.f32 %v1499_v63, %v1474_v0  ;;  %v1518_v49 = vunpack.c.l.bf16 %v2052_v55  ;;  %s1671_s10 = sadd.s32 (%p2439_p6), %s2090_s9, %s2061_s24 }
 0x57b   : > { %s2063_s11 = sshll.u32 (%p2439_p6), %s1671_s10, 3 }
 0x57c   : > { %v3189_v26 = vadd.f32 %v2290_v44, %v1501_v10  ;;  %s1673_s22 = scalar_lea.vmem (%p2439_p6), %s3271_s3, %s2063_s11 }
 0x57d   : > { %1749 = vst [vmem:[%s1673_s22 + $0x80] sm:$0xff] (%p2439_p6), %v1748_v28 }
 0x57e   : > { %2047 = vst [vmem:[%s2529_s25 + $0x60] sm:$0xff] %v3189_v26 }
 0x57f   : > { %v2292_v47 = vpop.eup %2291 }
 0x580   : > { %v1500_v35 = vsub.f32 %v3155_v38, %v2292_v47  ;;  %v1516_v38 = vunpack.c.l.bf16 %v2051_v3 }
 0x582   : > { %v1502_v39 = vmul.f32 %v1500_v35, %v1489_v46 }
 0x584   : > { %v3194_v5 = vadd.f32 %v2292_v47, %v1502_v39 }
 0x586   : > { %2048 = vst [vmem:[%s2529_s25 + $0x68] sm:$0xff] %v3194_v5  ;;  %v1519_v7 = vpack.c.bf16 %v3194_v5, %v3189_v26 }
 0x588   : > { %1528 = vmatmul.bf16.vlgmr.msrb.gmra.mxu1 %v1519_v7  ;;  %1542 = vmatmul.bf16.vlgmr.msrb.gmra.mxu2 %v1519_v7 }
 0x589   : > { %1556 = vmatmul.bf16.vlgmr.msrb.gmra.mxu3 %v1519_v7 }
 0x605   : > { %v1529_v57 = vpop.f32.mrf.mxu1 }
 0x606   : > { %v1562_v9 = vadd.f32 %v1529_v57, %v1513_v12 }
 0x608   : > { %v2053_v16 = vmul.f32 -1.442695, %v1562_v9 }
 0x60a   : > { %2293 = vpow2.f32 %v2053_v16 }
 0x60b   : > { %v1543_v15 = vpop.f32.mrf.mxu2 }
 0x60c   : > { %v1602_v6 = vadd.f32 %v1543_v15, %v1514_v50  ;;  %v1557_v23 = vpop.f32.mrf.mxu3 }
 0x60d   : > { %v1531_v29 = vpop.f32.mrf.mxu1  ;;  %v1642_v40 = vadd.f32 %v3086_v56, %v1557_v23  ;;  %v1742_v23 = vld [vmem:[%s2529_s25 + $0x28] sm:$0xff] (%p2439_p6) }
 0x60e   : > { %v2055_v30 = vmul.f32 -1.442695, %v1602_v6  ;;  %v1563_v24 = vadd.f32 %v1531_v29, %v1516_v38  ;;  %1743 = vst [vmem:[%s1673_s22 + $0x48] sm:$0xff] (%p2439_p6), %v1742_v23 }
 0x610   : > { %v2294_v25 = vpop.eup %2293  ;;  %2295 = vpow2.f32 %v2055_v30  ;;  %v2054_v32 = vmul.f32 -1.442695, %v1563_v24 }
 0x611   : > { %v1570_v34 = vadd.f32 1.0, %v2294_v25 }
 0x612   : > { %2297 = vpow2.f32 %v2054_v32 }
 0x613   : > { %2299 = vrcp.f32 %v1570_v34  ;;  %v1545_v54 = vpop.f32.mrf.mxu2  ;;  %v1583_v41 = vand.u32 2147483648, %v1570_v34  ;;  %v1581_v21 = vand.u32 2147483647, %v1570_v34  ;;  %vm1577_vm1 = vweird.f32 %v1570_v34 }
 0x614   : > { %v1603_v51 = vadd.f32 %v1545_v54, %v1517_v33  ;;  %v1559_v17 = vpop.f32.mrf.mxu3 }
 0x615   : > { %v1584_v61 = vor.u32 1.1754944e-38, %v1583_v41  ;;  %vm1582_vm3 = vcmp.eq.f32.partialorder %v1581_v21, 8.507059e+37  ;;  %v1643_v12 = vadd.f32 %v3086_v56, %v1559_v17  ;;  %v1744_v41 = vld [vmem:[%s2529_s25 + $0x30] sm:$0xff] (%p2439_p6) }
 0x616   : > { %v2296_v48 = vpop.eup %2295  ;;  %v2056_v59 = vmul.f32 -1.442695, %v1603_v51  ;;  %1745 = vst [vmem:[%s1673_s22 + $0x60] sm:$0xff] (%p2439_p6), %v1744_v41  ;;  %v1752_v21 = vld [vmem:[%s2529_s25 + $0x50] sm:$0xff] (%p2439_p6) }
 0x617   : > { %v3202_v2 = vadd.f32 1.0, %v2296_v48  ;;  %1753 = vst [vmem:[%s1673_s22 + $0xa0] sm:$0xff] (%p2439_p6), %v1752_v21 }
 0x618   : > { %v2298_v4 = vpop.eup %2297  ;;  %2301 = vpow2.f32 %v2056_v59 }
 0x619   : > { %v2300_v14 = vpop.eup %2299  ;;  %2303 = vrcp.f32 %v3202_v2  ;;  %v1571_v22 = vadd.f32 1.0, %v2298_v4  ;;  %v1623_v39 = vand.u32 2147483648, %v3202_v2  ;;  %vm1617_vm8 = vweird.f32 %v3202_v2 }
 0x61a   : > { %v1573_v11 = vmul.f32 %v2300_v14, %v1570_v34  ;;  %vm1578_vm0 = vweird.f32 %v2300_v14  ;;  %v1621_v57 = vand.u32 2147483647, %v3202_v2 }
 0x61b   : > { %2305 = vrcp.f32 %v1571_v22  ;;  %vm1579_vm2 = vmor %vm1577_vm1, %vm1578_vm0  ;;  %v1598_v8 = vand.u32 2147483648, %v1571_v22  ;;  %v1596_v27 = vand.u32 2147483647, %v1571_v22  ;;  %vm1592_vm6 = vweird.f32 %v1571_v22 }
 0x61c   : > { %v1574_v31 = vsub.f32 1.0, %v1573_v11  ;;  %v1624_v15 = vor.u32 1.1754944e-38, %v1623_v39  ;;  %vm1622_vm11 = vcmp.eq.f32.partialorder %v1621_v57, 8.507059e+37  ;;  %v1736_v11 = vld [vmem:[%s2529_s25 + $0x10] sm:$0xff] (%p2439_p6) }
 0x61d   : > { %v1599_v42 = vor.u32 1.1754944e-38, %v1598_v8  ;;  %vm1597_vm9 = vcmp.eq.f32.partialorder %v1596_v27, 8.507059e+37  ;;  %1737 = vst [vmem:[%s1673_s22 + $0x20] sm:$0xff] (%p2439_p6), %v1736_v11 }
 0x61e   : > { %v2302_v45 = vpop.eup %2301  ;;  %v1575_v13 = vmul.f32 %v2300_v14, %v1574_v31  ;;  %v1740_v31 = vld [vmem:[%s2529_s25 + $0x20] sm:$0xff] (%p2439_p6) }
 0x61f   : > { %v2304_v19 = vpop.eup %2303  ;;  %v3206_v20 = vadd.f32 1.0, %v2302_v45  ;;  %1741 = vst [vmem:[%s1673_s22 + $0x40] sm:$0xff] (%p2439_p6), %v1740_v31  ;;  %v1746_v45 = vld [vmem:[%s2529_s25 + $0x38] sm:$0xff] (%p2439_p6) }
 0x620   : > { %v1613_v58 = vmul.f32 %v2304_v19, %v3202_v2  ;;  %v1576_v37 = vadd.f32 %v2300_v14, %v1575_v13  ;;  %vm1618_vm5 = vweird.f32 %v2304_v19  ;;  %v1750_v13 = vld [vmem:[%s2529_s25 + $0x48] sm:$0xff] (%p2439_p6)  ;;  %1747 = vst [vmem:[%s1673_s22 + $0x68] sm:$0xff] (%p2439_p6), %v1746_v45 }
 0x621   : > { %2307 = vrcp.f32 %v3206_v20  ;;  %v2306_v62 = vpop.eup %2305  ;;  %vm1619_vm10 = vmor %vm1617_vm8, %vm1618_vm5  ;;  %v1638_v33 = vand.u32 2147483648, %v3206_v20  ;;  %vm1632_vm13 = vweird.f32 %v3206_v20  ;;  %v1636_v34 = vand.u32 2147483647, %v3206_v20  ;;  %1751 = vst [vmem:[%s1673_s22 + $0x88] sm:$0xff] (%p2439_p6), %v1750_v13 }
 0x622   : > { %v1614_v60 = vsub.f32 1.0, %v1613_v58  ;;  %v1580_v36 = vsel %vm1579_vm2, %v2300_v14, %v1576_v37  ;;  %v1588_v43 = vmul.f32 %v2306_v62, %v1571_v22  ;;  %vm1593_vm4 = vweird.f32 %v2306_v62  ;;  %v1734_v14 = vld [vmem:[%s2529_s25 + $0x8] sm:$0xff] (%p2439_p6)  ;;  %v1738_v22 = vld [vmem:[%s2529_s25 + $0x18] sm:$0xff] (%p2439_p6) }
 0x623   : > { %v1585_v1 = vsel %vm1582_vm3, %v1584_v61, %v1580_v36  ;;  %vm1594_vm7 = vmor %vm1592_vm6, %vm1593_vm4  ;;  %vm1637_vm15 = vcmp.eq.f32.partialorder %v1636_v34, 8.507059e+37  ;;  %1735 = vst [vmem:[%s1673_s22 + $0x8] sm:$0xff] (%p2439_p6), %v1734_v14  ;;  %v1758_v58 = vld [vmem:[%s2529_s25 + $0x68] sm:$0xff] (%p2439_p6) }
 0x624   : > { %v1644_v44 = vmul.f32 %v1642_v40, %v1585_v1  ;;  %v1615_v52 = vmul.f32 %v2304_v19, %v1614_v60  ;;  %v1589_v63 = vsub.f32 1.0, %v1588_v43  ;;  %1739 = vst [vmem:[%s1673_s22 + $0x28] sm:$0xff] (%p2439_p6), %v1738_v22 }
 0x625   : > { %1759 = vst [vmem:[%s1673_s22 + $0xc8] sm:$0xff] (%p2439_p6), %v1758_v58 }
 0x626   : > { %v1646_v0 = vadd.f32 %v1644_v44, %v1515_v53  ;;  %v1590_v18 = vmul.f32 %v2306_v62, %v1589_v63  ;;  %v1616_v35 = vadd.f32 %v2304_v19, %v1615_v52 }
 0x627   : > { %v2308_v10 = vpop.eup %2307 }
 0x628   : > { %2309 = vtanh.f32 %v1646_v0  ;;  %v1628_v47 = vmul.f32 %v2308_v10, %v3206_v20  ;;  %v1591_v46 = vadd.f32 %v2306_v62, %v1590_v18  ;;  %v1620_v16 = vsel %vm1619_vm10, %v2304_v19, %v1616_v35  ;;  %v1754_v19 = vld [vmem:[%s2529_s25 + $0x58] sm:$0xff] (%p2439_p6)  ;;  %v1756_v20 = vld [vmem:[%s2529_s25 + $0x60] sm:$0xff] (%p2439_p6) }
 0x629   : > { %v1625_v24 = vsel %vm1622_vm11, %v1624_v15, %v1620_v16  ;;  %vm1633_vm12 = vweird.f32 %v2308_v10  ;;  %1755 = vst [vmem:[%s1673_s22 + $0xa8] sm:$0xff] (%p2439_p6), %v1754_v19 }
 0x62a   : > { %v1629_v7 = vsub.f32 1.0, %v1628_v47  ;;  %v1595_v9 = vsel %vm1594_vm7, %v2306_v62, %v1591_v46  ;;  %vm1634_vm14 = vmor %vm1632_vm13, %vm1633_vm12  ;;  %1757 = vst [vmem:[%s1673_s22 + $0xc0] sm:$0xff] (%p2439_p6), %v1756_v20 }
 0x62b   : > { %v1600_v3 = vsel %vm1597_vm9, %v1599_v42, %v1595_v9 }
 0x62c   : > { %v1645_v50 = vmul.f32 %v1643_v12, %v1600_v3  ;;  %v1630_v6 = vmul.f32 %v2308_v10, %v1629_v7 }
 0x62e   : > { %v2310_v38 = vpop.eup %2309  ;;  %v1647_v30 = vadd.f32 %v1645_v50, %v1518_v49  ;;  %v1631_v25 = vadd.f32 %v2308_v10, %v1630_v6 }
 0x62f   : > { %v1650_v29 = vsub.f32 %v3189_v26, %v2310_v38  ;;  %v1639_v26 = vor.u32 1.1754944e-38, %v1638_v33 }
 0x630   : > { %2311 = vtanh.f32 %v1647_v30  ;;  %v1635_v54 = vsel %vm1634_vm14, %v2308_v10, %v1631_v25 }
 0x631   : > { %v1652_v56 = vmul.f32 %v1650_v29, %v1625_v24  ;;  %v1640_v59 = vsel %vm1637_vm15, %v1639_v26, %v1635_v54 }
 0x633   : > { %v1654_v32 = vadd.f32 %v2310_v38, %v1652_v56 }
 0x635   : > { %2057 = vst [vmem:[%s2529_s25 + $0x70] sm:$0xff] %v1654_v32 }
 0x636   : > { %1659 = vst [vmem:[#allocation2] sm:$0xff] %v1654_v32  ;;  %v2312_v51 = vpop.eup %2311 }
 0x637   : > { %v1651_v48 = vsub.f32 %v3194_v5, %v2312_v51  ;;  %v1732_v5 = vld [vmem:[%s2529_s25] sm:$0xff] (%p2439_p6) }
 0x638   : > { %1733 = vst [vmem:[%s1673_s22] sm:$0xff] (%p2439_p6), %v1732_v5 }
 0x639   : > { %v1653_v2 = vmul.f32 %v1651_v48, %v1640_v59 }
 0x63a   : > { %1667 = sbr.rel (!%p2439_p6) target bundleno = 1606 (0x646), region = 66 }
 0x63b   : > { %v1655_v4 = vadd.f32 %v2312_v51, %v1653_v2 }
 0x63c   : > { %v1760_v37 = vld [vmem:[%s2529_s25 + $0x70] sm:$0xff] (%p2439_p6) }
 0x63d   : > { %2058 = vst [vmem:[%s2529_s25 + $0x78] sm:$0xff] %v1655_v4 }
 0x63e   : > { %1660 = vst [vmem:[#allocation2 + $0x8] sm:$0xff] %v1655_v4 }
 0x63f   : > { %1761 = vst [vmem:[%s1673_s22 + $0xe0] sm:$0xff] %v1760_v37 }
 0x644   : > { %v1762_v53 = vld [vmem:[%s2529_s25 + $0x78] sm:$0xff] }
 0x645   : > { %1763 = vst [vmem:[%s1673_s22 + $0xe8] sm:$0xff] %v1762_v53 }
 0x646 PF: > { %s13_s18 = sadd.s32 1, %s2368_s18   ;;  %s3273_s12 = smov %s2348_s13 }
 0x647   : > { %p10_p13 = scmp.ge.s32.totalorder %s13_s18, 6   ;;  %s3274_s13 = smov %s2447_s27 }
 0x648   : > { %s3275_s14 = smov %s2360_s16  ;;  %s3276_s15 = smov %s2364_s17 }
 0x649   : > { %s3277_s16 = smov %s3280_s19  ;;  %s3278_s17 = smov %s3284_s20 }
 0x64a   :  { %12 = sbr.rel (!%p10_p13) target bundleno = 4 (0x4), region = 155 }

// kernel: temporal_encoder_forward.2
= control target key start
LH: loop header
LB: loop body
LE: loop exit
PB: predicated region body
PF: predicated region fallthrough
CT: control target
= control target key end

     0   :  { %s2266_s1 = inlined_call_operand.vmem [shape: bf16[128,384], index: 1, kind: input, shape index: {}]   ;;  %s2267_s0 = inlined_call_operand.vmem [shape: f32[512,128], index: 0, kind: input, shape index: {}]   ;;  %s2268_s2 = inlined_call_operand.vmem [shape: f32[1,384], index: 2, kind: input, shape index: {}]   ;;  %s2269_s3 = inlined_call_operand.vmem [shape: bf16[512,384], index: 3, kind: output, shape index: {}]  }
   0x1   :  { %v1131_v0 = vld [vmem:[%s2266_s1 + $0xa8] sm:$0xf]  ;;  %v1163_v1 = vld [vmem:[%s2266_s1 + $0xb0] sm:$0xf0]  ;;  %v1162_v2 = vld [vmem:[%s2266_s1 + $0xac] sm:$0xf] }
   0x2   :  { %v1132_v3 = vor.u32 %v1163_v1, %v1131_v0  ;;  %v1133_v4 = vld [vmem:[%s2266_s1 + $0xb4] sm:$0xf0]  ;;  %v1139_v5 = vld [vmem:[%s2266_s1 + $0xb0] sm:$0xf]  ;;  %v1164_v6 = vld [vmem:[%s2266_s1 + $0xb8] sm:$0xf0] }
   0x3   :  { %v1227_v7 = vor.u32 %v1162_v2, %v1133_v4  ;;  %v1229_v8 = vor.u32 %v1164_v6, %v1139_v5  ;;  %v1119_v9 = vld [vmem:[%s2266_s1 + $0x90] sm:$0xf]  ;;  %v1160_v10 = vld [vmem:[%s2266_s1 + $0x98] sm:$0xf0]  ;;  %v1159_v11 = vld [vmem:[%s2266_s1 + $0x94] sm:$0xf] }
   0x4   :  { %278 = vmatpush.bf16.msra.mxu0 %v1132_v3  ;;  %1165 = vmatpush.bf16.msra.mxu3 %v1132_v3  ;;  %v1120_v12 = vor.u32 %v1160_v10, %v1119_v9  ;;  %v1121_v13 = vld [vmem:[%s2266_s1 + $0x9c] sm:$0xf0]  ;;  %v1127_v14 = vld [vmem:[%s2266_s1 + $0x98] sm:$0xf]  ;;  %v1161_v15 = vld [vmem:[%s2266_s1 + $0xa0] sm:$0xf0] }
   0x5   :  { %447 = vmatpush.bf16.msra.mxu1 %v1227_v7  ;;  %616 = vmatpush.bf16.msra.mxu2 %v1229_v8  ;;  %v1251_v16 = vor.u32 %v1159_v11, %v1121_v13  ;;  %v1253_v17 = vor.u32 %v1161_v15, %v1127_v14  ;;  %v1107_v18 = vld [vmem:[%s2266_s1 + $0x78] sm:$0xf]  ;;  %v1157_v19 = vld [vmem:[%s2266_s1 + $0x80] sm:$0xf0]  ;;  %v1156_v20 = vld [vmem:[%s2266_s1 + $0x7c] sm:$0xf] }
   0x6   :  { %v1109_v21 = vld [vmem:[%s2266_s1 + $0x84] sm:$0xf0]  ;;  %v1115_v22 = vld [vmem:[%s2266_s1 + $0x80] sm:$0xf]  ;;  %v1158_v23 = vld [vmem:[%s2266_s1 + $0x88] sm:$0xf0]  ;;  %v1108_v24 = vor.u32 %v1157_v19, %v1107_v18 }
   0x7   :  { %v1275_v25 = vor.u32 %v1156_v20, %v1109_v21  ;;  %v1277_v26 = vor.u32 %v1158_v23, %v1115_v22  ;;  %v1095_v27 = vld [vmem:[%s2266_s1 + $0x60] sm:$0xf]  ;;  %v1154_v28 = vld [vmem:[%s2266_s1 + $0x68] sm:$0xf0]  ;;  %v1153_v29 = vld [vmem:[%s2266_s1 + $0x64] sm:$0xf] }
   0x8   :  { %279 = vmatpush.bf16.msra.mxu0 %v1120_v12  ;;  %1166 = vmatpush.bf16.msra.mxu3 %v1120_v12  ;;  %v1097_v30 = vld [vmem:[%s2266_s1 + $0x6c] sm:$0xf0]  ;;  %v1103_v31 = vld [vmem:[%s2266_s1 + $0x68] sm:$0xf]  ;;  %v1155_v32 = vld [vmem:[%s2266_s1 + $0x70] sm:$0xf0]  ;;  %v1096_v33 = vor.u32 %v1154_v28, %v1095_v27 }
   0x9   :  { %448 = vmatpush.bf16.msra.mxu1 %v1251_v16  ;;  %617 = vmatpush.bf16.msra.mxu2 %v1253_v17  ;;  %v1299_v34 = vor.u32 %v1153_v29, %v1097_v30  ;;  %v1301_v35 = vor.u32 %v1155_v32, %v1103_v31  ;;  %v1083_v36 = vld [vmem:[%s2266_s1 + $0x48] sm:$0xf]  ;;  %v1151_v37 = vld [vmem:[%s2266_s1 + $0x50] sm:$0xf0]  ;;  %v1150_v38 = vld [vmem:[%s2266_s1 + $0x4c] sm:$0xf] }
   0xa   :  { %v1085_v39 = vld [vmem:[%s2266_s1 + $0x54] sm:$0xf0]  ;;  %v1091_v40 = vld [vmem:[%s2266_s1 + $0x50] sm:$0xf]  ;;  %v1152_v41 = vld [vmem:[%s2266_s1 + $0x58] sm:$0xf0]  ;;  %v1084_v42 = vor.u32 %v1151_v37, %v1083_v36 }
   0xb   :  { %v1323_v43 = vor.u32 %v1150_v38, %v1085_v39  ;;  %v1325_v44 = vor.u32 %v1152_v41, %v1091_v40  ;;  %v1071_v45 = vld [vmem:[%s2266_s1 + $0x30] sm:$0xf]  ;;  %v1148_v46 = vld [vmem:[%s2266_s1 + $0x38] sm:$0xf0]  ;;  %v1147_v47 = vld [vmem:[%s2266_s1 + $0x34] sm:$0xf] }
   0xc   :  { %280 = vmatpush.bf16.msra.mxu0 %v1108_v24  ;;  %1167 = vmatpush.bf16.msra.mxu3 %v1108_v24  ;;  %v1073_v48 = vld [vmem:[%s2266_s1 + $0x3c] sm:$0xf0]  ;;  %v1079_v49 = vld [vmem:[%s2266_s1 + $0x38] sm:$0xf]  ;;  %v1149_v50 = vld [vmem:[%s2266_s1 + $0x40] sm:$0xf0]  ;;  %v1072_v51 = vor.u32 %v1148_v46, %v1071_v45 }
   0xd   :  { %449 = vmatpush.bf16.msra.mxu1 %v1275_v25  ;;  %618 = vmatpush.bf16.msra.mxu2 %v1277_v26  ;;  %v1076_v52 = vor.u32 %v1147_v47, %v1073_v48  ;;  %v1347_v53 = vor.u32 %v1149_v50, %v1079_v49  ;;  %v1059_v54 = vld [vmem:[%s2266_s1 + $0x18] sm:$0xf]  ;;  %v1145_v55 = vld [vmem:[%s2266_s1 + $0x20] sm:$0xf0]  ;;  %v1144_v56 = vld [vmem:[%s2266_s1 + $0x1c] sm:$0xf] }
   0xe   :  { %v1061_v57 = vld [vmem:[%s2266_s1 + $0x24] sm:$0xf0]  ;;  %v1067_v58 = vld [vmem:[%s2266_s1 + $0x20] sm:$0xf]  ;;  %v1146_v59 = vld [vmem:[%s2266_s1 + $0x28] sm:$0xf0]  ;;  %v1060_v60 = vor.u32 %v1145_v55, %v1059_v54 }
   0xf   :  { %v1064_v61 = vor.u32 %v1144_v56, %v1061_v57  ;;  %v1368_v62 = vor.u32 %v1146_v59, %v1067_v58  ;;  %v1047_v63 = vld [vmem:[%s2266_s1] sm:$0xf]  ;;  %v1142_v0 = vld [vmem:[%s2266_s1 + $0x8] sm:$0xf0]  ;;  %v1141_v1 = vld [vmem:[%s2266_s1 + $0x4] sm:$0xf] }
  0x10   :  { %281 = vmatpush.bf16.msra.mxu0 %v1096_v33  ;;  %1168 = vmatpush.bf16.msra.mxu3 %v1096_v33  ;;  %v1049_v2 = vld [vmem:[%s2266_s1 + $0xc] sm:$0xf0]  ;;  %v1055_v3 = vld [vmem:[%s2266_s1 + $0x8] sm:$0xf]  ;;  %v1143_v4 = vld [vmem:[%s2266_s1 + $0x10] sm:$0xf0]  ;;  %v1048_v6 = vor.u32 %v1142_v0, %v1047_v63 }
  0x11   :  { %450 = vmatpush.bf16.msra.mxu1 %v1299_v34  ;;  %619 = vmatpush.bf16.msra.mxu2 %v1301_v35  ;;  %v14_v5 = vld [vmem:[%s2267_s0] sm:$0xff]  ;;  %v15_v9 = vld [vmem:[%s2267_s0 + $0x8] sm:$0xff]  ;;  %v1052_v12 = vor.u32 %v1141_v1, %v1049_v2  ;;  %v1056_v13 = vor.u32 %v1143_v4, %v1055_v3  ;;  %v16_v18 = vld [vmem:[%s2267_s0 + $0x10] sm:$0xff] }
  0x12   :  { %v62_v10 = vld [vmem:[%s2267_s0 + $0x180] sm:$0xff]  ;;  %v63_v11 = vld [vmem:[%s2267_s0 + $0x188] sm:$0xff]  ;;  %v78_v14 = vpack.c.bf16 %v15_v9, %v14_v5  ;;  %v17_v19 = vld [vmem:[%s2267_s0 + $0x18] sm:$0xff] }
  0x13   :  { %v1401_v15 = vpack.c.bf16 %v63_v11, %v62_v10  ;;  %v65_v20 = vld [vmem:[%s2267_s0 + $0x198] sm:$0xff]  ;;  %v18_v22 = vld [vmem:[%s2267_s0 + $0x20] sm:$0xff]  ;;  %v19_v23 = vld [vmem:[%s2267_s0 + $0x28] sm:$0xff] }
  0x14   :  { %282 = vmatpush.bf16.msra.mxu0 %v1084_v42  ;;  %1169 = vmatpush.bf16.msra.mxu3 %v1084_v42  ;;  %v66_v24 = vld [vmem:[%s2267_s0 + $0x1a0] sm:$0xff]  ;;  %v80_v27 = vpack.c.bf16 %v19_v23, %v18_v22  ;;  %v20_v29 = vld [vmem:[%s2267_s0 + $0x30] sm:$0xff]  ;;  %v21_v30 = vld [vmem:[%s2267_s0 + $0x38] sm:$0xff] }
  0x15   :  { %451 = vmatpush.bf16.msra.mxu1 %v1323_v43  ;;  %620 = vmatpush.bf16.msra.mxu2 %v1325_v44  ;;  %v69_v31 = vld [vmem:[%s2267_s0 + $0x1b8] sm:$0xff]  ;;  %v22_v32 = vld [vmem:[%s2267_s0 + $0x40] sm:$0xff]  ;;  %v23_v33 = vld [vmem:[%s2267_s0 + $0x48] sm:$0xff] }
  0x16   :  { %v82_v36 = vpack.c.bf16 %v23_v33, %v22_v32  ;;  %v24_v38 = vld [vmem:[%s2267_s0 + $0x50] sm:$0xff]  ;;  %v25_v39 = vld [vmem:[%s2267_s0 + $0x58] sm:$0xff]  ;;  %v27_v45 = vld [vmem:[%s2267_s0 + $0x68] sm:$0xff] }
  0x17   :  { %v72_v40 = vld [vmem:[%s2267_s0 + $0x1d0] sm:$0xff]  ;;  %v73_v41 = vld [vmem:[%s2267_s0 + $0x1d8] sm:$0xff]  ;;  %v83_v42 = vpack.c.bf16 %v25_v39, %v24_v38  ;;  %v74_v46 = vld [vmem:[%s2267_s0 + $0x1e0] sm:$0xff] }
  0x18   :  { %283 = vmatpush.bf16.msra.mxu0 %v1072_v51  ;;  %1170 = vmatpush.bf16.msra.mxu3 %v1072_v51  ;;  %v75_v47 = vld [vmem:[%s2267_s0 + $0x1e8] sm:$0xff]  ;;  %v28_v50 = vld [vmem:[%s2267_s0 + $0x70] sm:$0xff]  ;;  %v29_v51 = vld [vmem:[%s2267_s0 + $0x78] sm:$0xff] }
  0x19   :  { %452 = vmatpush.bf16.msra.mxu1 %v1076_v52  ;;  %621 = vmatpush.bf16.msra.mxu2 %v1347_v53  ;;  %v1503_v49 = vpack.c.bf16 %v75_v47, %v74_v46  ;;  %v85_v54 = vpack.c.bf16 %v29_v51, %v28_v50  ;;  %v142_v56 = vld [vmem:[%s2268_s2] sm:$0x7]  ;;  %v31_v58 = vld [vmem:[%s2267_s0 + $0x88] sm:$0xff] }
  0x1a   :  { %v30_v57 = vld [vmem:[%s2267_s0 + $0x80] sm:$0xff]  ;;  %v1530_v59 = vperm.slane %v142_v56, 0  ;;  %v1537_v3 = vperm.slane %v142_v56, 2 }
  0x1b   :  { %v34_v39 = vld [vmem:[%s2267_s0 + $0xa0] sm:$0xff] }
  0x1c   :  { %284 = vmatpush.bf16.msra.mxu0 %v1060_v60  ;;  %1171 = vmatpush.bf16.msra.mxu3 %v1060_v60  ;;  %v1532_v60 = vperm.slane %v142_v56, 1 }
  0x1d   :  { %453 = vmatpush.bf16.msra.mxu1 %v1064_v61  ;;  %622 = vmatpush.bf16.msra.mxu2 %v1368_v62 }
  0x20   :  { %285 = vmatpush.bf16.msra.mxu0 %v1048_v6  ;;  %1172 = vmatpush.bf16.msra.mxu3 %v1048_v6 }
  0x21   :  { %454 = vmatpush.bf16.msra.mxu1 %v1052_v12  ;;  %623 = vmatpush.bf16.msra.mxu2 %v1056_v13 }
  0x23   :  { %286 = vmatmul.bf16.vlgmr.msra.gmra.mxu0 %v78_v14  ;;  %406 = vmatmul.bf16.vlgmr.msra.gmra.mxu3 %v1401_v15 }
  0x24   :  { %1173 = vmatpush.bf16.msrb.mxu3 %v1227_v7  ;;  %455 = vmatmul.bf16.vlgmr.msra.gmra.mxu1 %v78_v14  ;;  %v64_v7 = vld [vmem:[%s2267_s0 + $0x190] sm:$0xff] }
  0x25   :  { %624 = vmatmul.bf16.vlgmr.msra.gmra.mxu2 %v78_v14  ;;  %v1420_v21 = vpack.c.bf16 %v65_v20, %v64_v7 }
  0x28   :  { %1174 = vmatpush.bf16.msrb.mxu3 %v1251_v16  ;;  %v79_v16 = vpack.c.bf16 %v17_v19, %v16_v18  ;;  %v32_v18 = vld [vmem:[%s2267_s0 + $0x90] sm:$0xff]  ;;  %v33_v19 = vld [vmem:[%s2267_s0 + $0x98] sm:$0xff] }
  0x2c   :  { %1175 = vmatpush.bf16.msrb.mxu3 %v1275_v25  ;;  %v67_v25 = vld [vmem:[%s2267_s0 + $0x1a8] sm:$0xff] }
  0x2d   :  { %v1436_v28 = vpack.c.bf16 %v67_v25, %v66_v24 }
  0x30   :  { %1176 = vmatpush.bf16.msrb.mxu3 %v1299_v34  ;;  %v70_v34 = vld [vmem:[%s2267_s0 + $0x1c0] sm:$0xff] }
  0x33   :  { %291 = vmatmul.bf16.gmra.mxu0 %v79_v16  ;;  %411 = vmatmul.bf16.gmra.mxu3 %v1420_v21 }
  0x34   :  { %1177 = vmatpush.bf16.msrb.mxu3 %v1323_v43  ;;  %460 = vmatmul.bf16.gmra.mxu1 %v79_v16  ;;  %v1488_v43 = vpack.c.bf16 %v73_v41, %v72_v40  ;;  %v35_v40 = vld [vmem:[%s2267_s0 + $0xa8] sm:$0xff] }
  0x35   :  { %629 = vmatmul.bf16.gmra.mxu2 %v79_v16  ;;  %v87_v16 = vpack.c.bf16 %v33_v19, %v32_v18 }
  0x38   :  { %1178 = vmatpush.bf16.msrb.mxu3 %v1076_v52  ;;  %v76_v52 = vld [vmem:[%s2267_s0 + $0x1f0] sm:$0xff] }
  0x3c   :  { %1179 = vmatpush.bf16.msrb.mxu3 %v1064_v61  ;;  %v86_v61 = vpack.c.bf16 %v31_v58, %v30_v57 }
  0x40   :  { %1180 = vmatpush.bf16.msrb.mxu3 %v1052_v12 }
  0x43   :  { %296 = vmatmul.bf16.gmra.mxu0 %v80_v27  ;;  %416 = vmatmul.bf16.gmra.mxu3 %v1436_v28 }
  0x44   :  { %1181 = vmatpush.bf16.msra.mxu3 %v1229_v8  ;;  %465 = vmatmul.bf16.gmra.mxu1 %v80_v27  ;;  %v68_v8 = vld [vmem:[%s2267_s0 + $0x1b0] sm:$0xff] }
  0x45   :  { %634 = vmatmul.bf16.gmra.mxu2 %v80_v27 }
  0x48   :  { %1182 = vmatpush.bf16.msra.mxu3 %v1253_v17  ;;  %v81_v17 = vpack.c.bf16 %v21_v30, %v20_v29 }
  0x4c   :  { %1183 = vmatpush.bf16.msra.mxu3 %v1277_v26  ;;  %v1455_v26 = vpack.c.bf16 %v69_v31, %v68_v8 }
  0x50   :  { %1184 = vmatpush.bf16.msra.mxu3 %v1301_v35  ;;  %v71_v35 = vld [vmem:[%s2267_s0 + $0x1c8] sm:$0xff] }
  0x51   :  { %v1473_v37 = vpack.c.bf16 %v71_v35, %v70_v34 }
  0x53   :  { %301 = vmatmul.bf16.gmra.mxu0 %v81_v17  ;;  %421 = vmatmul.bf16.gmra.mxu3 %v1455_v26 }
  0x54   :  { %1185 = vmatpush.bf16.msra.mxu3 %v1325_v44  ;;  %470 = vmatmul.bf16.gmra.mxu1 %v81_v17  ;;  %v26_v44 = vld [vmem:[%s2267_s0 + $0x60] sm:$0xff] }
  0x55   :  { %639 = vmatmul.bf16.gmra.mxu2 %v81_v17  ;;  %v84_v48 = vpack.c.bf16 %v27_v45, %v26_v44  ;;  %v88_v44 = vpack.c.bf16 %v35_v40, %v34_v39 }
  0x58   :  { %1186 = vmatpush.bf16.msra.mxu3 %v1347_v53  ;;  %v77_v53 = vld [vmem:[%s2267_s0 + $0x1f8] sm:$0xff] }
  0x59   :  { %v1518_v55 = vpack.c.bf16 %v77_v53, %v76_v52 }
  0x5c   :  { %1187 = vmatpush.bf16.msra.mxu3 %v1368_v62 }
  0x60   :  { %1188 = vmatpush.bf16.msra.mxu3 %v1056_v13 }
  0x63   :  { %306 = vmatmul.bf16.gmra.mxu0 %v82_v36  ;;  %426 = vmatmul.bf16.gmra.mxu3 %v1473_v37 }
  0x64   :  { %475 = vmatmul.bf16.gmra.mxu1 %v82_v36 }
  0x65   :  { %644 = vmatmul.bf16.gmra.mxu2 %v82_v36 }
  0x73   :  { %311 = vmatmul.bf16.gmra.mxu0 %v83_v42  ;;  %431 = vmatmul.bf16.gmra.mxu3 %v1488_v43 }
  0x74   :  { %480 = vmatmul.bf16.gmra.mxu1 %v83_v42 }
  0x75   :  { %649 = vmatmul.bf16.gmra.mxu2 %v83_v42 }
  0x83   :  { %316 = vmatmul.bf16.gmra.mxu0 %v84_v48  ;;  %436 = vmatmul.bf16.gmra.mxu3 %v1503_v49 }
  0x84   :  { %485 = vmatmul.bf16.gmra.mxu1 %v84_v48 }
  0x85   :  { %654 = vmatmul.bf16.gmra.mxu2 %v84_v48 }
  0x93   :  { %321 = vmatmul.bf16.gmra.mxu0 %v85_v54  ;;  %441 = vmatmul.bf16.gmra.mxu3 %v1518_v55 }
  0x94   :  { %490 = vmatmul.bf16.gmra.mxu1 %v85_v54 }
  0x95   :  { %659 = vmatmul.bf16.gmra.mxu2 %v85_v54 }
  0xa0   :  { %v287_v62 = vpop.f32.mrf.mxu0 }
  0xa1   :  { %v288_v63 = vadd.f32 %v287_v62, %v1530_v59  ;;  %v456_v0 = vpop.f32.mrf.mxu1 }
  0xa2   :  { %v457_v1 = vadd.f32 %v456_v0, %v1532_v60 }
  0xa3   :  { %326 = vmatmul.bf16.gmra.mxu0 %v86_v61  ;;  %575 = vmatmul.bf16.vlgmr.msrb.gmra.mxu3 %v1401_v15 }
  0xa4   :  { %v785_v2 = vpack.c.bf16 %v457_v1, %v288_v63  ;;  %495 = vmatmul.bf16.gmra.mxu1 %v86_v61  ;;  %v36_v1 = vld [vmem:[%s2267_s0 + $0xb0] sm:$0xff] }
  0xa5   :  { %664 = vmatmul.bf16.gmra.mxu2 %v86_v61 }
  0xa6   :  { %913 = vst [vmem:[%s2269_s3] sm:$0xff] %v785_v2  ;;  %v1542_v4 = vpop.f32.mrf.mxu3  ;;  %v37_v2 = vld [vmem:[%s2267_s0 + $0xb8] sm:$0xff] }
  0xa8   :  { %v625_v5 = vpop.f32.mrf.mxu2  ;;  %v289_v9 = vpop.f32.mrf.mxu0 }
  0xa9   :  { %v626_v6 = vadd.f32 %v625_v5, %v1537_v3  ;;  %v290_v10 = vadd.f32 %v289_v9, %v1530_v59  ;;  %v458_v11 = vpop.f32.mrf.mxu1  ;;  %v89_v9 = vpack.c.bf16 %v37_v2, %v36_v1 }
  0xaa   :  { %v459_v13 = vadd.f32 %v458_v11, %v1532_v60 }
  0xab   :  { %v786_v12 = vpack.c.bf16 %v626_v6, %v626_v6 }
  0xac   :  { %v787_v14 = vpack.c.bf16 %v459_v13, %v290_v10 }
  0xad   :  { %914 = vst [vmem:[%s2269_s3 + $0x8] sm:$0xf] %v786_v12 }
  0xae   :  { %915 = vst [vmem:[%s2269_s3 + $0xc] sm:$0xff] %v787_v14  ;;  %v1559_v7 = vpop.f32.mrf.mxu3 }
  0xb0   :  { %v627_v20 = vpop.f32.mrf.mxu2  ;;  %v292_v23 = vpop.f32.mrf.mxu0 }
  0xb1   :  { %v628_v22 = vadd.f32 %v627_v20, %v1537_v3  ;;  %v293_v24 = vadd.f32 %v292_v23, %v1530_v59  ;;  %v461_v25 = vpop.f32.mrf.mxu1 }
  0xb2   :  { %v462_v29 = vadd.f32 %v461_v25, %v1532_v60 }
  0xb3   :  { %v788_v27 = vpack.c.bf16 %v628_v22, %v628_v22  ;;  %331 = vmatmul.bf16.gmra.mxu0 %v87_v16  ;;  %580 = vmatmul.bf16.gmra.mxu3 %v1420_v21 }
  0xb4   :  { %v789_v30 = vpack.c.bf16 %v462_v29, %v293_v24  ;;  %500 = vmatmul.bf16.gmra.mxu1 %v87_v16 }
  0xb5   :  { %916 = vst [vmem:[%s2269_s3 + $0x14] sm:$0xf] %v788_v27  ;;  %669 = vmatmul.bf16.gmra.mxu2 %v87_v16 }
  0xb6   :  { %917 = vst [vmem:[%s2269_s3 + $0x18] sm:$0xff] %v789_v30  ;;  %v1571_v8 = vpop.f32.mrf.mxu3 }
  0xb8   :  { %v630_v31 = vpop.f32.mrf.mxu2  ;;  %v294_v32 = vpop.f32.mrf.mxu0 }
  0xb9   :  { %v631_v17 = vadd.f32 %v630_v31, %v1537_v3  ;;  %v295_v33 = vadd.f32 %v294_v32, %v1530_v59  ;;  %v463_v34 = vpop.f32.mrf.mxu1  ;;  %v38_v31 = vld [vmem:[%s2267_s0 + $0xc0] sm:$0xff] }
  0xba   :  { %v464_v36 = vadd.f32 %v463_v34, %v1532_v60 }
  0xbb   :  { %v790_v35 = vpack.c.bf16 %v631_v17, %v631_v17  ;;  %v39_v17 = vld [vmem:[%s2267_s0 + $0xc8] sm:$0xff] }
  0xbc   :  { %v791_v38 = vpack.c.bf16 %v464_v36, %v295_v33  ;;  %v90_v34 = vpack.c.bf16 %v39_v17, %v38_v31 }
  0xbd   :  { %918 = vst [vmem:[%s2269_s3 + $0x20] sm:$0xf] %v790_v35 }
  0xbe   :  { %919 = vst [vmem:[%s2269_s3 + $0x24] sm:$0xff] %v791_v38  ;;  %v1588_v41 = vpop.f32.mrf.mxu3 }
  0xc0   :  { %v632_v42 = vpop.f32.mrf.mxu2  ;;  %v297_v46 = vpop.f32.mrf.mxu0 }
  0xc1   :  { %v633_v45 = vadd.f32 %v632_v42, %v1537_v3  ;;  %v298_v47 = vadd.f32 %v297_v46, %v1530_v59  ;;  %v466_v48 = vpop.f32.mrf.mxu1 }
  0xc2   :  { %v467_v51 = vadd.f32 %v466_v48, %v1532_v60 }
  0xc3   :  { %v792_v50 = vpack.c.bf16 %v633_v45, %v633_v45  ;;  %336 = vmatmul.bf16.gmra.mxu0 %v88_v44  ;;  %585 = vmatmul.bf16.gmra.mxu3 %v1436_v28 }
  0xc4   :  { %v793_v52 = vpack.c.bf16 %v467_v51, %v298_v47  ;;  %505 = vmatmul.bf16.gmra.mxu1 %v88_v44 }
  0xc5   :  { %920 = vst [vmem:[%s2269_s3 + $0x2c] sm:$0xf] %v792_v50  ;;  %674 = vmatmul.bf16.gmra.mxu2 %v88_v44 }
  0xc6   :  { %921 = vst [vmem:[%s2269_s3 + $0x30] sm:$0xff] %v793_v52  ;;  %v1600_v53 = vpop.f32.mrf.mxu3 }
  0xc8   :  { %v635_v54 = vpop.f32.mrf.mxu2  ;;  %v299_v57 = vpop.f32.mrf.mxu0 }
  0xc9   :  { %v636_v56 = vadd.f32 %v635_v54, %v1537_v3  ;;  %v300_v58 = vadd.f32 %v299_v57, %v1530_v59  ;;  %v468_v61 = vpop.f32.mrf.mxu1  ;;  %v40_v57 = vld [vmem:[%s2267_s0 + $0xd0] sm:$0xff] }
  0xca   :  { %v469_v63 = vadd.f32 %v468_v61, %v1532_v60 }
  0xcb   :  { %v794_v62 = vpack.c.bf16 %v636_v56, %v636_v56 }
  0xcc   :  { %v795_v0 = vpack.c.bf16 %v469_v63, %v300_v58  ;;  %v41_v58 = vld [vmem:[%s2267_s0 + $0xd8] sm:$0xff] }
  0xcd   :  { %922 = vst [vmem:[%s2269_s3 + $0x38] sm:$0xf] %v794_v62  ;;  %v91_v63 = vpack.c.bf16 %v41_v58, %v40_v57 }
  0xce   :  { %923 = vst [vmem:[%s2269_s3 + $0x3c] sm:$0xff] %v795_v0  ;;  %v1617_v5 = vpop.f32.mrf.mxu3 }
  0xd0   :  { %v637_v6 = vpop.f32.mrf.mxu2  ;;  %v302_v11 = vpop.f32.mrf.mxu0 }
  0xd1   :  { %v638_v10 = vadd.f32 %v637_v6, %v1537_v3  ;;  %v303_v12 = vadd.f32 %v302_v11, %v1530_v59  ;;  %v471_v13 = vpop.f32.mrf.mxu1 }
  0xd2   :  { %v472_v18 = vadd.f32 %v471_v13, %v1532_v60 }
  0xd3   :  { %v796_v14 = vpack.c.bf16 %v638_v10, %v638_v10  ;;  %341 = vmatmul.bf16.gmra.mxu0 %v89_v9  ;;  %590 = vmatmul.bf16.gmra.mxu3 %v1455_v26 }
  0xd4   :  { %v797_v19 = vpack.c.bf16 %v472_v18, %v303_v12  ;;  %510 = vmatmul.bf16.gmra.mxu1 %v89_v9 }
  0xd5   :  { %924 = vst [vmem:[%s2269_s3 + $0x44] sm:$0xf] %v796_v14  ;;  %679 = vmatmul.bf16.gmra.mxu2 %v89_v9 }
  0xd6   :  { %925 = vst [vmem:[%s2269_s3 + $0x48] sm:$0xff] %v797_v19  ;;  %v1629_v20 = vpop.f32.mrf.mxu3 }
  0xd8   :  { %v640_v16 = vpop.f32.mrf.mxu2  ;;  %v304_v23 = vpop.f32.mrf.mxu0 }
  0xd9   :  { %v641_v22 = vadd.f32 %v640_v16, %v1537_v3  ;;  %v305_v24 = vadd.f32 %v304_v23, %v1530_v59  ;;  %v473_v25 = vpop.f32.mrf.mxu1 }
  0xda   :  { %v474_v29 = vadd.f32 %v473_v25, %v1532_v60  ;;  %v42_v25 = vld [vmem:[%s2267_s0 + $0xe0] sm:$0xff] }
  0xdb   :  { %v798_v27 = vpack.c.bf16 %v641_v22, %v641_v22 }
  0xdc   :  { %v799_v30 = vpack.c.bf16 %v474_v29, %v305_v24 }
  0xdd   :  { %926 = vst [vmem:[%s2269_s3 + $0x50] sm:$0xf] %v798_v27  ;;  %v43_v27 = vld [vmem:[%s2267_s0 + $0xe8] sm:$0xff] }
  0xde   :  { %927 = vst [vmem:[%s2269_s3 + $0x54] sm:$0xff] %v799_v30  ;;  %v1646_v32 = vpop.f32.mrf.mxu3  ;;  %v92_v31 = vpack.c.bf16 %v43_v27, %v42_v25  ;;  %v46_v25 = vld [vmem:[%s2267_s0 + $0x100] sm:$0xff]  ;;  %v47_v27 = vld [vmem:[%s2267_s0 + $0x108] sm:$0xff] }
  0xe0   :  { %v642_v33 = vpop.f32.mrf.mxu2  ;;  %v307_v36 = vpop.f32.mrf.mxu0 }
  0xe1   :  { %v643_v35 = vadd.f32 %v642_v33, %v1537_v3  ;;  %v308_v38 = vadd.f32 %v307_v36, %v1530_v59  ;;  %v476_v39 = vpop.f32.mrf.mxu1 }
  0xe2   :  { %v477_v42 = vadd.f32 %v476_v39, %v1532_v60 }
  0xe3   :  { %v800_v40 = vpack.c.bf16 %v643_v35, %v643_v35  ;;  %346 = vmatmul.bf16.gmra.mxu0 %v90_v34  ;;  %595 = vmatmul.bf16.gmra.mxu3 %v1473_v37 }
  0xe4   :  { %v801_v44 = vpack.c.bf16 %v477_v42, %v308_v38  ;;  %515 = vmatmul.bf16.gmra.mxu1 %v90_v34 }
  0xe5   :  { %928 = vst [vmem:[%s2269_s3 + $0x5c] sm:$0xf] %v800_v40  ;;  %684 = vmatmul.bf16.gmra.mxu2 %v90_v34 }
  0xe6   :  { %929 = vst [vmem:[%s2269_s3 + $0x60] sm:$0xff] %v801_v44  ;;  %v1658_v45 = vpop.f32.mrf.mxu3 }
  0xe8   :  { %v645_v46 = vpop.f32.mrf.mxu2  ;;  %v309_v48 = vpop.f32.mrf.mxu0 }
  0xe9   :  { %v646_v47 = vadd.f32 %v645_v46, %v1537_v3  ;;  %v310_v50 = vadd.f32 %v309_v48, %v1530_v59  ;;  %v478_v51 = vpop.f32.mrf.mxu1 }
  0xea   :  { %v479_v54 = vadd.f32 %v478_v51, %v1532_v60 }
  0xeb   :  { %v802_v52 = vpack.c.bf16 %v646_v47, %v646_v47 }
  0xec   :  { %v803_v56 = vpack.c.bf16 %v479_v54, %v310_v50  ;;  %v44_v54 = vld [vmem:[%s2267_s0 + $0xf0] sm:$0xff] }
  0xed   :  { %930 = vst [vmem:[%s2269_s3 + $0x68] sm:$0xf] %v802_v52 }
  0xee   :  { %931 = vst [vmem:[%s2269_s3 + $0x6c] sm:$0xff] %v803_v56  ;;  %v1675_v61 = vpop.f32.mrf.mxu3  ;;  %v45_v56 = vld [vmem:[%s2267_s0 + $0xf8] sm:$0xff] }
  0xf0   :  { %v647_v62 = vpop.f32.mrf.mxu2  ;;  %v312_v1 = vpop.f32.mrf.mxu0 }
  0xf1   :  { %v648_v0 = vadd.f32 %v647_v62, %v1537_v3  ;;  %v313_v2 = vadd.f32 %v312_v1, %v1530_v59  ;;  %v481_v6 = vpop.f32.mrf.mxu1  ;;  %v93_v62 = vpack.c.bf16 %v45_v56, %v44_v54 }
  0xf2   :  { %v482_v10 = vadd.f32 %v481_v6, %v1532_v60 }
  0xf3   :  { %v804_v9 = vpack.c.bf16 %v648_v0, %v648_v0  ;;  %351 = vmatmul.bf16.gmra.mxu0 %v91_v63  ;;  %600 = vmatmul.bf16.gmra.mxu3 %v1488_v43 }
  0xf4   :  { %v805_v11 = vpack.c.bf16 %v482_v10, %v313_v2  ;;  %520 = vmatmul.bf16.gmra.mxu1 %v91_v63 }
  0xf5   :  { %932 = vst [vmem:[%s2269_s3 + $0x74] sm:$0xf] %v804_v9  ;;  %689 = vmatmul.bf16.gmra.mxu2 %v91_v63 }
  0xf6   :  { %933 = vst [vmem:[%s2269_s3 + $0x78] sm:$0xff] %v805_v11  ;;  %v1687_v12 = vpop.f32.mrf.mxu3 }
  0xf8   :  { %v650_v13 = vpop.f32.mrf.mxu2  ;;  %v314_v18 = vpop.f32.mrf.mxu0 }
  0xf9   :  { %v651_v14 = vadd.f32 %v650_v13, %v1537_v3  ;;  %v315_v19 = vadd.f32 %v314_v18, %v1530_v59  ;;  %v483_v16 = vpop.f32.mrf.mxu1 }
  0xfa   :  { %v484_v23 = vadd.f32 %v483_v16, %v1532_v60 }
  0xfb   :  { %v806_v22 = vpack.c.bf16 %v651_v14, %v651_v14 }
  0xfc   :  { %v807_v24 = vpack.c.bf16 %v484_v23, %v315_v19 }
  0xfd   :  { %934 = vst [vmem:[%s2269_s3 + $0x80] sm:$0xf] %v806_v22 }
  0xfe   :  { %935 = vst [vmem:[%s2269_s3 + $0x84] sm:$0xff] %v807_v24  ;;  %v1704_v29 = vpop.f32.mrf.mxu3 }
 0x100   :  { %v652_v30 = vpop.f32.mrf.mxu2  ;;  %v317_v33 = vpop.f32.mrf.mxu0 }
 0x101   :  { %v653_v17 = vadd.f32 %v652_v30, %v1537_v3  ;;  %v318_v34 = vadd.f32 %v317_v33, %v1530_v59  ;;  %v486_v35 = vpop.f32.mrf.mxu1 }
 0x102   :  { %v487_v38 = vadd.f32 %v486_v35, %v1532_v60 }
 0x103   :  { %v808_v36 = vpack.c.bf16 %v653_v17, %v653_v17  ;;  %356 = vmatmul.bf16.gmra.mxu0 %v92_v31  ;;  %605 = vmatmul.bf16.gmra.mxu3 %v1503_v49  ;;  %v94_v17 = vpack.c.bf16 %v47_v27, %v46_v25 }
 0x104   :  { %v809_v39 = vpack.c.bf16 %v487_v38, %v318_v34  ;;  %525 = vmatmul.bf16.gmra.mxu1 %v92_v31 }
 0x105   :  { %936 = vst [vmem:[%s2269_s3 + $0x8c] sm:$0xf] %v808_v36  ;;  %694 = vmatmul.bf16.gmra.mxu2 %v92_v31 }
 0x106   :  { %937 = vst [vmem:[%s2269_s3 + $0x90] sm:$0xff] %v809_v39  ;;  %v1716_v40 = vpop.f32.mrf.mxu3 }
 0x108   :  { %v655_v42 = vpop.f32.mrf.mxu2  ;;  %v319_v46 = vpop.f32.mrf.mxu0 }
 0x109   :  { %v656_v44 = vadd.f32 %v655_v42, %v1537_v3  ;;  %v320_v47 = vadd.f32 %v319_v46, %v1530_v59  ;;  %v488_v48 = vpop.f32.mrf.mxu1  ;;  %v408_v46 = vadd.f32 %v1542_v4, %v1530_v59 }
 0x10a   :  { %v489_v51 = vadd.f32 %v488_v48, %v1532_v60 }
 0x10b   :  { %v810_v50 = vpack.c.bf16 %v656_v44, %v656_v44 }
 0x10c   :  { %v811_v52 = vpack.c.bf16 %v489_v51, %v320_v47 }
 0x10d   :  { %938 = vst [vmem:[%s2269_s3 + $0x98] sm:$0xf] %v810_v50 }
 0x10e   :  { %939 = vst [vmem:[%s2269_s3 + $0x9c] sm:$0xff] %v811_v52  ;;  %v1733_v57 = vpop.f32.mrf.mxu3 }
 0x110   :  { %v657_v58 = vpop.f32.mrf.mxu2  ;;  %v322_v0 = vpop.f32.mrf.mxu0 }
 0x111   :  { %v658_v63 = vadd.f32 %v657_v58, %v1537_v3  ;;  %v323_v1 = vadd.f32 %v322_v0, %v1530_v59  ;;  %v491_v2 = vpop.f32.mrf.mxu1 }
 0x112   :  { %v492_v9 = vadd.f32 %v491_v2, %v1532_v60 }
 0x113   :  { %v812_v6 = vpack.c.bf16 %v658_v63, %v658_v63  ;;  %361 = vmatmul.bf16.gmra.mxu0 %v93_v62  ;;  %610 = vmatmul.bf16.gmra.mxu3 %v1518_v55  ;;  %v49_v63 = vld [vmem:[%s2267_s0 + $0x118] sm:$0xff] }
 0x114   :  { %v813_v10 = vpack.c.bf16 %v492_v9, %v323_v1  ;;  %530 = vmatmul.bf16.gmra.mxu1 %v93_v62  ;;  %v410_v1 = vadd.f32 %v1559_v7, %v1530_v59 }
 0x115   :  { %940 = vst [vmem:[%s2269_s3 + $0xa4] sm:$0xf] %v812_v6  ;;  %699 = vmatmul.bf16.gmra.mxu2 %v93_v62  ;;  %v48_v62 = vld [vmem:[%s2267_s0 + $0x110] sm:$0xff] }
 0x116   :  { %941 = vst [vmem:[%s2269_s3 + $0xa8] sm:$0xff] %v813_v10  ;;  %v1745_v11 = vpop.f32.mrf.mxu3  ;;  %v95_v9 = vpack.c.bf16 %v49_v63, %v48_v62  ;;  %v418_v62 = vadd.f32 %v1600_v53, %v1530_v59 }
 0x118   :  { %v660_v13 = vpop.f32.mrf.mxu2  ;;  %v324_v18 = vpop.f32.mrf.mxu0 }
 0x119   :  { %v661_v14 = vadd.f32 %v660_v13, %v1537_v3  ;;  %v325_v19 = vadd.f32 %v324_v18, %v1530_v59  ;;  %v493_v16 = vpop.f32.mrf.mxu1 }
 0x11a   :  { %v494_v23 = vadd.f32 %v493_v16, %v1532_v60 }
 0x11b   :  { %v814_v22 = vpack.c.bf16 %v661_v14, %v661_v14 }
 0x11c   :  { %v815_v24 = vpack.c.bf16 %v494_v23, %v325_v19 }
 0x11d   :  { %942 = vst [vmem:[%s2269_s3 + $0xb0] sm:$0xf] %v814_v22 }
 0x11e   :  { %943 = vst [vmem:[%s2269_s3 + $0xb4] sm:$0xff] %v815_v24  ;;  %v1762_v30 = vpop.f32.mrf.mxu3  ;;  %v413_v24 = vadd.f32 %v1571_v8, %v1530_v59 }
 0x120   :  { %v662_v31 = vpop.f32.mrf.mxu2  ;;  %v327_v34 = vpop.f32.mrf.mxu0 }
 0x121   :  { %v663_v33 = vadd.f32 %v662_v31, %v1537_v3  ;;  %v328_v35 = vadd.f32 %v327_v34, %v1530_v59  ;;  %v496_v36 = vpop.f32.mrf.mxu1 }
 0x122   :  { %v497_v39 = vadd.f32 %v496_v36, %v1532_v60 }
 0x123   :  { %v816_v38 = vpack.c.bf16 %v663_v33, %v663_v33  ;;  %366 = vmatmul.bf16.gmra.mxu0 %v94_v17  ;;  %744 = vmatmul.bf16.vlgmr.msra.gmra.mxu3 %v1401_v15 }
 0x124   :  { %v817_v42 = vpack.c.bf16 %v497_v39, %v328_v35  ;;  %535 = vmatmul.bf16.gmra.mxu1 %v94_v17  ;;  %v51_v39 = vld [vmem:[%s2267_s0 + $0x128] sm:$0xff] }
 0x125   :  { %944 = vst [vmem:[%s2269_s3 + $0xbc] sm:$0xf] %v816_v38  ;;  %704 = vmatmul.bf16.gmra.mxu2 %v94_v17  ;;  %v50_v38 = vld [vmem:[%s2267_s0 + $0x120] sm:$0xff] }
 0x126   :  { %945 = vst [vmem:[%s2269_s3 + $0xc0] sm:$0xff] %v817_v42  ;;  %v576_v44 = vpop.f32.mrf.mxu3 }
 0x127   :  { %v577_v47 = vadd.f32 %v576_v44, %v1532_v60  ;;  %v415_v44 = vadd.f32 %v1588_v41, %v1530_v59 }
 0x128   :  { %v665_v48 = vpop.f32.mrf.mxu2  ;;  %v329_v50 = vpop.f32.mrf.mxu0 }
 0x129   :  { %v666_v15 = vadd.f32 %v665_v48, %v1537_v3  ;;  %v881_v51 = vpack.c.bf16 %v577_v47, %v408_v46  ;;  %v330_v52 = vadd.f32 %v329_v50, %v1530_v59  ;;  %v498_v54 = vpop.f32.mrf.mxu1  ;;  %v96_v48 = vpack.c.bf16 %v51_v39, %v50_v38 }
 0x12a   :  { %v499_v58 = vadd.f32 %v498_v54, %v1532_v60 }
 0x12b   :  { %v818_v56 = vpack.c.bf16 %v666_v15, %v666_v15  ;;  %1009 = vst [vmem:[%s2269_s3 + $0x240] sm:$0xff] %v881_v51 }
 0x12c   :  { %v819_v4 = vpack.c.bf16 %v499_v58, %v330_v52 }
 0x12d   :  { %946 = vst [vmem:[%s2269_s3 + $0xc8] sm:$0xf] %v818_v56 }
 0x12e   :  { %947 = vst [vmem:[%s2269_s3 + $0xcc] sm:$0xff] %v819_v4  ;;  %v578_v0 = vpop.f32.mrf.mxu3 }
 0x12f   :  { %v579_v2 = vadd.f32 %v578_v0, %v1532_v60 }
 0x130   :  { %v667_v6 = vpop.f32.mrf.mxu2  ;;  %v332_v13 = vpop.f32.mrf.mxu0 }
 0x131   :  { %v668_v10 = vadd.f32 %v667_v6, %v1537_v3  ;;  %v883_v14 = vpack.c.bf16 %v579_v2, %v410_v1  ;;  %v333_v18 = vadd.f32 %v332_v13, %v1530_v59  ;;  %v501_v19 = vpop.f32.mrf.mxu1 }
 0x132   :  { %v502_v22 = vadd.f32 %v501_v19, %v1532_v60 }
 0x133   :  { %v820_v16 = vpack.c.bf16 %v668_v10, %v668_v10  ;;  %1011 = vst [vmem:[%s2269_s3 + $0x24c] sm:$0xff] %v883_v14  ;;  %371 = vmatmul.bf16.gmra.mxu0 %v95_v9  ;;  %749 = vmatmul.bf16.gmra.mxu3 %v1420_v21  ;;  %v52_v14 = vld [vmem:[%s2267_s0 + $0x130] sm:$0xff] }
 0x134   :  { %v821_v7 = vpack.c.bf16 %v502_v22, %v333_v18  ;;  %540 = vmatmul.bf16.gmra.mxu1 %v95_v9  ;;  %v53_v18 = vld [vmem:[%s2267_s0 + $0x138] sm:$0xff] }
 0x135   :  { %948 = vst [vmem:[%s2269_s3 + $0xd4] sm:$0xf] %v820_v16  ;;  %709 = vmatmul.bf16.gmra.mxu2 %v95_v9  ;;  %v420_v16 = vadd.f32 %v1617_v5, %v1530_v59 }
 0x136   :  { %949 = vst [vmem:[%s2269_s3 + $0xd8] sm:$0xff] %v821_v7  ;;  %v581_v23 = vpop.f32.mrf.mxu3 }
 0x137   :  { %v582_v25 = vadd.f32 %v581_v23, %v1532_v60  ;;  %v97_v23 = vpack.c.bf16 %v53_v18, %v52_v14 }
 0x138   :  { %v670_v27 = vpop.f32.mrf.mxu2  ;;  %v334_v31 = vpop.f32.mrf.mxu0 }
 0x139   :  { %v671_v21 = vadd.f32 %v670_v27, %v1537_v3  ;;  %v885_v17 = vpack.c.bf16 %v582_v25, %v413_v24  ;;  %v335_v33 = vadd.f32 %v334_v31, %v1530_v59  ;;  %v503_v34 = vpop.f32.mrf.mxu1 }
 0x13a   :  { %v504_v36 = vadd.f32 %v503_v34, %v1532_v60 }
 0x13b   :  { %v822_v35 = vpack.c.bf16 %v671_v21, %v671_v21  ;;  %1013 = vst [vmem:[%s2269_s3 + $0x258] sm:$0xff] %v885_v17 }
 0x13c   :  { %v823_v8 = vpack.c.bf16 %v504_v36, %v335_v33 }
 0x13d   :  { %950 = vst [vmem:[%s2269_s3 + $0xe0] sm:$0xf] %v822_v35  ;;  %v423_v35 = vadd.f32 %v1629_v20, %v1530_v59 }
 0x13e   :  { %951 = vst [vmem:[%s2269_s3 + $0xe4] sm:$0xff] %v823_v8  ;;  %v583_v42 = vpop.f32.mrf.mxu3 }
 0x13f   :  { %v584_v46 = vadd.f32 %v583_v42, %v1532_v60 }
 0x140   :  { %v672_v47 = vpop.f32.mrf.mxu2  ;;  %v337_v50 = vpop.f32.mrf.mxu0 }
 0x141   :  { %v673_v15 = vadd.f32 %v672_v47, %v1537_v3  ;;  %v887_v51 = vpack.c.bf16 %v584_v46, %v415_v44  ;;  %v338_v52 = vadd.f32 %v337_v50, %v1530_v59  ;;  %v506_v54 = vpop.f32.mrf.mxu1 }
 0x142   :  { %v507_v58 = vadd.f32 %v506_v54, %v1532_v60 }
 0x143   :  { %v824_v56 = vpack.c.bf16 %v673_v15, %v673_v15  ;;  %1015 = vst [vmem:[%s2269_s3 + $0x264] sm:$0xff] %v887_v51  ;;  %376 = vmatmul.bf16.gmra.mxu0 %v96_v48  ;;  %754 = vmatmul.bf16.gmra.mxu3 %v1436_v28  ;;  %v55_v15 = vld [vmem:[%s2267_s0 + $0x148] sm:$0xff]  ;;  %v425_v51 = vadd.f32 %v1646_v32, %v1530_v59 }
 0x144   :  { %v825_v41 = vpack.c.bf16 %v507_v58, %v338_v52  ;;  %545 = vmatmul.bf16.gmra.mxu1 %v96_v48 }
 0x145   :  { %952 = vst [vmem:[%s2269_s3 + $0xec] sm:$0xf] %v824_v56  ;;  %714 = vmatmul.bf16.gmra.mxu2 %v96_v48  ;;  %v54_v48 = vld [vmem:[%s2267_s0 + $0x140] sm:$0xff] }
 0x146   :  { %953 = vst [vmem:[%s2269_s3 + $0xf0] sm:$0xff] %v825_v41  ;;  %v586_v4 = vpop.f32.mrf.mxu3  ;;  %v98_v56 = vpack.c.bf16 %v55_v15, %v54_v48  ;;  %v58_v48 = vld [vmem:[%s2267_s0 + $0x160] sm:$0xff]  ;;  %v59_v15 = vld [vmem:[%s2267_s0 + $0x168] sm:$0xff] }
 0x147   :  { %v587_v63 = vadd.f32 %v586_v4, %v1532_v60 }
 0x148   :  { %v675_v0 = vpop.f32.mrf.mxu2  ;;  %v339_v1 = vpop.f32.mrf.mxu0 }
 0x149   :  { %v676_v28 = vadd.f32 %v675_v0, %v1537_v3  ;;  %v889_v2 = vpack.c.bf16 %v587_v63, %v418_v62  ;;  %v340_v6 = vadd.f32 %v339_v1, %v1530_v59  ;;  %v508_v9 = vpop.f32.mrf.mxu1 }
 0x14a   :  { %v509_v13 = vadd.f32 %v508_v9, %v1532_v60 }
 0x14b   :  { %v826_v10 = vpack.c.bf16 %v676_v28, %v676_v28  ;;  %1017 = vst [vmem:[%s2269_s3 + $0x270] sm:$0xff] %v889_v2  ;;  %v428_v2 = vadd.f32 %v1658_v45, %v1530_v59 }
 0x14c   :  { %v827_v53 = vpack.c.bf16 %v509_v13, %v340_v6 }
 0x14d   :  { %954 = vst [vmem:[%s2269_s3 + $0xf8] sm:$0xf] %v826_v10 }
 0x14e   :  { %955 = vst [vmem:[%s2269_s3 + $0xfc] sm:$0xff] %v827_v53  ;;  %v588_v19 = vpop.f32.mrf.mxu3 }
 0x14f   :  { %v589_v22 = vadd.f32 %v588_v19, %v1532_v60 }
 0x150   :  { %v677_v7 = vpop.f32.mrf.mxu2  ;;  %v342_v25 = vpop.f32.mrf.mxu0 }
 0x151   :  { %v678_v24 = vadd.f32 %v677_v7, %v1537_v3  ;;  %v891_v27 = vpack.c.bf16 %v589_v22, %v420_v16  ;;  %v343_v21 = vadd.f32 %v342_v25, %v1530_v59  ;;  %v511_v31 = vpop.f32.mrf.mxu1  ;;  %v56_v16 = vld [vmem:[%s2267_s0 + $0x150] sm:$0xff]  ;;  %v57_v22 = vld [vmem:[%s2267_s0 + $0x158] sm:$0xff] }
 0x152   :  { %v512_v33 = vadd.f32 %v511_v31, %v1532_v60 }
 0x153   :  { %v828_v17 = vpack.c.bf16 %v678_v24, %v678_v24  ;;  %1019 = vst [vmem:[%s2269_s3 + $0x27c] sm:$0xff] %v891_v27  ;;  %381 = vmatmul.bf16.gmra.mxu0 %v97_v23  ;;  %759 = vmatmul.bf16.gmra.mxu3 %v1455_v26  ;;  %v99_v27 = vpack.c.bf16 %v57_v22, %v56_v16 }
 0x154   :  { %v829_v5 = vpack.c.bf16 %v512_v33, %v343_v21  ;;  %550 = vmatmul.bf16.gmra.mxu1 %v97_v23  ;;  %v440_v16 = vadd.f32 %v1733_v57, %v1530_v59 }
 0x155   :  { %956 = vst [vmem:[%s2269_s3 + $0x104] sm:$0xf] %v828_v17  ;;  %719 = vmatmul.bf16.gmra.mxu2 %v97_v23  ;;  %v430_v23 = vadd.f32 %v1675_v61, %v1530_v59 }
 0x156   :  { %957 = vst [vmem:[%s2269_s3 + $0x108] sm:$0xff] %v829_v5  ;;  %v591_v34 = vpop.f32.mrf.mxu3 }
 0x157   :  { %v592_v36 = vadd.f32 %v591_v34, %v1532_v60 }
 0x158   :  { %v680_v8 = vpop.f32.mrf.mxu2  ;;  %v344_v38 = vpop.f32.mrf.mxu0 }
 0x159   :  { %v681_v26 = vadd.f32 %v680_v8, %v1537_v3  ;;  %v893_v39 = vpack.c.bf16 %v592_v36, %v423_v35  ;;  %v345_v42 = vadd.f32 %v344_v38, %v1530_v59  ;;  %v513_v44 = vpop.f32.mrf.mxu1  ;;  %v433_v8 = vadd.f32 %v1687_v12, %v1530_v59 }
 0x15a   :  { %v514_v47 = vadd.f32 %v513_v44, %v1532_v60 }
 0x15b   :  { %v830_v46 = vpack.c.bf16 %v681_v26, %v681_v26  ;;  %1021 = vst [vmem:[%s2269_s3 + $0x288] sm:$0xff] %v893_v39 }
 0x15c   :  { %v831_v20 = vpack.c.bf16 %v514_v47, %v345_v42 }
 0x15d   :  { %958 = vst [vmem:[%s2269_s3 + $0x110] sm:$0xf] %v830_v46 }
 0x15e   :  { %959 = vst [vmem:[%s2269_s3 + $0x114] sm:$0xff] %v831_v20  ;;  %v593_v50 = vpop.f32.mrf.mxu3 }
 0x15f   :  { %v594_v52 = vadd.f32 %v593_v50, %v1532_v60 }
 0x160   :  { %v682_v54 = vpop.f32.mrf.mxu2  ;;  %v347_v41 = vpop.f32.mrf.mxu0 }
 0x161   :  { %v683_v58 = vadd.f32 %v682_v54, %v1537_v3  ;;  %v895_v4 = vpack.c.bf16 %v594_v52, %v425_v51  ;;  %v348_v62 = vadd.f32 %v347_v41, %v1530_v59  ;;  %v516_v63 = vpop.f32.mrf.mxu1  ;;  %v435_v51 = vadd.f32 %v1704_v29, %v1530_v59 }
 0x162   :  { %v517_v28 = vadd.f32 %v516_v63, %v1532_v60 }
 0x163   :  { %v832_v0 = vpack.c.bf16 %v683_v58, %v683_v58  ;;  %1023 = vst [vmem:[%s2269_s3 + $0x294] sm:$0xff] %v895_v4  ;;  %386 = vmatmul.bf16.gmra.mxu0 %v98_v56  ;;  %764 = vmatmul.bf16.gmra.mxu3 %v1473_v37 }
 0x164   :  { %v833_v32 = vpack.c.bf16 %v517_v28, %v348_v62  ;;  %555 = vmatmul.bf16.gmra.mxu1 %v98_v56 }
 0x165   :  { %960 = vst [vmem:[%s2269_s3 + $0x11c] sm:$0xf] %v832_v0  ;;  %724 = vmatmul.bf16.gmra.mxu2 %v98_v56  ;;  %v100_v56 = vpack.c.bf16 %v59_v15, %v58_v48 }
 0x166   :  { %961 = vst [vmem:[%s2269_s3 + $0x120] sm:$0xff] %v833_v32  ;;  %v596_v1 = vpop.f32.mrf.mxu3 }
 0x167   :  { %v597_v6 = vadd.f32 %v596_v1, %v1532_v60  ;;  %v438_v1 = vadd.f32 %v1716_v40, %v1530_v59 }
 0x168   :  { %v685_v9 = vpop.f32.mrf.mxu2  ;;  %v349_v10 = vpop.f32.mrf.mxu0 }
 0x169   :  { %v686_v37 = vadd.f32 %v685_v9, %v1537_v3  ;;  %v897_v13 = vpack.c.bf16 %v597_v6, %v428_v2  ;;  %v350_v53 = vadd.f32 %v349_v10, %v1530_v59  ;;  %v518_v14 = vpop.f32.mrf.mxu1 }
 0x16a   :  { %v519_v19 = vadd.f32 %v518_v14, %v1532_v60 }
 0x16b   :  { %v834_v18 = vpack.c.bf16 %v686_v37, %v686_v37  ;;  %1025 = vst [vmem:[%s2269_s3 + $0x2a0] sm:$0xff] %v897_v13 }
 0x16c   :  { %v835_v45 = vpack.c.bf16 %v519_v19, %v350_v53  ;;  %v61_v19 = vld [vmem:[%s2267_s0 + $0x178] sm:$0xff] }
 0x16d   :  { %962 = vst [vmem:[%s2269_s3 + $0x128] sm:$0xf] %v834_v18  ;;  %v60_v18 = vld [vmem:[%s2267_s0 + $0x170] sm:$0xff] }
 0x16e   :  { %963 = vst [vmem:[%s2269_s3 + $0x12c] sm:$0xff] %v835_v45  ;;  %v598_v7 = vpop.f32.mrf.mxu3 }
 0x16f   :  { %v599_v24 = vadd.f32 %v598_v7, %v1532_v60 }
 0x170   :  { %v687_v25 = vpop.f32.mrf.mxu2  ;;  %v352_v31 = vpop.f32.mrf.mxu0 }
 0x171   :  { %v688_v21 = vadd.f32 %v687_v25, %v1537_v3  ;;  %v899_v17 = vpack.c.bf16 %v599_v24, %v430_v23  ;;  %v353_v33 = vadd.f32 %v352_v31, %v1530_v59  ;;  %v521_v5 = vpop.f32.mrf.mxu1  ;;  %v101_v23 = vpack.c.bf16 %v61_v19, %v60_v18 }
 0x172   :  { %v522_v35 = vadd.f32 %v521_v5, %v1532_v60 }
 0x173   :  { %v836_v34 = vpack.c.bf16 %v688_v21, %v688_v21  ;;  %1027 = vst [vmem:[%s2269_s3 + $0x2ac] sm:$0xff] %v899_v17  ;;  %391 = vmatmul.bf16.gmra.mxu0 %v99_v27  ;;  %769 = vmatmul.bf16.gmra.mxu3 %v1488_v43 }
 0x174   :  { %v837_v61 = vpack.c.bf16 %v522_v35, %v353_v33  ;;  %560 = vmatmul.bf16.gmra.mxu1 %v99_v27 }
 0x175   :  { %964 = vst [vmem:[%s2269_s3 + $0x134] sm:$0xf] %v836_v34  ;;  %729 = vmatmul.bf16.gmra.mxu2 %v99_v27  ;;  %v443_v34 = vadd.f32 %v1745_v11, %v1530_v59 }
 0x176   :  { %965 = vst [vmem:[%s2269_s3 + $0x138] sm:$0xff] %v837_v61  ;;  %v601_v36 = vpop.f32.mrf.mxu3 }
 0x177   :  { %v602_v26 = vadd.f32 %v601_v36, %v1532_v60 }
 0x178   :  { %v690_v38 = vpop.f32.mrf.mxu2  ;;  %v354_v39 = vpop.f32.mrf.mxu0 }
 0x179   :  { %v691_v43 = vadd.f32 %v690_v38, %v1537_v3  ;;  %v901_v42 = vpack.c.bf16 %v602_v26, %v433_v8  ;;  %v355_v44 = vadd.f32 %v354_v39, %v1530_v59  ;;  %v523_v46 = vpop.f32.mrf.mxu1 }
 0x17a   :  { %v524_v20 = vadd.f32 %v523_v46, %v1532_v60 }
 0x17b   :  { %v838_v47 = vpack.c.bf16 %v691_v43, %v691_v43  ;;  %1029 = vst [vmem:[%s2269_s3 + $0x2b8] sm:$0xff] %v901_v42 }
 0x17c   :  { %v839_v12 = vpack.c.bf16 %v524_v20, %v355_v44  ;;  %v445_v44 = vadd.f32 %v1762_v30, %v1530_v59 }
 0x17d   :  { %966 = vst [vmem:[%s2269_s3 + $0x140] sm:$0xf] %v838_v47 }
 0x17e   :  { %967 = vst [vmem:[%s2269_s3 + $0x144] sm:$0xff] %v839_v12  ;;  %v603_v50 = vpop.f32.mrf.mxu3 }
 0x17f   :  { %v604_v52 = vadd.f32 %v603_v50, %v1532_v60 }
 0x180   :  { %v692_v54 = vpop.f32.mrf.mxu2  ;;  %v357_v41 = vpop.f32.mrf.mxu0 }
 0x181   :  { %v693_v58 = vadd.f32 %v692_v54, %v1537_v3  ;;  %v903_v4 = vpack.c.bf16 %v604_v52, %v435_v51  ;;  %v358_v62 = vadd.f32 %v357_v41, %v1530_v59  ;;  %v526_v63 = vpop.f32.mrf.mxu1 }
 0x182   :  { %v527_v28 = vadd.f32 %v526_v63, %v1532_v60 }
 0x183   :  { %v840_v0 = vpack.c.bf16 %v693_v58, %v693_v58  ;;  %1031 = vst [vmem:[%s2269_s3 + $0x2c4] sm:$0xff] %v903_v4  ;;  %396 = vmatmul.bf16.gmra.mxu0 %v100_v56  ;;  %774 = vmatmul.bf16.gmra.mxu3 %v1503_v49 }
 0x184   :  { %v841_v29 = vpack.c.bf16 %v527_v28, %v358_v62  ;;  %565 = vmatmul.bf16.gmra.mxu1 %v100_v56 }
 0x185   :  { %968 = vst [vmem:[%s2269_s3 + $0x14c] sm:$0xf] %v840_v0  ;;  %734 = vmatmul.bf16.gmra.mxu2 %v100_v56 }
 0x186   :  { %969 = vst [vmem:[%s2269_s3 + $0x150] sm:$0xff] %v841_v29  ;;  %v606_v32 = vpop.f32.mrf.mxu3 }
 0x187   :  { %v607_v2 = vadd.f32 %v606_v32, %v1532_v60 }
 0x188   :  { %v695_v6 = vpop.f32.mrf.mxu2  ;;  %v359_v9 = vpop.f32.mrf.mxu0 }
 0x189   :  { %v696_v49 = vadd.f32 %v695_v6, %v1537_v3  ;;  %v905_v37 = vpack.c.bf16 %v607_v2, %v438_v1  ;;  %v360_v10 = vadd.f32 %v359_v9, %v1530_v59  ;;  %v528_v13 = vpop.f32.mrf.mxu1 }
 0x18a   :  { %v529_v14 = vadd.f32 %v528_v13, %v1532_v60 }
 0x18b   :  { %v842_v53 = vpack.c.bf16 %v696_v49, %v696_v49  ;;  %1033 = vst [vmem:[%s2269_s3 + $0x2d0] sm:$0xff] %v905_v37 }
 0x18c   :  { %v843_v40 = vpack.c.bf16 %v529_v14, %v360_v10 }
 0x18d   :  { %970 = vst [vmem:[%s2269_s3 + $0x158] sm:$0xf] %v842_v53 }
 0x18e   :  { %971 = vst [vmem:[%s2269_s3 + $0x15c] sm:$0xff] %v843_v40  ;;  %v608_v45 = vpop.f32.mrf.mxu3 }
 0x18f   :  { %v609_v22 = vadd.f32 %v608_v45, %v1532_v60 }
 0x190   :  { %v697_v7 = vpop.f32.mrf.mxu2  ;;  %v362_v25 = vpop.f32.mrf.mxu0 }
 0x191   :  { %v698_v24 = vadd.f32 %v697_v7, %v1537_v3  ;;  %v907_v27 = vpack.c.bf16 %v609_v22, %v440_v16  ;;  %v363_v21 = vadd.f32 %v362_v25, %v1530_v59  ;;  %v531_v31 = vpop.f32.mrf.mxu1 }
 0x192   :  { %v532_v33 = vadd.f32 %v531_v31, %v1532_v60 }
 0x193   :  { %v844_v17 = vpack.c.bf16 %v698_v24, %v698_v24  ;;  %1035 = vst [vmem:[%s2269_s3 + $0x2dc] sm:$0xff] %v907_v27  ;;  %401 = vmatmul.bf16.gmra.mxu0 %v101_v23  ;;  %779 = vmatmul.bf16.gmra.mxu3 %v1518_v55 }
 0x194   :  { %v845_v57 = vpack.c.bf16 %v532_v33, %v363_v21  ;;  %570 = vmatmul.bf16.gmra.mxu1 %v101_v23 }
 0x195   :  { %972 = vst [vmem:[%s2269_s3 + $0x164] sm:$0xf] %v844_v17  ;;  %739 = vmatmul.bf16.gmra.mxu2 %v101_v23 }
 0x196   :  { %973 = vst [vmem:[%s2269_s3 + $0x168] sm:$0xff] %v845_v57  ;;  %v611_v5 = vpop.f32.mrf.mxu3 }
 0x197   :  { %v612_v35 = vadd.f32 %v611_v5, %v1532_v60 }
 0x198   :  { %v700_v61 = vpop.f32.mrf.mxu2  ;;  %v364_v36 = vpop.f32.mrf.mxu0 }
 0x199   :  { %v701_v55 = vadd.f32 %v700_v61, %v1537_v3  ;;  %v909_v8 = vpack.c.bf16 %v612_v35, %v443_v34  ;;  %v365_v26 = vadd.f32 %v364_v36, %v1530_v59  ;;  %v533_v38 = vpop.f32.mrf.mxu1 }
 0x19a   :  { %v534_v39 = vadd.f32 %v533_v38, %v1532_v60 }
 0x19b   :  { %v846_v43 = vpack.c.bf16 %v701_v55, %v701_v55  ;;  %1037 = vst [vmem:[%s2269_s3 + $0x2e8] sm:$0xff] %v909_v8 }
 0x19c   :  { %v847_v11 = vpack.c.bf16 %v534_v39, %v365_v26 }
 0x19d   :  { %974 = vst [vmem:[%s2269_s3 + $0x170] sm:$0xf] %v846_v43 }
 0x19e   :  { %975 = vst [vmem:[%s2269_s3 + $0x174] sm:$0xff] %v847_v11  ;;  %v613_v42 = vpop.f32.mrf.mxu3 }
 0x19f   :  { %v614_v46 = vadd.f32 %v613_v42, %v1532_v60 }
 0x1a0   :  { %v702_v47 = vpop.f32.mrf.mxu2  ;;  %v367_v12 = vpop.f32.mrf.mxu0 }
 0x1a1   :  { %v703_v20 = vadd.f32 %v702_v47, %v1537_v3  ;;  %v911_v48 = vpack.c.bf16 %v614_v46, %v445_v44  ;;  %v368_v15 = vadd.f32 %v367_v12, %v1530_v59  ;;  %v536_v50 = vpop.f32.mrf.mxu1 }
 0x1a2   :  { %v537_v52 = vadd.f32 %v536_v50, %v1532_v60 }
 0x1a3   :  { %v848_v51 = vpack.c.bf16 %v703_v20, %v703_v20  ;;  %1039 = vst [vmem:[%s2269_s3 + $0x2f4] sm:$0xff] %v911_v48 }
 0x1a4   :  { %v849_v30 = vpack.c.bf16 %v537_v52, %v368_v15 }
 0x1a5   :  { %976 = vst [vmem:[%s2269_s3 + $0x17c] sm:$0xf] %v848_v51 }
 0x1a6   :  { %977 = vst [vmem:[%s2269_s3 + $0x180] sm:$0xff] %v849_v30  ;;  %v745_v54 = vpop.f32.mrf.mxu3 }
 0x1a7   :  { %v746_v58 = vadd.f32 %v745_v54, %v1537_v3 }
 0x1a8   :  { %v705_v56 = vpop.f32.mrf.mxu2  ;;  %v369_v4 = vpop.f32.mrf.mxu0 }
 0x1a9   :  { %v706_v41 = vadd.f32 %v705_v56, %v1537_v3  ;;  %v882_v62 = vpack.c.bf16 %v746_v58, %v746_v58  ;;  %v370_v63 = vadd.f32 %v369_v4, %v1530_v59  ;;  %v538_v0 = vpop.f32.mrf.mxu1 }
 0x1aa   :  { %v539_v29 = vadd.f32 %v538_v0, %v1532_v60 }
 0x1ab   :  { %v850_v28 = vpack.c.bf16 %v706_v41, %v706_v41  ;;  %1010 = vst [vmem:[%s2269_s3 + $0x248] sm:$0xf] %v882_v62 }
 0x1ac   :  { %v851_v32 = vpack.c.bf16 %v539_v29, %v370_v63 }
 0x1ad   :  { %978 = vst [vmem:[%s2269_s3 + $0x188] sm:$0xf] %v850_v28 }
 0x1ae   :  { %979 = vst [vmem:[%s2269_s3 + $0x18c] sm:$0xff] %v851_v32  ;;  %v747_v1 = vpop.f32.mrf.mxu3 }
 0x1af   :  { %v748_v6 = vadd.f32 %v747_v1, %v1537_v3 }
 0x1b0   :  { %v707_v2 = vpop.f32.mrf.mxu2  ;;  %v372_v9 = vpop.f32.mrf.mxu0 }
 0x1b1   :  { %v708_v49 = vadd.f32 %v707_v2, %v1537_v3  ;;  %v884_v37 = vpack.c.bf16 %v748_v6, %v748_v6  ;;  %v373_v10 = vadd.f32 %v372_v9, %v1530_v59  ;;  %v541_v13 = vpop.f32.mrf.mxu1 }
 0x1b2   :  { %v542_v14 = vadd.f32 %v541_v13, %v1532_v60 }
 0x1b3   :  { %v852_v53 = vpack.c.bf16 %v708_v49, %v708_v49  ;;  %1012 = vst [vmem:[%s2269_s3 + $0x254] sm:$0xf] %v884_v37 }
 0x1b4   :  { %v853_v40 = vpack.c.bf16 %v542_v14, %v373_v10 }
 0x1b5   :  { %980 = vst [vmem:[%s2269_s3 + $0x194] sm:$0xf] %v852_v53 }
 0x1b6   :  { %981 = vst [vmem:[%s2269_s3 + $0x198] sm:$0xff] %v853_v40  ;;  %v750_v18 = vpop.f32.mrf.mxu3 }
 0x1b7   :  { %v751_v45 = vadd.f32 %v750_v18, %v1537_v3 }
 0x1b8   :  { %v710_v19 = vpop.f32.mrf.mxu2  ;;  %v374_v22 = vpop.f32.mrf.mxu0 }
 0x1b9   :  { %v711_v16 = vadd.f32 %v710_v19, %v1537_v3  ;;  %v886_v7 = vpack.c.bf16 %v751_v45, %v751_v45  ;;  %v375_v23 = vadd.f32 %v374_v22, %v1530_v59  ;;  %v543_v24 = vpop.f32.mrf.mxu1 }
 0x1ba   :  { %v544_v27 = vadd.f32 %v543_v24, %v1532_v60 }
 0x1bb   :  { %v854_v25 = vpack.c.bf16 %v711_v16, %v711_v16  ;;  %1014 = vst [vmem:[%s2269_s3 + $0x260] sm:$0xf] %v886_v7 }
 0x1bc   :  { %v855_v21 = vpack.c.bf16 %v544_v27, %v375_v23 }
 0x1bd   :  { %982 = vst [vmem:[%s2269_s3 + $0x1a0] sm:$0xf] %v854_v25 }
 0x1be   :  { %983 = vst [vmem:[%s2269_s3 + $0x1a4] sm:$0xff] %v855_v21  ;;  %v752_v31 = vpop.f32.mrf.mxu3 }
 0x1bf   :  { %v753_v33 = vadd.f32 %v752_v31, %v1537_v3 }
 0x1c0   :  { %v712_v17 = vpop.f32.mrf.mxu2  ;;  %v377_v5 = vpop.f32.mrf.mxu0 }
 0x1c1   :  { %v713_v57 = vadd.f32 %v712_v17, %v1537_v3  ;;  %v888_v34 = vpack.c.bf16 %v753_v33, %v753_v33  ;;  %v378_v35 = vadd.f32 %v377_v5, %v1530_v59  ;;  %v546_v61 = vpop.f32.mrf.mxu1 }
 0x1c2   :  { %v547_v36 = vadd.f32 %v546_v61, %v1532_v60 }
 0x1c3   :  { %v856_v55 = vpack.c.bf16 %v713_v57, %v713_v57  ;;  %1016 = vst [vmem:[%s2269_s3 + $0x26c] sm:$0xf] %v888_v34 }
 0x1c4   :  { %v857_v8 = vpack.c.bf16 %v547_v36, %v378_v35 }
 0x1c5   :  { %984 = vst [vmem:[%s2269_s3 + $0x1ac] sm:$0xf] %v856_v55 }
 0x1c6   :  { %985 = vst [vmem:[%s2269_s3 + $0x1b0] sm:$0xff] %v857_v8  ;;  %v755_v26 = vpop.f32.mrf.mxu3 }
 0x1c7   :  { %v756_v43 = vadd.f32 %v755_v26, %v1537_v3 }
 0x1c8   :  { %v715_v38 = vpop.f32.mrf.mxu2  ;;  %v379_v11 = vpop.f32.mrf.mxu0 }
 0x1c9   :  { %v716_v39 = vadd.f32 %v715_v38, %v1537_v3  ;;  %v890_v42 = vpack.c.bf16 %v756_v43, %v756_v43  ;;  %v380_v44 = vadd.f32 %v379_v11, %v1530_v59  ;;  %v548_v46 = vpop.f32.mrf.mxu1 }
 0x1ca   :  { %v549_v20 = vadd.f32 %v548_v46, %v1532_v60 }
 0x1cb   :  { %v858_v47 = vpack.c.bf16 %v716_v39, %v716_v39  ;;  %1018 = vst [vmem:[%s2269_s3 + $0x278] sm:$0xf] %v890_v42 }
 0x1cc   :  { %v859_v12 = vpack.c.bf16 %v549_v20, %v380_v44 }
 0x1cd   :  { %986 = vst [vmem:[%s2269_s3 + $0x1b8] sm:$0xf] %v858_v47 }
 0x1ce   :  { %987 = vst [vmem:[%s2269_s3 + $0x1bc] sm:$0xff] %v859_v12  ;;  %v757_v48 = vpop.f32.mrf.mxu3 }
 0x1cf   :  { %v758_v50 = vadd.f32 %v757_v48, %v1537_v3 }
 0x1d0   :  { %v717_v15 = vpop.f32.mrf.mxu2  ;;  %v382_v52 = vpop.f32.mrf.mxu0 }
 0x1d1   :  { %v718_v51 = vadd.f32 %v717_v15, %v1537_v3  ;;  %v892_v30 = vpack.c.bf16 %v758_v50, %v758_v50  ;;  %v383_v54 = vadd.f32 %v382_v52, %v1530_v59  ;;  %v551_v56 = vpop.f32.mrf.mxu1 }
 0x1d2   :  { %v552_v41 = vadd.f32 %v551_v56, %v1532_v60 }
 0x1d3   :  { %v860_v58 = vpack.c.bf16 %v718_v51, %v718_v51  ;;  %1020 = vst [vmem:[%s2269_s3 + $0x284] sm:$0xf] %v892_v30 }
 0x1d4   :  { %v861_v4 = vpack.c.bf16 %v552_v41, %v383_v54 }
 0x1d5   :  { %988 = vst [vmem:[%s2269_s3 + $0x1c4] sm:$0xf] %v860_v58 }
 0x1d6   :  { %989 = vst [vmem:[%s2269_s3 + $0x1c8] sm:$0xff] %v861_v4  ;;  %v760_v62 = vpop.f32.mrf.mxu3 }
 0x1d7   :  { %v761_v0 = vadd.f32 %v760_v62, %v1537_v3 }
 0x1d8   :  { %v720_v63 = vpop.f32.mrf.mxu2  ;;  %v384_v29 = vpop.f32.mrf.mxu0 }
 0x1d9   :  { %v721_v28 = vadd.f32 %v720_v63, %v1537_v3  ;;  %v894_v32 = vpack.c.bf16 %v761_v0, %v761_v0  ;;  %v385_v1 = vadd.f32 %v384_v29, %v1530_v59  ;;  %v553_v2 = vpop.f32.mrf.mxu1 }
 0x1da   :  { %v554_v49 = vadd.f32 %v553_v2, %v1532_v60 }
 0x1db   :  { %v862_v6 = vpack.c.bf16 %v721_v28, %v721_v28  ;;  %1022 = vst [vmem:[%s2269_s3 + $0x290] sm:$0xf] %v894_v32 }
 0x1dc   :  { %v863_v9 = vpack.c.bf16 %v554_v49, %v385_v1 }
 0x1dd   :  { %990 = vst [vmem:[%s2269_s3 + $0x1d0] sm:$0xf] %v862_v6 }
 0x1de   :  { %991 = vst [vmem:[%s2269_s3 + $0x1d4] sm:$0xff] %v863_v9  ;;  %v762_v37 = vpop.f32.mrf.mxu3 }
 0x1df   :  { %v763_v13 = vadd.f32 %v762_v37, %v1537_v3 }
 0x1e0   :  { %v722_v10 = vpop.f32.mrf.mxu2  ;;  %v387_v14 = vpop.f32.mrf.mxu0 }
 0x1e1   :  { %v723_v53 = vadd.f32 %v722_v10, %v1537_v3  ;;  %v896_v40 = vpack.c.bf16 %v763_v13, %v763_v13  ;;  %v388_v18 = vadd.f32 %v387_v14, %v1530_v59  ;;  %v556_v19 = vpop.f32.mrf.mxu1 }
 0x1e2   :  { %v557_v16 = vadd.f32 %v556_v19, %v1532_v60 }
 0x1e3   :  { %v864_v45 = vpack.c.bf16 %v723_v53, %v723_v53  ;;  %1024 = vst [vmem:[%s2269_s3 + $0x29c] sm:$0xf] %v896_v40 }
 0x1e4   :  { %v865_v22 = vpack.c.bf16 %v557_v16, %v388_v18 }
 0x1e5   :  { %992 = vst [vmem:[%s2269_s3 + $0x1dc] sm:$0xf] %v864_v45 }
 0x1e6   :  { %993 = vst [vmem:[%s2269_s3 + $0x1e0] sm:$0xff] %v865_v22  ;;  %v765_v7 = vpop.f32.mrf.mxu3 }
 0x1e7   :  { %v766_v24 = vadd.f32 %v765_v7, %v1537_v3 }
 0x1e8   :  { %v725_v23 = vpop.f32.mrf.mxu2  ;;  %v389_v27 = vpop.f32.mrf.mxu0 }
 0x1e9   :  { %v726_v25 = vadd.f32 %v725_v23, %v1537_v3  ;;  %v898_v21 = vpack.c.bf16 %v766_v24, %v766_v24  ;;  %v390_v31 = vadd.f32 %v389_v27, %v1530_v59  ;;  %v558_v17 = vpop.f32.mrf.mxu1 }
 0x1ea   :  { %v559_v57 = vadd.f32 %v558_v17, %v1532_v60 }
 0x1eb   :  { %v866_v33 = vpack.c.bf16 %v726_v25, %v726_v25  ;;  %1026 = vst [vmem:[%s2269_s3 + $0x2a8] sm:$0xf] %v898_v21 }
 0x1ec   :  { %v867_v5 = vpack.c.bf16 %v559_v57, %v390_v31 }
 0x1ed   :  { %994 = vst [vmem:[%s2269_s3 + $0x1e8] sm:$0xf] %v866_v33 }
 0x1ee   :  { %995 = vst [vmem:[%s2269_s3 + $0x1ec] sm:$0xff] %v867_v5  ;;  %v767_v34 = vpop.f32.mrf.mxu3 }
 0x1ef   :  { %v768_v61 = vadd.f32 %v767_v34, %v1537_v3 }
 0x1f0   :  { %v727_v35 = vpop.f32.mrf.mxu2  ;;  %v392_v36 = vpop.f32.mrf.mxu0 }
 0x1f1   :  { %v728_v55 = vadd.f32 %v727_v35, %v1537_v3  ;;  %v900_v8 = vpack.c.bf16 %v768_v61, %v768_v61  ;;  %v393_v26 = vadd.f32 %v392_v36, %v1530_v59  ;;  %v561_v38 = vpop.f32.mrf.mxu1 }
 0x1f2   :  { %v562_v39 = vadd.f32 %v561_v38, %v1532_v60 }
 0x1f3   :  { %v868_v43 = vpack.c.bf16 %v728_v55, %v728_v55  ;;  %1028 = vst [vmem:[%s2269_s3 + $0x2b4] sm:$0xf] %v900_v8 }
 0x1f4   :  { %v869_v11 = vpack.c.bf16 %v562_v39, %v393_v26 }
 0x1f5   :  { %996 = vst [vmem:[%s2269_s3 + $0x1f4] sm:$0xf] %v868_v43 }
 0x1f6   :  { %997 = vst [vmem:[%s2269_s3 + $0x1f8] sm:$0xff] %v869_v11  ;;  %v770_v42 = vpop.f32.mrf.mxu3 }
 0x1f7   :  { %v771_v46 = vadd.f32 %v770_v42, %v1537_v3 }
 0x1f8   :  { %v730_v44 = vpop.f32.mrf.mxu2  ;;  %v394_v20 = vpop.f32.mrf.mxu0 }
 0x1f9   :  { %v731_v47 = vadd.f32 %v730_v44, %v1537_v3  ;;  %v902_v12 = vpack.c.bf16 %v771_v46, %v771_v46  ;;  %v395_v48 = vadd.f32 %v394_v20, %v1530_v59  ;;  %v563_v15 = vpop.f32.mrf.mxu1 }
 0x1fa   :  { %v564_v51 = vadd.f32 %v563_v15, %v1532_v60 }
 0x1fb   :  { %v870_v50 = vpack.c.bf16 %v731_v47, %v731_v47  ;;  %1030 = vst [vmem:[%s2269_s3 + $0x2c0] sm:$0xf] %v902_v12 }
 0x1fc   :  { %v871_v52 = vpack.c.bf16 %v564_v51, %v395_v48 }
 0x1fd   :  { %998 = vst [vmem:[%s2269_s3 + $0x200] sm:$0xf] %v870_v50 }
 0x1fe   :  { %999 = vst [vmem:[%s2269_s3 + $0x204] sm:$0xff] %v871_v52  ;;  %v772_v30 = vpop.f32.mrf.mxu3 }
 0x1ff   :  { %v773_v56 = vadd.f32 %v772_v30, %v1537_v3 }
 0x200   :  { %v732_v54 = vpop.f32.mrf.mxu2  ;;  %v397_v41 = vpop.f32.mrf.mxu0 }
 0x201   :  { %v733_v58 = vadd.f32 %v732_v54, %v1537_v3  ;;  %v904_v4 = vpack.c.bf16 %v773_v56, %v773_v56  ;;  %v398_v62 = vadd.f32 %v397_v41, %v1530_v59  ;;  %v566_v63 = vpop.f32.mrf.mxu1 }
 0x202   :  { %v567_v28 = vadd.f32 %v566_v63, %v1532_v60 }
 0x203   :  { %v872_v0 = vpack.c.bf16 %v733_v58, %v733_v58  ;;  %1032 = vst [vmem:[%s2269_s3 + $0x2cc] sm:$0xf] %v904_v4 }
 0x204   :  { %v873_v29 = vpack.c.bf16 %v567_v28, %v398_v62 }
 0x205   :  { %1000 = vst [vmem:[%s2269_s3 + $0x20c] sm:$0xf] %v872_v0 }
 0x206   :  { %1001 = vst [vmem:[%s2269_s3 + $0x210] sm:$0xff] %v873_v29  ;;  %v775_v32 = vpop.f32.mrf.mxu3 }
 0x207   :  { %v776_v2 = vadd.f32 %v775_v32, %v1537_v3 }
 0x208   :  { %v735_v1 = vpop.f32.mrf.mxu2  ;;  %v399_v49 = vpop.f32.mrf.mxu0 }
 0x209   :  { %v736_v6 = vadd.f32 %v735_v1, %v1537_v3  ;;  %v906_v9 = vpack.c.bf16 %v776_v2, %v776_v2  ;;  %v400_v37 = vadd.f32 %v399_v49, %v1530_v59  ;;  %v568_v10 = vpop.f32.mrf.mxu1 }
 0x20a   :  { %v569_v53 = vadd.f32 %v568_v10, %v1532_v60 }
 0x20b   :  { %v874_v13 = vpack.c.bf16 %v736_v6, %v736_v6  ;;  %1034 = vst [vmem:[%s2269_s3 + $0x2d8] sm:$0xf] %v906_v9 }
 0x20c   :  { %v875_v14 = vpack.c.bf16 %v569_v53, %v400_v37 }
 0x20d   :  { %1002 = vst [vmem:[%s2269_s3 + $0x218] sm:$0xf] %v874_v13 }
 0x20e   :  { %1003 = vst [vmem:[%s2269_s3 + $0x21c] sm:$0xff] %v875_v14  ;;  %v777_v40 = vpop.f32.mrf.mxu3 }
 0x20f   :  { %v778_v19 = vadd.f32 %v777_v40, %v1537_v3 }
 0x210   :  { %v737_v18 = vpop.f32.mrf.mxu2  ;;  %v402_v16 = vpop.f32.mrf.mxu0 }
 0x211   :  { %v738_v45 = vadd.f32 %v737_v18, %v1537_v3  ;;  %v908_v22 = vpack.c.bf16 %v778_v19, %v778_v19  ;;  %v403_v7 = vadd.f32 %v402_v16, %v1530_v59  ;;  %v571_v23 = vpop.f32.mrf.mxu1 }
 0x212   :  { %v572_v25 = vadd.f32 %v571_v23, %v1532_v60 }
 0x213   :  { %v876_v24 = vpack.c.bf16 %v738_v45, %v738_v45  ;;  %1036 = vst [vmem:[%s2269_s3 + $0x2e4] sm:$0xf] %v908_v22 }
 0x214   :  { %v877_v27 = vpack.c.bf16 %v572_v25, %v403_v7 }
 0x215   :  { %1004 = vst [vmem:[%s2269_s3 + $0x224] sm:$0xf] %v876_v24 }
 0x216   :  { %1005 = vst [vmem:[%s2269_s3 + $0x228] sm:$0xff] %v877_v27  ;;  %v780_v21 = vpop.f32.mrf.mxu3 }
 0x217   :  { %v781_v17 = vadd.f32 %v780_v21, %v1537_v3 }
 0x218   :  { %v740_v31 = vpop.f32.mrf.mxu2  ;;  %v404_v57 = vpop.f32.mrf.mxu0 }
 0x219   :  { %v741_v33 = vadd.f32 %v740_v31, %v1537_v3  ;;  %v910_v5 = vpack.c.bf16 %v781_v17, %v781_v17  ;;  %v405_v34 = vadd.f32 %v404_v57, %v1530_v59  ;;  %v573_v35 = vpop.f32.mrf.mxu1 }
 0x21a   :  { %v574_v55 = vadd.f32 %v573_v35, %v1532_v60 }
 0x21b   :  { %v878_v61 = vpack.c.bf16 %v741_v33, %v741_v33  ;;  %1038 = vst [vmem:[%s2269_s3 + $0x2f0] sm:$0xf] %v910_v5 }
 0x21c   :  { %v879_v36 = vpack.c.bf16 %v574_v55, %v405_v34 }
 0x21d   :  { %1006 = vst [vmem:[%s2269_s3 + $0x230] sm:$0xf] %v878_v61 }
 0x21e   :  { %1007 = vst [vmem:[%s2269_s3 + $0x234] sm:$0xff] %v879_v36  ;;  %v782_v8 = vpop.f32.mrf.mxu3 }
 0x21f   :  { %v783_v59 = vadd.f32 %v782_v8, %v1537_v3 }
 0x220   :  { %v742_v26 = vpop.f32.mrf.mxu2 }
 0x221   :  { %v743_v38 = vadd.f32 %v742_v26, %v1537_v3  ;;  %v912_v60 = vpack.c.bf16 %v783_v59, %v783_v59 }
 0x223   :  { %v880_v43 = vpack.c.bf16 %v743_v38, %v743_v38  ;;  %1040 = vst [vmem:[%s2269_s3 + $0x2fc] sm:$0xf] %v912_v60 }
 0x225   :  { %1008 = vst [vmem:[%s2269_s3 + $0x23c] sm:$0xf] %v880_v43 }

</bundles_post_ra>
